<compile_context>
chip_gen: v7x
topology: tpu7x:2x2x1
jax: 0.10.0
libtpu: 0.0.40
codegen_flags: <defaults>
</compile_context>

<pallas_src>
import functools

import jax
import jax.numpy as jnp
from jax import lax
from jax.experimental import pallas as pl
from jax.experimental.pallas import tpu as pltpu

_HI = lax.Precision.HIGHEST


def _sigmoid(x):
    # Single EUP (tanh) instead of exp + reciprocal; identical to sigmoid
    # within f32 ulps.
    return 0.5 * (jnp.tanh(0.5 * x) + 1.0)


# ---------------------------------------------------------------------------
# Fused kernel.
#   x_ref    : (T_in*B, D)   time-major flattened encoder input
#   w_ih1_ref: (D, 4H)       encoder input weights
#   b1_ref   : (1, 4H)       encoder combined bias (b_ih + b_hh)
#   w_hh1_ref: (H, 4H)       encoder recurrent weights
#   w_hh2_ref: (H, 4H)       decoder recurrent weights
#   b2_ref   : (1, 4H)       decoder combined bias
#   y_ref    : (B, T_out*H)  decoder hidden states, lane-dense single store
#   gx_scr   : (T_in*B, 4H)  VMEM scratch for the hoisted input projection
# ---------------------------------------------------------------------------
def _seq2seq_kernel(x_ref, w_ih1_ref, b1_ref, w_hh1_ref, w_hh2_ref, b2_ref,
                    y_ref, gx_scr):
    TB, _ = x_ref.shape
    H = w_hh1_ref.shape[0]
    B, TH = y_ref.shape
    T_in = TB // B
    T_out = TH // H

    w_hh1 = w_hh1_ref[...]
    w_hh2 = w_hh2_ref[...]
    b2 = b2_ref[...]

    # Encoder input projection: one big matmul, off the serial recurrence
    # chain; result staged in VMEM scratch, read back one (B, 4H) slab/step.
    gx_scr[...] = (
        jnp.dot(x_ref[...], w_ih1_ref[...],
                preferred_element_type=jnp.float32, precision=_HI)
        + b1_ref[...])

    def cell(gates, c):
        # PyTorch gate order [i, f, g, o].
        i = _sigmoid(gates[:, 0 * H:1 * H])
        f = _sigmoid(gates[:, 1 * H:2 * H])
        g = jnp.tanh(gates[:, 2 * H:3 * H])
        o = _sigmoid(gates[:, 3 * H:4 * H])
        c_new = f * c + i * g
        h_new = o * jnp.tanh(c_new)
        return h_new, c_new

    h = jnp.zeros((B, H), jnp.float32)
    c = jnp.zeros((B, H), jnp.float32)

    # --- Encoder (seq1): per-step work is one (B,H)@(H,4H) dot + gates. -----
    for t in range(T_in):
        gates = gx_scr[pl.ds(t * B, B), :] + jnp.dot(
            h, w_hh1, preferred_element_type=jnp.float32, precision=_HI)
        h, c = cell(gates, c)

    # --- Decoder (seq2): input is identically zero -> no input matmul. ------
    hs = []
    for t in range(T_out):
        gates = jnp.dot(h, w_hh2, preferred_element_type=jnp.float32,
                        precision=_HI) + b2
        h, c = cell(gates, c)
        hs.append(h)

    # Single lane-dense store: (B, T_out*H).
    y_ref[...] = jnp.concatenate(hs, axis=1)


# ---------------------------------------------------------------------------
# Wrapper: one pallas_call; output reshape is a free row-major split.
# ---------------------------------------------------------------------------
def seq2seq_pallas(x, params, output_shape):
    """x: (B, T_in, D) batch-first.  Returns y: (B, T_out, H)."""
    B, T_in, D = x.shape
    T_out, H = output_shape

    # Time-major flatten so each encoder step reads a contiguous (B, D) slab.
    # (Tiny: (T_in*B, D) f32; the big (T_in, B, 4H) gx intermediate of the old
    # version no longer round-trips HBM.)
    x_tm = jnp.swapaxes(x, 0, 1).reshape(T_in * B, D)

    grid_spec = pltpu.PrefetchScalarGridSpec(
        num_scalar_prefetch=0,
        grid=(1,),
        in_specs=[
            pl.BlockSpec((T_in * B, D), lambda i: (0, 0)),      # x_tm
            pl.BlockSpec((D, 4 * H), lambda i: (0, 0)),          # w_ih1
            pl.BlockSpec((1, 4 * H), lambda i: (0, 0)),          # b1
            pl.BlockSpec((H, 4 * H), lambda i: (0, 0)),          # w_hh1
            pl.BlockSpec((H, 4 * H), lambda i: (0, 0)),          # w_hh2
            pl.BlockSpec((1, 4 * H), lambda i: (0, 0)),          # b2
        ],
        out_specs=pl.BlockSpec((B, T_out * H), lambda i: (0, 0)),
        scratch_shapes=[pltpu.VMEM((T_in * B, 4 * H), jnp.float32)],
    )

    y_flat = pl.pallas_call(
        _seq2seq_kernel,
        out_shape=jax.ShapeDtypeStruct((B, T_out * H), jnp.float32),
        grid_spec=grid_spec,
        compiler_params=pltpu.CompilerParams(
            dimension_semantics=("arbitrary",),
            vmem_limit_bytes=32 * 1024 * 1024),
    )(x_tm, params["w_ih1"], params["b1"], params["w_hh1"],
      params["w_hh2"], params["b2"])

    # (B, T_out*H) -> (B, T_out, H): pure metadata reshape, no transpose.
    return y_flat.reshape(B, T_out, H)


# ---------------------------------------------------------------------------
# Pure-JAX reference (lax.scan), faithful to the torch module (including the
# zero decoder input and its w_ih2 matmul) for the correctness check.
# ---------------------------------------------------------------------------
def _lstm_ref(x_bf, w_ih, w_hh, b, h0, c0):
    H = h0.shape[-1]

    def step(carry, x_t):
        h, c = carry
        gates = (jnp.dot(x_t, w_ih, precision=_HI)
                 + jnp.dot(h, w_hh, precision=_HI) + b)
        i = jax.nn.sigmoid(gates[:, 0 * H:1 * H])
        f = jax.nn.sigmoid(gates[:, 1 * H:2 * H])
        g = jnp.tanh(gates[:, 2 * H:3 * H])
        o = jax.nn.sigmoid(gates[:, 3 * H:4 * H])
        c = f * c + i * g
        h = o * jnp.tanh(c)
        return (h, c), h

    (hN, cN), ys = jax.lax.scan(step, (h0, c0), jnp.transpose(x_bf, (1, 0, 2)))
    return jnp.transpose(ys, (1, 0, 2)), hN, cN


def seq2seq_ref(x, params, output_shape):
    B = x.shape[0]
    T_out, H = output_shape
    h0 = jnp.zeros((B, H), jnp.float32)
    c0 = jnp.zeros((B, H), jnp.float32)
    _, h1, c1 = _lstm_ref(x, params["w_ih1"], params["w_hh1"], params["b1"],
                          h0, c0)
    z = jnp.zeros((B, T_out, H), jnp.float32)
    y, _, _ = _lstm_ref(z, params["w_ih2"], params["w_hh2"], params["b2"],
                        h1, c1)
    return y


# ---------------------------------------------------------------------------
# Deterministic synthetic parameters (PyTorch-style init, combined biases).
# ---------------------------------------------------------------------------
def make_params(key, input_size, hidden_size):
    ks = jax.random.split(key, 10)
    s = 1.0 / jnp.sqrt(hidden_size)

    def u(k, shape):
        return jax.random.uniform(k, shape, jnp.float32, -s, s)

    return {
        # layer 1: input_size -> hidden
        "w_ih1": u(ks[0], (input_size, 4 * hidden_size)),
        "w_hh1": u(ks[1], (hidden_size, 4 * hidden_size)),
        "b1": u(ks[2], (1, 4 * hidden_size)) + u(ks[3], (1, 4 * hidden_size)),
        # layer 2: hidden -> hidden.  w_ih2 is only used by the reference;
        # the Pallas path drops it because the decoder input is exactly zero.
        "w_ih2": u(ks[4], (hidden_size, 4 * hidden_size)),
        "w_hh2": u(ks[5], (hidden_size, 4 * hidden_size)),
        "b2": u(ks[6], (1, 4 * hidden_size)) + u(ks[7], (1, 4 * hidden_size)),
    }


if __name__ == "__main__":
    # Module config: input_shape=(T_in, input_size), output_shape=(T_out, hidden)
    input_shape = (8, 16)    # T_in=8,  input_size=16
    output_shape = (8, 32)   # T_out=8, hidden=32
    B = 2

    key = jax.random.PRNGKey(0)
    k_x, k_p = jax.random.split(key)
    x = jax.random.normal(k_x, (B,) + input_shape, jnp.float32)   # (2, 8, 16)
    params = make_params(k_p, input_shape[1], output_shape[1])

    fwd = jax.jit(functools.partial(seq2seq_pallas, output_shape=output_shape))
    y = fwd(x, params)
    jax.block_until_ready(y)

    y_ref = seq2seq_ref(x, params, output_shape)
    assert y.shape == (B,) + output_shape
    assert jnp.allclose(y, y_ref, atol=1e-4, rtol=1e-4), "mismatch vs reference"

    print("KERNEL_OK")
</pallas_src>

<mosaic_0001>
module attributes {stable_mosaic.version = 11 : i64} {
  func.func @_seq2seq_kernel(%arg0: i32, %arg1: memref<16x16xf32, #tpu.memory_space<vmem>>, %arg2: memref<16x128xf32, #tpu.memory_space<vmem>>, %arg3: memref<1x128xf32, #tpu.memory_space<vmem>>, %arg4: memref<32x128xf32, #tpu.memory_space<vmem>>, %arg5: memref<32x128xf32, #tpu.memory_space<vmem>>, %arg6: memref<1x128xf32, #tpu.memory_space<vmem>>, %arg7: memref<2x256xf32, #tpu.memory_space<vmem>>, %arg8: memref<16x128xf32, #tpu.memory_space<vmem>>) attributes {dimension_semantics = [#tpu.dimension_semantics<arbitrary>], iteration_bounds = array<i64: 1>, scalar_prefetch = 0 : i64, scratch_operands = 1 : i64, tpu.core_type = #tpu.core_type<tc>, window_params = [{pipeline_mode = #tpu.pipeline_mode<synchronous>, transform_indices = @transform_0, window_bounds = array<i64: 16, 16>}, {pipeline_mode = #tpu.pipeline_mode<synchronous>, transform_indices = @transform_1, window_bounds = array<i64: 16, 128>}, {pipeline_mode = #tpu.pipeline_mode<synchronous>, transform_indices = @transform_2, window_bounds = array<i64: 1, 128>}, {pipeline_mode = #tpu.pipeline_mode<synchronous>, transform_indices = @transform_3, window_bounds = array<i64: 32, 128>}, {pipeline_mode = #tpu.pipeline_mode<synchronous>, transform_indices = @transform_4, window_bounds = array<i64: 32, 128>}, {pipeline_mode = #tpu.pipeline_mode<synchronous>, transform_indices = @transform_5, window_bounds = array<i64: 1, 128>}, {pipeline_mode = #tpu.pipeline_mode<synchronous>, transform_indices = @transform_6, window_bounds = array<i64: 2, 256>}]} {
    %c0 = arith.constant 0 : index
    %c0_0 = arith.constant 0 : index
    %0 = vector.load %arg4[%c0, %c0_0] : memref<32x128xf32, #tpu.memory_space<vmem>>, vector<32x128xf32>
    %c0_1 = arith.constant 0 : index
    %c0_2 = arith.constant 0 : index
    %1 = vector.load %arg5[%c0_1, %c0_2] : memref<32x128xf32, #tpu.memory_space<vmem>>, vector<32x128xf32>
    %c0_3 = arith.constant 0 : index
    %c0_4 = arith.constant 0 : index
    %2 = vector.load %arg6[%c0_3, %c0_4] : memref<1x128xf32, #tpu.memory_space<vmem>>, vector<1x128xf32>
    %c0_5 = arith.constant 0 : index
    %c0_6 = arith.constant 0 : index
    %3 = vector.load %arg1[%c0_5, %c0_6] : memref<16x16xf32, #tpu.memory_space<vmem>>, vector<16x16xf32>
    %c0_7 = arith.constant 0 : index
    %c0_8 = arith.constant 0 : index
    %4 = vector.load %arg2[%c0_7, %c0_8] : memref<16x128xf32, #tpu.memory_space<vmem>>, vector<16x128xf32>
    %cst = arith.constant dense<0.000000e+00> : vector<16x128xf32>
    %5 = tpu.matmul %3, %4, %cst {dimension_numbers = #tpu.dot_dimension_numbers<[1], [0], [0], [1], [0, 0, 1, 1], [], []>, precision = #tpu.contract_precision<fp32>} : vector<16x16xf32>, vector<16x128xf32>, vector<16x128xf32> -> vector<16x128xf32>
    %c0_9 = arith.constant 0 : index
    %c0_10 = arith.constant 0 : index
    %6 = vector.load %arg3[%c0_9, %c0_10] : memref<1x128xf32, #tpu.memory_space<vmem>>, vector<1x128xf32>
    %7 = vector.broadcast %6 : vector<1x128xf32> to vector<16x128xf32>
    %8 = arith.addf %5, %7 : vector<16x128xf32>
    %c0_11 = arith.constant 0 : index
    %c0_12 = arith.constant 0 : index
    %9 = vector.load %arg8[%c0_11, %c0_12] : memref<16x128xf32, #tpu.memory_space<vmem>>, vector<16x128xf32>
    tpu.vector_store %arg8[%c0_11, %c0_12], %8 {strides = array<i32>} : memref<16x128xf32, #tpu.memory_space<vmem>>, vector<16x128xf32>,
    %cst_13 = arith.constant 0.000000e+00 : f32
    %10 = vector.broadcast %cst_13 : f32 to vector<2x32xf32>
    %cst_14 = arith.constant 0.000000e+00 : f32
    %11 = vector.broadcast %cst_14 : f32 to vector<2x32xf32>
    %c0_15 = arith.constant 0 : index
    %c0_16 = arith.constant 0 : index
    %12 = vector.load %arg8[%c0_15, %c0_16] : memref<16x128xf32, #tpu.memory_space<vmem>>, vector<2x128xf32>
    %cst_17 = arith.constant dense<0.000000e+00> : vector<2x128xf32>
    %13 = tpu.matmul %10, %0, %cst_17 {dimension_numbers = #tpu.dot_dimension_numbers<[1], [0], [0], [1], [0, 0, 1, 1], [], []>, precision = #tpu.contract_precision<fp32>} : vector<2x32xf32>, vector<32x128xf32>, vector<2x128xf32> -> vector<2x128xf32>
    %14 = arith.addf %12, %13 : vector<2x128xf32>
    %15 = vector.extract_strided_slice %14 {offsets = [0, 0], sizes = [2, 32], strides = [1, 1]} : vector<2x128xf32> to vector<2x32xf32>
    %cst_18 = arith.constant 5.000000e-01 : f32
    %16 = vector.broadcast %cst_18 : f32 to vector<2x32xf32>
    %17 = arith.mulf %16, %15 : vector<2x32xf32>
    %18 = math.tanh %17 : vector<2x32xf32>
    %cst_19 = arith.constant 1.000000e+00 : f32
    %19 = vector.broadcast %cst_19 : f32 to vector<2x32xf32>
    %20 = arith.addf %18, %19 : vector<2x32xf32>
    %cst_20 = arith.constant 5.000000e-01 : f32
    %21 = vector.broadcast %cst_20 : f32 to vector<2x32xf32>
    %22 = arith.mulf %21, %20 : vector<2x32xf32>
    %23 = vector.extract_strided_slice %14 {offsets = [0, 32], sizes = [2, 32], strides = [1, 1]} : vector<2x128xf32> to vector<2x32xf32>
    %cst_21 = arith.constant 5.000000e-01 : f32
    %24 = vector.broadcast %cst_21 : f32 to vector<2x32xf32>
    %25 = arith.mulf %24, %23 : vector<2x32xf32>
    %26 = math.tanh %25 : vector<2x32xf32>
    %cst_22 = arith.constant 1.000000e+00 : f32
    %27 = vector.broadcast %cst_22 : f32 to vector<2x32xf32>
    %28 = arith.addf %26, %27 : vector<2x32xf32>
    %cst_23 = arith.constant 5.000000e-01 : f32
    %29 = vector.broadcast %cst_23 : f32 to vector<2x32xf32>
    %30 = arith.mulf %29, %28 : vector<2x32xf32>
    %31 = vector.extract_strided_slice %14 {offsets = [0, 64], sizes = [2, 32], strides = [1, 1]} : vector<2x128xf32> to vector<2x32xf32>
    %32 = math.tanh %31 : vector<2x32xf32>
    %33 = vector.extract_strided_slice %14 {offsets = [0, 96], sizes = [2, 32], strides = [1, 1]} : vector<2x128xf32> to vector<2x32xf32>
    %cst_24 = arith.constant 5.000000e-01 : f32
    %34 = vector.broadcast %cst_24 : f32 to vector<2x32xf32>
    %35 = arith.mulf %34, %33 : vector<2x32xf32>
    %36 = math.tanh %35 : vector<2x32xf32>
    %cst_25 = arith.constant 1.000000e+00 : f32
    %37 = vector.broadcast %cst_25 : f32 to vector<2x32xf32>
    %38 = arith.addf %36, %37 : vector<2x32xf32>
    %cst_26 = arith.constant 5.000000e-01 : f32
    %39 = vector.broadcast %cst_26 : f32 to vector<2x32xf32>
    %40 = arith.mulf %39, %38 : vector<2x32xf32>
    %41 = arith.mulf %30, %11 : vector<2x32xf32>
    %42 = arith.mulf %22, %32 : vector<2x32xf32>
    %43 = arith.addf %41, %42 : vector<2x32xf32>
    %44 = math.tanh %43 : vector<2x32xf32>
    %45 = arith.mulf %40, %44 : vector<2x32xf32>
    %c2 = arith.constant 2 : index
    %c0_27 = arith.constant 0 : index
    %46 = vector.load %arg8[%c2, %c0_27] : memref<16x128xf32, #tpu.memory_space<vmem>>, vector<2x128xf32>
    %cst_28 = arith.constant dense<0.000000e+00> : vector<2x128xf32>
    %47 = tpu.matmul %45, %0, %cst_28 {dimension_numbers = #tpu.dot_dimension_numbers<[1], [0], [0], [1], [0, 0, 1, 1], [], []>, precision = #tpu.contract_precision<fp32>} : vector<2x32xf32>, vector<32x128xf32>, vector<2x128xf32> -> vector<2x128xf32>
    %48 = arith.addf %46, %47 : vector<2x128xf32>
    %49 = vector.extract_strided_slice %48 {offsets = [0, 0], sizes = [2, 32], strides = [1, 1]} : vector<2x128xf32> to vector<2x32xf32>
    %cst_29 = arith.constant 5.000000e-01 : f32
    %50 = vector.broadcast %cst_29 : f32 to vector<2x32xf32>
    %51 = arith.mulf %50, %49 : vector<2x32xf32>
    %52 = math.tanh %51 : vector<2x32xf32>
    %cst_30 = arith.constant 1.000000e+00 : f32
    %53 = vector.broadcast %cst_30 : f32 to vector<2x32xf32>
    %54 = arith.addf %52, %53 : vector<2x32xf32>
    %cst_31 = arith.constant 5.000000e-01 : f32
    %55 = vector.broadcast %cst_31 : f32 to vector<2x32xf32>
    %56 = arith.mulf %55, %54 : vector<2x32xf32>
    %57 = vector.extract_strided_slice %48 {offsets = [0, 32], sizes = [2, 32], strides = [1, 1]} : vector<2x128xf32> to vector<2x32xf32>
    %cst_32 = arith.constant 5.000000e-01 : f32
    %58 = vector.broadcast %cst_32 : f32 to vector<2x32xf32>
    %59 = arith.mulf %58, %57 : vector<2x32xf32>
    %60 = math.tanh %59 : vector<2x32xf32>
    %cst_33 = arith.constant 1.000000e+00 : f32
    %61 = vector.broadcast %cst_33 : f32 to vector<2x32xf32>
    %62 = arith.addf %60, %61 : vector<2x32xf32>
    %cst_34 = arith.constant 5.000000e-01 : f32
    %63 = vector.broadcast %cst_34 : f32 to vector<2x32xf32>
    %64 = arith.mulf %63, %62 : vector<2x32xf32>
    %65 = vector.extract_strided_slice %48 {offsets = [0, 64], sizes = [2, 32], strides = [1, 1]} : vector<2x128xf32> to vector<2x32xf32>
    %66 = math.tanh %65 : vector<2x32xf32>
    %67 = vector.extract_strided_slice %48 {offsets = [0, 96], sizes = [2, 32], strides = [1, 1]} : vector<2x128xf32> to vector<2x32xf32>
    %cst_35 = arith.constant 5.000000e-01 : f32
    %68 = vector.broadcast %cst_35 : f32 to vector<2x32xf32>
    %69 = arith.mulf %68, %67 : vector<2x32xf32>
    %70 = math.tanh %69 : vector<2x32xf32>
    %cst_36 = arith.constant 1.000000e+00 : f32
    %71 = vector.broadcast %cst_36 : f32 to vector<2x32xf32>
    %72 = arith.addf %70, %71 : vector<2x32xf32>
    %cst_37 = arith.constant 5.000000e-01 : f32
    %73 = vector.broadcast %cst_37 : f32 to vector<2x32xf32>
    %74 = arith.mulf %73, %72 : vector<2x32xf32>
    %75 = arith.mulf %64, %43 : vector<2x32xf32>
    %76 = arith.mulf %56, %66 : vector<2x32xf32>
    %77 = arith.addf %75, %76 : vector<2x32xf32>
    %78 = math.tanh %77 : vector<2x32xf32>
    %79 = arith.mulf %74, %78 : vector<2x32xf32>
    %c4 = arith.constant 4 : index
    %c0_38 = arith.constant 0 : index
    %80 = vector.load %arg8[%c4, %c0_38] : memref<16x128xf32, #tpu.memory_space<vmem>>, vector<2x128xf32>
    %cst_39 = arith.constant dense<0.000000e+00> : vector<2x128xf32>
    %81 = tpu.matmul %79, %0, %cst_39 {dimension_numbers = #tpu.dot_dimension_numbers<[1], [0], [0], [1], [0, 0, 1, 1], [], []>, precision = #tpu.contract_precision<fp32>} : vector<2x32xf32>, vector<32x128xf32>, vector<2x128xf32> -> vector<2x128xf32>
    %82 = arith.addf %80, %81 : vector<2x128xf32>
    %83 = vector.extract_strided_slice %82 {offsets = [0, 0], sizes = [2, 32], strides = [1, 1]} : vector<2x128xf32> to vector<2x32xf32>
    %cst_40 = arith.constant 5.000000e-01 : f32
    %84 = vector.broadcast %cst_40 : f32 to vector<2x32xf32>
    %85 = arith.mulf %84, %83 : vector<2x32xf32>
    %86 = math.tanh %85 : vector<2x32xf32>
    %cst_41 = arith.constant 1.000000e+00 : f32
    %87 = vector.broadcast %cst_41 : f32 to vector<2x32xf32>
    %88 = arith.addf %86, %87 : vector<2x32xf32>
    %cst_42 = arith.constant 5.000000e-01 : f32
    %89 = vector.broadcast %cst_42 : f32 to vector<2x32xf32>
    %90 = arith.mulf %89, %88 : vector<2x32xf32>
    %91 = vector.extract_strided_slice %82 {offsets = [0, 32], sizes = [2, 32], strides = [1, 1]} : vector<2x128xf32> to vector<2x32xf32>
    %cst_43 = arith.constant 5.000000e-01 : f32
    %92 = vector.broadcast %cst_43 : f32 to vector<2x32xf32>
    %93 = arith.mulf %92, %91 : vector<2x32xf32>
    %94 = math.tanh %93 : vector<2x32xf32>
    %cst_44 = arith.constant 1.000000e+00 : f32
    %95 = vector.broadcast %cst_44 : f32 to vector<2x32xf32>
    %96 = arith.addf %94, %95 : vector<2x32xf32>
    %cst_45 = arith.constant 5.000000e-01 : f32
    %97 = vector.broadcast %cst_45 : f32 to vector<2x32xf32>
    %98 = arith.mulf %97, %96 : vector<2x32xf32>
    %99 = vector.extract_strided_slice %82 {offsets = [0, 64], sizes = [2, 32], strides = [1, 1]} : vector<2x128xf32> to vector<2x32xf32>
    %100 = math.tanh %99 : vector<2x32xf32>
    %101 = vector.extract_strided_slice %82 {offsets = [0, 96], sizes = [2, 32], strides = [1, 1]} : vector<2x128xf32> to vector<2x32xf32>
    %cst_46 = arith.constant 5.000000e-01 : f32
    %102 = vector.broadcast %cst_46 : f32 to vector<2x32xf32>
    %103 = arith.mulf %102, %101 : vector<2x32xf32>
    %104 = math.tanh %103 : vector<2x32xf32>
    %cst_47 = arith.constant 1.000000e+00 : f32
    %105 = vector.broadcast %cst_47 : f32 to vector<2x32xf32>
    %106 = arith.addf %104, %105 : vector<2x32xf32>
    %cst_48 = arith.constant 5.000000e-01 : f32
    %107 = vector.broadcast %cst_48 : f32 to vector<2x32xf32>
    %108 = arith.mulf %107, %106 : vector<2x32xf32>
    %109 = arith.mulf %98, %77 : vector<2x32xf32>
    %110 = arith.mulf %90, %100 : vector<2x32xf32>
    %111 = arith.addf %109, %110 : vector<2x32xf32>
    %112 = math.tanh %111 : vector<2x32xf32>
    %113 = arith.mulf %108, %112 : vector<2x32xf32>
    %c6 = arith.constant 6 : index
    %c0_49 = arith.constant 0 : index
    %114 = vector.load %arg8[%c6, %c0_49] : memref<16x128xf32, #tpu.memory_space<vmem>>, vector<2x128xf32>
    %cst_50 = arith.constant dense<0.000000e+00> : vector<2x128xf32>
    %115 = tpu.matmul %113, %0, %cst_50 {dimension_numbers = #tpu.dot_dimension_numbers<[1], [0], [0], [1], [0, 0, 1, 1], [], []>, precision = #tpu.contract_precision<fp32>} : vector<2x32xf32>, vector<32x128xf32>, vector<2x128xf32> -> vector<2x128xf32>
    %116 = arith.addf %114, %115 : vector<2x128xf32>
    %117 = vector.extract_strided_slice %116 {offsets = [0, 0], sizes = [2, 32], strides = [1, 1]} : vector<2x128xf32> to vector<2x32xf32>
    %cst_51 = arith.constant 5.000000e-01 : f32
    %118 = vector.broadcast %cst_51 : f32 to vector<2x32xf32>
    %119 = arith.mulf %118, %117 : vector<2x32xf32>
    %120 = math.tanh %119 : vector<2x32xf32>
    %cst_52 = arith.constant 1.000000e+00 : f32
    %121 = vector.broadcast %cst_52 : f32 to vector<2x32xf32>
    %122 = arith.addf %120, %121 : vector<2x32xf32>
    %cst_53 = arith.constant 5.000000e-01 : f32
    %123 = vector.broadcast %cst_53 : f32 to vector<2x32xf32>
    %124 = arith.mulf %123, %122 : vector<2x32xf32>
    %125 = vector.extract_strided_slice %116 {offsets = [0, 32], sizes = [2, 32], strides = [1, 1]} : vector<2x128xf32> to vector<2x32xf32>
    %cst_54 = arith.constant 5.000000e-01 : f32
    %126 = vector.broadcast %cst_54 : f32 to vector<2x32xf32>
    %127 = arith.mulf %126, %125 : vector<2x32xf32>
    %128 = math.tanh %127 : vector<2x32xf32>
    %cst_55 = arith.constant 1.000000e+00 : f32
    %129 = vector.broadcast %cst_55 : f32 to vector<2x32xf32>
    %130 = arith.addf %128, %129 : vector<2x32xf32>
    %cst_56 = arith.constant 5.000000e-01 : f32
    %131 = vector.broadcast %cst_56 : f32 to vector<2x32xf32>
    %132 = arith.mulf %131, %130 : vector<2x32xf32>
    %133 = vector.extract_strided_slice %116 {offsets = [0, 64], sizes = [2, 32], strides = [1, 1]} : vector<2x128xf32> to vector<2x32xf32>
    %134 = math.tanh %133 : vector<2x32xf32>
    %135 = vector.extract_strided_slice %116 {offsets = [0, 96], sizes = [2, 32], strides = [1, 1]} : vector<2x128xf32> to vector<2x32xf32>
    %cst_57 = arith.constant 5.000000e-01 : f32
    %136 = vector.broadcast %cst_57 : f32 to vector<2x32xf32>
    %137 = arith.mulf %136, %135 : vector<2x32xf32>
    %138 = math.tanh %137 : vector<2x32xf32>
    %cst_58 = arith.constant 1.000000e+00 : f32
    %139 = vector.broadcast %cst_58 : f32 to vector<2x32xf32>
    %140 = arith.addf %138, %139 : vector<2x32xf32>
    %cst_59 = arith.constant 5.000000e-01 : f32
    %141 = vector.broadcast %cst_59 : f32 to vector<2x32xf32>
    %142 = arith.mulf %141, %140 : vector<2x32xf32>
    %143 = arith.mulf %132, %111 : vector<2x32xf32>
    %144 = arith.mulf %124, %134 : vector<2x32xf32>
    %145 = arith.addf %143, %144 : vector<2x32xf32>
    %146 = math.tanh %145 : vector<2x32xf32>
    %147 = arith.mulf %142, %146 : vector<2x32xf32>
    %c8 = arith.constant 8 : index
    %c0_60 = arith.constant 0 : index
    %148 = vector.load %arg8[%c8, %c0_60] : memref<16x128xf32, #tpu.memory_space<vmem>>, vector<2x128xf32>
    %cst_61 = arith.constant dense<0.000000e+00> : vector<2x128xf32>
    %149 = tpu.matmul %147, %0, %cst_61 {dimension_numbers = #tpu.dot_dimension_numbers<[1], [0], [0], [1], [0, 0, 1, 1], [], []>, precision = #tpu.contract_precision<fp32>} : vector<2x32xf32>, vector<32x128xf32>, vector<2x128xf32> -> vector<2x128xf32>
    %150 = arith.addf %148, %149 : vector<2x128xf32>
    %151 = vector.extract_strided_slice %150 {offsets = [0, 0], sizes = [2, 32], strides = [1, 1]} : vector<2x128xf32> to vector<2x32xf32>
    %cst_62 = arith.constant 5.000000e-01 : f32
    %152 = vector.broadcast %cst_62 : f32 to vector<2x32xf32>
    %153 = arith.mulf %152, %151 : vector<2x32xf32>
    %154 = math.tanh %153 : vector<2x32xf32>
    %cst_63 = arith.constant 1.000000e+00 : f32
    %155 = vector.broadcast %cst_63 : f32 to vector<2x32xf32>
    %156 = arith.addf %154, %155 : vector<2x32xf32>
    %cst_64 = arith.constant 5.000000e-01 : f32
    %157 = vector.broadcast %cst_64 : f32 to vector<2x32xf32>
    %158 = arith.mulf %157, %156 : vector<2x32xf32>
    %159 = vector.extract_strided_slice %150 {offsets = [0, 32], sizes = [2, 32], strides = [1, 1]} : vector<2x128xf32> to vector<2x32xf32>
    %cst_65 = arith.constant 5.000000e-01 : f32
    %160 = vector.broadcast %cst_65 : f32 to vector<2x32xf32>
    %161 = arith.mulf %160, %159 : vector<2x32xf32>
    %162 = math.tanh %161 : vector<2x32xf32>
    %cst_66 = arith.constant 1.000000e+00 : f32
    %163 = vector.broadcast %cst_66 : f32 to vector<2x32xf32>
    %164 = arith.addf %162, %163 : vector<2x32xf32>
    %cst_67 = arith.constant 5.000000e-01 : f32
    %165 = vector.broadcast %cst_67 : f32 to vector<2x32xf32>
    %166 = arith.mulf %165, %164 : vector<2x32xf32>
    %167 = vector.extract_strided_slice %150 {offsets = [0, 64], sizes = [2, 32], strides = [1, 1]} : vector<2x128xf32> to vector<2x32xf32>
    %168 = math.tanh %167 : vector<2x32xf32>
    %169 = vector.extract_strided_slice %150 {offsets = [0, 96], sizes = [2, 32], strides = [1, 1]} : vector<2x128xf32> to vector<2x32xf32>
    %cst_68 = arith.constant 5.000000e-01 : f32
    %170 = vector.broadcast %cst_68 : f32 to vector<2x32xf32>
    %171 = arith.mulf %170, %169 : vector<2x32xf32>
    %172 = math.tanh %171 : vector<2x32xf32>
    %cst_69 = arith.constant 1.000000e+00 : f32
    %173 = vector.broadcast %cst_69 : f32 to vector<2x32xf32>
    %174 = arith.addf %172, %173 : vector<2x32xf32>
    %cst_70 = arith.constant 5.000000e-01 : f32
    %175 = vector.broadcast %cst_70 : f32 to vector<2x32xf32>
    %176 = arith.mulf %175, %174 : vector<2x32xf32>
    %177 = arith.mulf %166, %145 : vector<2x32xf32>
    %178 = arith.mulf %158, %168 : vector<2x32xf32>
    %179 = arith.addf %177, %178 : vector<2x32xf32>
    %180 = math.tanh %179 : vector<2x32xf32>
    %181 = arith.mulf %176, %180 : vector<2x32xf32>
    %c10 = arith.constant 10 : index
    %c0_71 = arith.constant 0 : index
    %182 = vector.load %arg8[%c10, %c0_71] : memref<16x128xf32, #tpu.memory_space<vmem>>, vector<2x128xf32>
    %cst_72 = arith.constant dense<0.000000e+00> : vector<2x128xf32>
    %183 = tpu.matmul %181, %0, %cst_72 {dimension_numbers = #tpu.dot_dimension_numbers<[1], [0], [0], [1], [0, 0, 1, 1], [], []>, precision = #tpu.contract_precision<fp32>} : vector<2x32xf32>, vector<32x128xf32>, vector<2x128xf32> -> vector<2x128xf32>
    %184 = arith.addf %182, %183 : vector<2x128xf32>
    %185 = vector.extract_strided_slice %184 {offsets = [0, 0], sizes = [2, 32], strides = [1, 1]} : vector<2x128xf32> to vector<2x32xf32>
    %cst_73 = arith.constant 5.000000e-01 : f32
    %186 = vector.broadcast %cst_73 : f32 to vector<2x32xf32>
    %187 = arith.mulf %186, %185 : vector<2x32xf32>
    %188 = math.tanh %187 : vector<2x32xf32>
    %cst_74 = arith.constant 1.000000e+00 : f32
    %189 = vector.broadcast %cst_74 : f32 to vector<2x32xf32>
    %190 = arith.addf %188, %189 : vector<2x32xf32>
    %cst_75 = arith.constant 5.000000e-01 : f32
    %191 = vector.broadcast %cst_75 : f32 to vector<2x32xf32>
    %192 = arith.mulf %191, %190 : vector<2x32xf32>
    %193 = vector.extract_strided_slice %184 {offsets = [0, 32], sizes = [2, 32], strides = [1, 1]} : vector<2x128xf32> to vector<2x32xf32>
    %cst_76 = arith.constant 5.000000e-01 : f32
    %194 = vector.broadcast %cst_76 : f32 to vector<2x32xf32>
    %195 = arith.mulf %194, %193 : vector<2x32xf32>
    %196 = math.tanh %195 : vector<2x32xf32>
    %cst_77 = arith.constant 1.000000e+00 : f32
    %197 = vector.broadcast %cst_77 : f32 to vector<2x32xf32>
    %198 = arith.addf %196, %197 : vector<2x32xf32>
    %cst_78 = arith.constant 5.000000e-01 : f32
    %199 = vector.broadcast %cst_78 : f32 to vector<2x32xf32>
    %200 = arith.mulf %199, %198 : vector<2x32xf32>
    %201 = vector.extract_strided_slice %184 {offsets = [0, 64], sizes = [2, 32], strides = [1, 1]} : vector<2x128xf32> to vector<2x32xf32>
    %202 = math.tanh %201 : vector<2x32xf32>
    %203 = vector.extract_strided_slice %184 {offsets = [0, 96], sizes = [2, 32], strides = [1, 1]} : vector<2x128xf32> to vector<2x32xf32>
    %cst_79 = arith.constant 5.000000e-01 : f32
    %204 = vector.broadcast %cst_79 : f32 to vector<2x32xf32>
    %205 = arith.mulf %204, %203 : vector<2x32xf32>
    %206 = math.tanh %205 : vector<2x32xf32>
    %cst_80 = arith.constant 1.000000e+00 : f32
    %207 = vector.broadcast %cst_80 : f32 to vector<2x32xf32>
    %208 = arith.addf %206, %207 : vector<2x32xf32>
    %cst_81 = arith.constant 5.000000e-01 : f32
    %209 = vector.broadcast %cst_81 : f32 to vector<2x32xf32>
    %210 = arith.mulf %209, %208 : vector<2x32xf32>
    %211 = arith.mulf %200, %179 : vector<2x32xf32>
    %212 = arith.mulf %192, %202 : vector<2x32xf32>
    %213 = arith.addf %211, %212 : vector<2x32xf32>
    %214 = math.tanh %213 : vector<2x32xf32>
    %215 = arith.mulf %210, %214 : vector<2x32xf32>
    %c12 = arith.constant 12 : index
    %c0_82 = arith.constant 0 : index
    %216 = vector.load %arg8[%c12, %c0_82] : memref<16x128xf32, #tpu.memory_space<vmem>>, vector<2x128xf32>
    %cst_83 = arith.constant dense<0.000000e+00> : vector<2x128xf32>
    %217 = tpu.matmul %215, %0, %cst_83 {dimension_numbers = #tpu.dot_dimension_numbers<[1], [0], [0], [1], [0, 0, 1, 1], [], []>, precision = #tpu.contract_precision<fp32>} : vector<2x32xf32>, vector<32x128xf32>, vector<2x128xf32> -> vector<2x128xf32>
    %218 = arith.addf %216, %217 : vector<2x128xf32>
    %219 = vector.extract_strided_slice %218 {offsets = [0, 0], sizes = [2, 32], strides = [1, 1]} : vector<2x128xf32> to vector<2x32xf32>
    %cst_84 = arith.constant 5.000000e-01 : f32
    %220 = vector.broadcast %cst_84 : f32 to vector<2x32xf32>
    %221 = arith.mulf %220, %219 : vector<2x32xf32>
    %222 = math.tanh %221 : vector<2x32xf32>
    %cst_85 = arith.constant 1.000000e+00 : f32
    %223 = vector.broadcast %cst_85 : f32 to vector<2x32xf32>
    %224 = arith.addf %222, %223 : vector<2x32xf32>
    %cst_86 = arith.constant 5.000000e-01 : f32
    %225 = vector.broadcast %cst_86 : f32 to vector<2x32xf32>
    %226 = arith.mulf %225, %224 : vector<2x32xf32>
    %227 = vector.extract_strided_slice %218 {offsets = [0, 32], sizes = [2, 32], strides = [1, 1]} : vector<2x128xf32> to vector<2x32xf32>
    %cst_87 = arith.constant 5.000000e-01 : f32
    %228 = vector.broadcast %cst_87 : f32 to vector<2x32xf32>
    %229 = arith.mulf %228, %227 : vector<2x32xf32>
    %230 = math.tanh %229 : vector<2x32xf32>
    %cst_88 = arith.constant 1.000000e+00 : f32
    %231 = vector.broadcast %cst_88 : f32 to vector<2x32xf32>
    %232 = arith.addf %230, %231 : vector<2x32xf32>
    %cst_89 = arith.constant 5.000000e-01 : f32
    %233 = vector.broadcast %cst_89 : f32 to vector<2x32xf32>
    %234 = arith.mulf %233, %232 : vector<2x32xf32>
    %235 = vector.extract_strided_slice %218 {offsets = [0, 64], sizes = [2, 32], strides = [1, 1]} : vector<2x128xf32> to vector<2x32xf32>
    %236 = math.tanh %235 : vector<2x32xf32>
    %237 = vector.extract_strided_slice %218 {offsets = [0, 96], sizes = [2, 32], strides = [1, 1]} : vector<2x128xf32> to vector<2x32xf32>
    %cst_90 = arith.constant 5.000000e-01 : f32
    %238 = vector.broadcast %cst_90 : f32 to vector<2x32xf32>
    %239 = arith.mulf %238, %237 : vector<2x32xf32>
    %240 = math.tanh %239 : vector<2x32xf32>
    %cst_91 = arith.constant 1.000000e+00 : f32
    %241 = vector.broadcast %cst_91 : f32 to vector<2x32xf32>
    %242 = arith.addf %240, %241 : vector<2x32xf32>
    %cst_92 = arith.constant 5.000000e-01 : f32
    %243 = vector.broadcast %cst_92 : f32 to vector<2x32xf32>
    %244 = arith.mulf %243, %242 : vector<2x32xf32>
    %245 = arith.mulf %234, %213 : vector<2x32xf32>
    %246 = arith.mulf %226, %236 : vector<2x32xf32>
    %247 = arith.addf %245, %246 : vector<2x32xf32>
    %248 = math.tanh %247 : vector<2x32xf32>
    %249 = arith.mulf %244, %248 : vector<2x32xf32>
    %c14 = arith.constant 14 : index
    %c0_93 = arith.constant 0 : index
    %250 = vector.load %arg8[%c14, %c0_93] : memref<16x128xf32, #tpu.memory_space<vmem>>, vector<2x128xf32>
    %cst_94 = arith.constant dense<0.000000e+00> : vector<2x128xf32>
    %251 = tpu.matmul %249, %0, %cst_94 {dimension_numbers = #tpu.dot_dimension_numbers<[1], [0], [0], [1], [0, 0, 1, 1], [], []>, precision = #tpu.contract_precision<fp32>} : vector<2x32xf32>, vector<32x128xf32>, vector<2x128xf32> -> vector<2x128xf32>
    %252 = arith.addf %250, %251 : vector<2x128xf32>
    %253 = vector.extract_strided_slice %252 {offsets = [0, 0], sizes = [2, 32], strides = [1, 1]} : vector<2x128xf32> to vector<2x32xf32>
    %cst_95 = arith.constant 5.000000e-01 : f32
    %254 = vector.broadcast %cst_95 : f32 to vector<2x32xf32>
    %255 = arith.mulf %254, %253 : vector<2x32xf32>
    %256 = math.tanh %255 : vector<2x32xf32>
    %cst_96 = arith.constant 1.000000e+00 : f32
    %257 = vector.broadcast %cst_96 : f32 to vector<2x32xf32>
    %258 = arith.addf %256, %257 : vector<2x32xf32>
    %cst_97 = arith.constant 5.000000e-01 : f32
    %259 = vector.broadcast %cst_97 : f32 to vector<2x32xf32>
    %260 = arith.mulf %259, %258 : vector<2x32xf32>
    %261 = vector.extract_strided_slice %252 {offsets = [0, 32], sizes = [2, 32], strides = [1, 1]} : vector<2x128xf32> to vector<2x32xf32>
    %cst_98 = arith.constant 5.000000e-01 : f32
    %262 = vector.broadcast %cst_98 : f32 to vector<2x32xf32>
    %263 = arith.mulf %262, %261 : vector<2x32xf32>
    %264 = math.tanh %263 : vector<2x32xf32>
    %cst_99 = arith.constant 1.000000e+00 : f32
    %265 = vector.broadcast %cst_99 : f32 to vector<2x32xf32>
    %266 = arith.addf %264, %265 : vector<2x32xf32>
    %cst_100 = arith.constant 5.000000e-01 : f32
    %267 = vector.broadcast %cst_100 : f32 to vector<2x32xf32>
    %268 = arith.mulf %267, %266 : vector<2x32xf32>
    %269 = vector.extract_strided_slice %252 {offsets = [0, 64], sizes = [2, 32], strides = [1, 1]} : vector<2x128xf32> to vector<2x32xf32>
    %270 = math.tanh %269 : vector<2x32xf32>
    %271 = vector.extract_strided_slice %252 {offsets = [0, 96], sizes = [2, 32], strides = [1, 1]} : vector<2x128xf32> to vector<2x32xf32>
    %cst_101 = arith.constant 5.000000e-01 : f32
    %272 = vector.broadcast %cst_101 : f32 to vector<2x32xf32>
    %273 = arith.mulf %272, %271 : vector<2x32xf32>
    %274 = math.tanh %273 : vector<2x32xf32>
    %cst_102 = arith.constant 1.000000e+00 : f32
    %275 = vector.broadcast %cst_102 : f32 to vector<2x32xf32>
    %276 = arith.addf %274, %275 : vector<2x32xf32>
    %cst_103 = arith.constant 5.000000e-01 : f32
    %277 = vector.broadcast %cst_103 : f32 to vector<2x32xf32>
    %278 = arith.mulf %277, %276 : vector<2x32xf32>
    %279 = arith.mulf %268, %247 : vector<2x32xf32>
    %280 = arith.mulf %260, %270 : vector<2x32xf32>
    %281 = arith.addf %279, %280 : vector<2x32xf32>
    %282 = math.tanh %281 : vector<2x32xf32>
    %283 = arith.mulf %278, %282 : vector<2x32xf32>
    %cst_104 = arith.constant dense<0.000000e+00> : vector<2x128xf32>
    %284 = tpu.matmul %283, %1, %cst_104 {dimension_numbers = #tpu.dot_dimension_numbers<[1], [0], [0], [1], [0, 0, 1, 1], [], []>, precision = #tpu.contract_precision<fp32>} : vector<2x32xf32>, vector<32x128xf32>, vector<2x128xf32> -> vector<2x128xf32>
    %285 = vector.broadcast %2 : vector<1x128xf32> to vector<2x128xf32>
    %286 = arith.addf %284, %285 : vector<2x128xf32>
    %287 = vector.extract_strided_slice %286 {offsets = [0, 0], sizes = [2, 32], strides = [1, 1]} : vector<2x128xf32> to vector<2x32xf32>
    %cst_105 = arith.constant 5.000000e-01 : f32
    %288 = vector.broadcast %cst_105 : f32 to vector<2x32xf32>
    %289 = arith.mulf %288, %287 : vector<2x32xf32>
    %290 = math.tanh %289 : vector<2x32xf32>
    %cst_106 = arith.constant 1.000000e+00 : f32
    %291 = vector.broadcast %cst_106 : f32 to vector<2x32xf32>
    %292 = arith.addf %290, %291 : vector<2x32xf32>
    %cst_107 = arith.constant 5.000000e-01 : f32
    %293 = vector.broadcast %cst_107 : f32 to vector<2x32xf32>
    %294 = arith.mulf %293, %292 : vector<2x32xf32>
    %295 = vector.extract_strided_slice %286 {offsets = [0, 32], sizes = [2, 32], strides = [1, 1]} : vector<2x128xf32> to vector<2x32xf32>
    %cst_108 = arith.constant 5.000000e-01 : f32
    %296 = vector.broadcast %cst_108 : f32 to vector<2x32xf32>
    %297 = arith.mulf %296, %295 : vector<2x32xf32>
    %298 = math.tanh %297 : vector<2x32xf32>
    %cst_109 = arith.constant 1.000000e+00 : f32
    %299 = vector.broadcast %cst_109 : f32 to vector<2x32xf32>
    %300 = arith.addf %298, %299 : vector<2x32xf32>
    %cst_110 = arith.constant 5.000000e-01 : f32
    %301 = vector.broadcast %cst_110 : f32 to vector<2x32xf32>
    %302 = arith.mulf %301, %300 : vector<2x32xf32>
    %303 = vector.extract_strided_slice %286 {offsets = [0, 64], sizes = [2, 32], strides = [1, 1]} : vector<2x128xf32> to vector<2x32xf32>
    %304 = math.tanh %303 : vector<2x32xf32>
    %305 = vector.extract_strided_slice %286 {offsets = [0, 96], sizes = [2, 32], strides = [1, 1]} : vector<2x128xf32> to vector<2x32xf32>
    %cst_111 = arith.constant 5.000000e-01 : f32
    %306 = vector.broadcast %cst_111 : f32 to vector<2x32xf32>
    %307 = arith.mulf %306, %305 : vector<2x32xf32>
    %308 = math.tanh %307 : vector<2x32xf32>
    %cst_112 = arith.constant 1.000000e+00 : f32
    %309 = vector.broadcast %cst_112 : f32 to vector<2x32xf32>
    %310 = arith.addf %308, %309 : vector<2x32xf32>
    %cst_113 = arith.constant 5.000000e-01 : f32
    %311 = vector.broadcast %cst_113 : f32 to vector<2x32xf32>
    %312 = arith.mulf %311, %310 : vector<2x32xf32>
    %313 = arith.mulf %302, %281 : vector<2x32xf32>
    %314 = arith.mulf %294, %304 : vector<2x32xf32>
    %315 = arith.addf %313, %314 : vector<2x32xf32>
    %316 = math.tanh %315 : vector<2x32xf32>
    %317 = arith.mulf %312, %316 : vector<2x32xf32>
    %cst_114 = arith.constant dense<0.000000e+00> : vector<2x128xf32>
    %318 = tpu.matmul %317, %1, %cst_114 {dimension_numbers = #tpu.dot_dimension_numbers<[1], [0], [0], [1], [0, 0, 1, 1], [], []>, precision = #tpu.contract_precision<fp32>} : vector<2x32xf32>, vector<32x128xf32>, vector<2x128xf32> -> vector<2x128xf32>
    %319 = vector.broadcast %2 : vector<1x128xf32> to vector<2x128xf32>
    %320 = arith.addf %318, %319 : vector<2x128xf32>
    %321 = vector.extract_strided_slice %320 {offsets = [0, 0], sizes = [2, 32], strides = [1, 1]} : vector<2x128xf32> to vector<2x32xf32>
    %cst_115 = arith.constant 5.000000e-01 : f32
    %322 = vector.broadcast %cst_115 : f32 to vector<2x32xf32>
    %323 = arith.mulf %322, %321 : vector<2x32xf32>
    %324 = math.tanh %323 : vector<2x32xf32>
    %cst_116 = arith.constant 1.000000e+00 : f32
    %325 = vector.broadcast %cst_116 : f32 to vector<2x32xf32>
    %326 = arith.addf %324, %325 : vector<2x32xf32>
    %cst_117 = arith.constant 5.000000e-01 : f32
    %327 = vector.broadcast %cst_117 : f32 to vector<2x32xf32>
    %328 = arith.mulf %327, %326 : vector<2x32xf32>
    %329 = vector.extract_strided_slice %320 {offsets = [0, 32], sizes = [2, 32], strides = [1, 1]} : vector<2x128xf32> to vector<2x32xf32>
    %cst_118 = arith.constant 5.000000e-01 : f32
    %330 = vector.broadcast %cst_118 : f32 to vector<2x32xf32>
    %331 = arith.mulf %330, %329 : vector<2x32xf32>
    %332 = math.tanh %331 : vector<2x32xf32>
    %cst_119 = arith.constant 1.000000e+00 : f32
    %333 = vector.broadcast %cst_119 : f32 to vector<2x32xf32>
    %334 = arith.addf %332, %333 : vector<2x32xf32>
    %cst_120 = arith.constant 5.000000e-01 : f32
    %335 = vector.broadcast %cst_120 : f32 to vector<2x32xf32>
    %336 = arith.mulf %335, %334 : vector<2x32xf32>
    %337 = vector.extract_strided_slice %320 {offsets = [0, 64], sizes = [2, 32], strides = [1, 1]} : vector<2x128xf32> to vector<2x32xf32>
    %338 = math.tanh %337 : vector<2x32xf32>
    %339 = vector.extract_strided_slice %320 {offsets = [0, 96], sizes = [2, 32], strides = [1, 1]} : vector<2x128xf32> to vector<2x32xf32>
    %cst_121 = arith.constant 5.000000e-01 : f32
    %340 = vector.broadcast %cst_121 : f32 to vector<2x32xf32>
    %341 = arith.mulf %340, %339 : vector<2x32xf32>
    %342 = math.tanh %341 : vector<2x32xf32>
    %cst_122 = arith.constant 1.000000e+00 : f32
    %343 = vector.broadcast %cst_122 : f32 to vector<2x32xf32>
    %344 = arith.addf %342, %343 : vector<2x32xf32>
    %cst_123 = arith.constant 5.000000e-01 : f32
    %345 = vector.broadcast %cst_123 : f32 to vector<2x32xf32>
    %346 = arith.mulf %345, %344 : vector<2x32xf32>
    %347 = arith.mulf %336, %315 : vector<2x32xf32>
    %348 = arith.mulf %328, %338 : vector<2x32xf32>
    %349 = arith.addf %347, %348 : vector<2x32xf32>
    %350 = math.tanh %349 : vector<2x32xf32>
    %351 = arith.mulf %346, %350 : vector<2x32xf32>
    %cst_124 = arith.constant dense<0.000000e+00> : vector<2x128xf32>
    %352 = tpu.matmul %351, %1, %cst_124 {dimension_numbers = #tpu.dot_dimension_numbers<[1], [0], [0], [1], [0, 0, 1, 1], [], []>, precision = #tpu.contract_precision<fp32>} : vector<2x32xf32>, vector<32x128xf32>, vector<2x128xf32> -> vector<2x128xf32>
    %353 = vector.broadcast %2 : vector<1x128xf32> to vector<2x128xf32>
    %354 = arith.addf %352, %353 : vector<2x128xf32>
    %355 = vector.extract_strided_slice %354 {offsets = [0, 0], sizes = [2, 32], strides = [1, 1]} : vector<2x128xf32> to vector<2x32xf32>
    %cst_125 = arith.constant 5.000000e-01 : f32
    %356 = vector.broadcast %cst_125 : f32 to vector<2x32xf32>
    %357 = arith.mulf %356, %355 : vector<2x32xf32>
    %358 = math.tanh %357 : vector<2x32xf32>
    %cst_126 = arith.constant 1.000000e+00 : f32
    %359 = vector.broadcast %cst_126 : f32 to vector<2x32xf32>
    %360 = arith.addf %358, %359 : vector<2x32xf32>
    %cst_127 = arith.constant 5.000000e-01 : f32
    %361 = vector.broadcast %cst_127 : f32 to vector<2x32xf32>
    %362 = arith.mulf %361, %360 : vector<2x32xf32>
    %363 = vector.extract_strided_slice %354 {offsets = [0, 32], sizes = [2, 32], strides = [1, 1]} : vector<2x128xf32> to vector<2x32xf32>
    %cst_128 = arith.constant 5.000000e-01 : f32
    %364 = vector.broadcast %cst_128 : f32 to vector<2x32xf32>
    %365 = arith.mulf %364, %363 : vector<2x32xf32>
    %366 = math.tanh %365 : vector<2x32xf32>
    %cst_129 = arith.constant 1.000000e+00 : f32
    %367 = vector.broadcast %cst_129 : f32 to vector<2x32xf32>
    %368 = arith.addf %366, %367 : vector<2x32xf32>
    %cst_130 = arith.constant 5.000000e-01 : f32
    %369 = vector.broadcast %cst_130 : f32 to vector<2x32xf32>
    %370 = arith.mulf %369, %368 : vector<2x32xf32>
    %371 = vector.extract_strided_slice %354 {offsets = [0, 64], sizes = [2, 32], strides = [1, 1]} : vector<2x128xf32> to vector<2x32xf32>
    %372 = math.tanh %371 : vector<2x32xf32>
    %373 = vector.extract_strided_slice %354 {offsets = [0, 96], sizes = [2, 32], strides = [1, 1]} : vector<2x128xf32> to vector<2x32xf32>
    %cst_131 = arith.constant 5.000000e-01 : f32
    %374 = vector.broadcast %cst_131 : f32 to vector<2x32xf32>
    %375 = arith.mulf %374, %373 : vector<2x32xf32>
    %376 = math.tanh %375 : vector<2x32xf32>
    %cst_132 = arith.constant 1.000000e+00 : f32
    %377 = vector.broadcast %cst_132 : f32 to vector<2x32xf32>
    %378 = arith.addf %376, %377 : vector<2x32xf32>
    %cst_133 = arith.constant 5.000000e-01 : f32
    %379 = vector.broadcast %cst_133 : f32 to vector<2x32xf32>
    %380 = arith.mulf %379, %378 : vector<2x32xf32>
    %381 = arith.mulf %370, %349 : vector<2x32xf32>
    %382 = arith.mulf %362, %372 : vector<2x32xf32>
    %383 = arith.addf %381, %382 : vector<2x32xf32>
    %384 = math.tanh %383 : vector<2x32xf32>
    %385 = arith.mulf %380, %384 : vector<2x32xf32>
    %cst_134 = arith.constant dense<0.000000e+00> : vector<2x128xf32>
    %386 = tpu.matmul %385, %1, %cst_134 {dimension_numbers = #tpu.dot_dimension_numbers<[1], [0], [0], [1], [0, 0, 1, 1], [], []>, precision = #tpu.contract_precision<fp32>} : vector<2x32xf32>, vector<32x128xf32>, vector<2x128xf32> -> vector<2x128xf32>
    %387 = vector.broadcast %2 : vector<1x128xf32> to vector<2x128xf32>
    %388 = arith.addf %386, %387 : vector<2x128xf32>
    %389 = vector.extract_strided_slice %388 {offsets = [0, 0], sizes = [2, 32], strides = [1, 1]} : vector<2x128xf32> to vector<2x32xf32>
    %cst_135 = arith.constant 5.000000e-01 : f32
    %390 = vector.broadcast %cst_135 : f32 to vector<2x32xf32>
    %391 = arith.mulf %390, %389 : vector<2x32xf32>
    %392 = math.tanh %391 : vector<2x32xf32>
    %cst_136 = arith.constant 1.000000e+00 : f32
    %393 = vector.broadcast %cst_136 : f32 to vector<2x32xf32>
    %394 = arith.addf %392, %393 : vector<2x32xf32>
    %cst_137 = arith.constant 5.000000e-01 : f32
    %395 = vector.broadcast %cst_137 : f32 to vector<2x32xf32>
    %396 = arith.mulf %395, %394 : vector<2x32xf32>
    %397 = vector.extract_strided_slice %388 {offsets = [0, 32], sizes = [2, 32], strides = [1, 1]} : vector<2x128xf32> to vector<2x32xf32>
    %cst_138 = arith.constant 5.000000e-01 : f32
    %398 = vector.broadcast %cst_138 : f32 to vector<2x32xf32>
    %399 = arith.mulf %398, %397 : vector<2x32xf32>
    %400 = math.tanh %399 : vector<2x32xf32>
    %cst_139 = arith.constant 1.000000e+00 : f32
    %401 = vector.broadcast %cst_139 : f32 to vector<2x32xf32>
    %402 = arith.addf %400, %401 : vector<2x32xf32>
    %cst_140 = arith.constant 5.000000e-01 : f32
    %403 = vector.broadcast %cst_140 : f32 to vector<2x32xf32>
    %404 = arith.mulf %403, %402 : vector<2x32xf32>
    %405 = vector.extract_strided_slice %388 {offsets = [0, 64], sizes = [2, 32], strides = [1, 1]} : vector<2x128xf32> to vector<2x32xf32>
    %406 = math.tanh %405 : vector<2x32xf32>
    %407 = vector.extract_strided_slice %388 {offsets = [0, 96], sizes = [2, 32], strides = [1, 1]} : vector<2x128xf32> to vector<2x32xf32>
    %cst_141 = arith.constant 5.000000e-01 : f32
    %408 = vector.broadcast %cst_141 : f32 to vector<2x32xf32>
    %409 = arith.mulf %408, %407 : vector<2x32xf32>
    %410 = math.tanh %409 : vector<2x32xf32>
    %cst_142 = arith.constant 1.000000e+00 : f32
    %411 = vector.broadcast %cst_142 : f32 to vector<2x32xf32>
    %412 = arith.addf %410, %411 : vector<2x32xf32>
    %cst_143 = arith.constant 5.000000e-01 : f32
    %413 = vector.broadcast %cst_143 : f32 to vector<2x32xf32>
    %414 = arith.mulf %413, %412 : vector<2x32xf32>
    %415 = arith.mulf %404, %383 : vector<2x32xf32>
    %416 = arith.mulf %396, %406 : vector<2x32xf32>
    %417 = arith.addf %415, %416 : vector<2x32xf32>
    %418 = math.tanh %417 : vector<2x32xf32>
    %419 = arith.mulf %414, %418 : vector<2x32xf32>
    %cst_144 = arith.constant dense<0.000000e+00> : vector<2x128xf32>
    %420 = tpu.matmul %419, %1, %cst_144 {dimension_numbers = #tpu.dot_dimension_numbers<[1], [0], [0], [1], [0, 0, 1, 1], [], []>, precision = #tpu.contract_precision<fp32>} : vector<2x32xf32>, vector<32x128xf32>, vector<2x128xf32> -> vector<2x128xf32>
    %421 = vector.broadcast %2 : vector<1x128xf32> to vector<2x128xf32>
    %422 = arith.addf %420, %421 : vector<2x128xf32>
    %423 = vector.extract_strided_slice %422 {offsets = [0, 0], sizes = [2, 32], strides = [1, 1]} : vector<2x128xf32> to vector<2x32xf32>
    %cst_145 = arith.constant 5.000000e-01 : f32
    %424 = vector.broadcast %cst_145 : f32 to vector<2x32xf32>
    %425 = arith.mulf %424, %423 : vector<2x32xf32>
    %426 = math.tanh %425 : vector<2x32xf32>
    %cst_146 = arith.constant 1.000000e+00 : f32
    %427 = vector.broadcast %cst_146 : f32 to vector<2x32xf32>
    %428 = arith.addf %426, %427 : vector<2x32xf32>
    %cst_147 = arith.constant 5.000000e-01 : f32
    %429 = vector.broadcast %cst_147 : f32 to vector<2x32xf32>
    %430 = arith.mulf %429, %428 : vector<2x32xf32>
    %431 = vector.extract_strided_slice %422 {offsets = [0, 32], sizes = [2, 32], strides = [1, 1]} : vector<2x128xf32> to vector<2x32xf32>
    %cst_148 = arith.constant 5.000000e-01 : f32
    %432 = vector.broadcast %cst_148 : f32 to vector<2x32xf32>
    %433 = arith.mulf %432, %431 : vector<2x32xf32>
    %434 = math.tanh %433 : vector<2x32xf32>
    %cst_149 = arith.constant 1.000000e+00 : f32
    %435 = vector.broadcast %cst_149 : f32 to vector<2x32xf32>
    %436 = arith.addf %434, %435 : vector<2x32xf32>
    %cst_150 = arith.constant 5.000000e-01 : f32
    %437 = vector.broadcast %cst_150 : f32 to vector<2x32xf32>
    %438 = arith.mulf %437, %436 : vector<2x32xf32>
    %439 = vector.extract_strided_slice %422 {offsets = [0, 64], sizes = [2, 32], strides = [1, 1]} : vector<2x128xf32> to vector<2x32xf32>
    %440 = math.tanh %439 : vector<2x32xf32>
    %441 = vector.extract_strided_slice %422 {offsets = [0, 96], sizes = [2, 32], strides = [1, 1]} : vector<2x128xf32> to vector<2x32xf32>
    %cst_151 = arith.constant 5.000000e-01 : f32
    %442 = vector.broadcast %cst_151 : f32 to vector<2x32xf32>
    %443 = arith.mulf %442, %441 : vector<2x32xf32>
    %444 = math.tanh %443 : vector<2x32xf32>
    %cst_152 = arith.constant 1.000000e+00 : f32
    %445 = vector.broadcast %cst_152 : f32 to vector<2x32xf32>
    %446 = arith.addf %444, %445 : vector<2x32xf32>
    %cst_153 = arith.constant 5.000000e-01 : f32
    %447 = vector.broadcast %cst_153 : f32 to vector<2x32xf32>
    %448 = arith.mulf %447, %446 : vector<2x32xf32>
    %449 = arith.mulf %438, %417 : vector<2x32xf32>
    %450 = arith.mulf %430, %440 : vector<2x32xf32>
    %451 = arith.addf %449, %450 : vector<2x32xf32>
    %452 = math.tanh %451 : vector<2x32xf32>
    %453 = arith.mulf %448, %452 : vector<2x32xf32>
    %cst_154 = arith.constant dense<0.000000e+00> : vector<2x128xf32>
    %454 = tpu.matmul %453, %1, %cst_154 {dimension_numbers = #tpu.dot_dimension_numbers<[1], [0], [0], [1], [0, 0, 1, 1], [], []>, precision = #tpu.contract_precision<fp32>} : vector<2x32xf32>, vector<32x128xf32>, vector<2x128xf32> -> vector<2x128xf32>
    %455 = vector.broadcast %2 : vector<1x128xf32> to vector<2x128xf32>
    %456 = arith.addf %454, %455 : vector<2x128xf32>
    %457 = vector.extract_strided_slice %456 {offsets = [0, 0], sizes = [2, 32], strides = [1, 1]} : vector<2x128xf32> to vector<2x32xf32>
    %cst_155 = arith.constant 5.000000e-01 : f32
    %458 = vector.broadcast %cst_155 : f32 to vector<2x32xf32>
    %459 = arith.mulf %458, %457 : vector<2x32xf32>
    %460 = math.tanh %459 : vector<2x32xf32>
    %cst_156 = arith.constant 1.000000e+00 : f32
    %461 = vector.broadcast %cst_156 : f32 to vector<2x32xf32>
    %462 = arith.addf %460, %461 : vector<2x32xf32>
    %cst_157 = arith.constant 5.000000e-01 : f32
    %463 = vector.broadcast %cst_157 : f32 to vector<2x32xf32>
    %464 = arith.mulf %463, %462 : vector<2x32xf32>
    %465 = vector.extract_strided_slice %456 {offsets = [0, 32], sizes = [2, 32], strides = [1, 1]} : vector<2x128xf32> to vector<2x32xf32>
    %cst_158 = arith.constant 5.000000e-01 : f32
    %466 = vector.broadcast %cst_158 : f32 to vector<2x32xf32>
    %467 = arith.mulf %466, %465 : vector<2x32xf32>
    %468 = math.tanh %467 : vector<2x32xf32>
    %cst_159 = arith.constant 1.000000e+00 : f32
    %469 = vector.broadcast %cst_159 : f32 to vector<2x32xf32>
    %470 = arith.addf %468, %469 : vector<2x32xf32>
    %cst_160 = arith.constant 5.000000e-01 : f32
    %471 = vector.broadcast %cst_160 : f32 to vector<2x32xf32>
    %472 = arith.mulf %471, %470 : vector<2x32xf32>
    %473 = vector.extract_strided_slice %456 {offsets = [0, 64], sizes = [2, 32], strides = [1, 1]} : vector<2x128xf32> to vector<2x32xf32>
    %474 = math.tanh %473 : vector<2x32xf32>
    %475 = vector.extract_strided_slice %456 {offsets = [0, 96], sizes = [2, 32], strides = [1, 1]} : vector<2x128xf32> to vector<2x32xf32>
    %cst_161 = arith.constant 5.000000e-01 : f32
    %476 = vector.broadcast %cst_161 : f32 to vector<2x32xf32>
    %477 = arith.mulf %476, %475 : vector<2x32xf32>
    %478 = math.tanh %477 : vector<2x32xf32>
    %cst_162 = arith.constant 1.000000e+00 : f32
    %479 = vector.broadcast %cst_162 : f32 to vector<2x32xf32>
    %480 = arith.addf %478, %479 : vector<2x32xf32>
    %cst_163 = arith.constant 5.000000e-01 : f32
    %481 = vector.broadcast %cst_163 : f32 to vector<2x32xf32>
    %482 = arith.mulf %481, %480 : vector<2x32xf32>
    %483 = arith.mulf %472, %451 : vector<2x32xf32>
    %484 = arith.mulf %464, %474 : vector<2x32xf32>
    %485 = arith.addf %483, %484 : vector<2x32xf32>
    %486 = math.tanh %485 : vector<2x32xf32>
    %487 = arith.mulf %482, %486 : vector<2x32xf32>
    %cst_164 = arith.constant dense<0.000000e+00> : vector<2x128xf32>
    %488 = tpu.matmul %487, %1, %cst_164 {dimension_numbers = #tpu.dot_dimension_numbers<[1], [0], [0], [1], [0, 0, 1, 1], [], []>, precision = #tpu.contract_precision<fp32>} : vector<2x32xf32>, vector<32x128xf32>, vector<2x128xf32> -> vector<2x128xf32>
    %489 = vector.broadcast %2 : vector<1x128xf32> to vector<2x128xf32>
    %490 = arith.addf %488, %489 : vector<2x128xf32>
    %491 = vector.extract_strided_slice %490 {offsets = [0, 0], sizes = [2, 32], strides = [1, 1]} : vector<2x128xf32> to vector<2x32xf32>
    %cst_165 = arith.constant 5.000000e-01 : f32
    %492 = vector.broadcast %cst_165 : f32 to vector<2x32xf32>
    %493 = arith.mulf %492, %491 : vector<2x32xf32>
    %494 = math.tanh %493 : vector<2x32xf32>
    %cst_166 = arith.constant 1.000000e+00 : f32
    %495 = vector.broadcast %cst_166 : f32 to vector<2x32xf32>
    %496 = arith.addf %494, %495 : vector<2x32xf32>
    %cst_167 = arith.constant 5.000000e-01 : f32
    %497 = vector.broadcast %cst_167 : f32 to vector<2x32xf32>
    %498 = arith.mulf %497, %496 : vector<2x32xf32>
    %499 = vector.extract_strided_slice %490 {offsets = [0, 32], sizes = [2, 32], strides = [1, 1]} : vector<2x128xf32> to vector<2x32xf32>
    %cst_168 = arith.constant 5.000000e-01 : f32
    %500 = vector.broadcast %cst_168 : f32 to vector<2x32xf32>
    %501 = arith.mulf %500, %499 : vector<2x32xf32>
    %502 = math.tanh %501 : vector<2x32xf32>
    %cst_169 = arith.constant 1.000000e+00 : f32
    %503 = vector.broadcast %cst_169 : f32 to vector<2x32xf32>
    %504 = arith.addf %502, %503 : vector<2x32xf32>
    %cst_170 = arith.constant 5.000000e-01 : f32
    %505 = vector.broadcast %cst_170 : f32 to vector<2x32xf32>
    %506 = arith.mulf %505, %504 : vector<2x32xf32>
    %507 = vector.extract_strided_slice %490 {offsets = [0, 64], sizes = [2, 32], strides = [1, 1]} : vector<2x128xf32> to vector<2x32xf32>
    %508 = math.tanh %507 : vector<2x32xf32>
    %509 = vector.extract_strided_slice %490 {offsets = [0, 96], sizes = [2, 32], strides = [1, 1]} : vector<2x128xf32> to vector<2x32xf32>
    %cst_171 = arith.constant 5.000000e-01 : f32
    %510 = vector.broadcast %cst_171 : f32 to vector<2x32xf32>
    %511 = arith.mulf %510, %509 : vector<2x32xf32>
    %512 = math.tanh %511 : vector<2x32xf32>
    %cst_172 = arith.constant 1.000000e+00 : f32
    %513 = vector.broadcast %cst_172 : f32 to vector<2x32xf32>
    %514 = arith.addf %512, %513 : vector<2x32xf32>
    %cst_173 = arith.constant 5.000000e-01 : f32
    %515 = vector.broadcast %cst_173 : f32 to vector<2x32xf32>
    %516 = arith.mulf %515, %514 : vector<2x32xf32>
    %517 = arith.mulf %506, %485 : vector<2x32xf32>
    %518 = arith.mulf %498, %508 : vector<2x32xf32>
    %519 = arith.addf %517, %518 : vector<2x32xf32>
    %520 = math.tanh %519 : vector<2x32xf32>
    %521 = arith.mulf %516, %520 : vector<2x32xf32>
    %cst_174 = arith.constant dense<0.000000e+00> : vector<2x128xf32>
    %522 = tpu.matmul %521, %1, %cst_174 {dimension_numbers = #tpu.dot_dimension_numbers<[1], [0], [0], [1], [0, 0, 1, 1], [], []>, precision = #tpu.contract_precision<fp32>} : vector<2x32xf32>, vector<32x128xf32>, vector<2x128xf32> -> vector<2x128xf32>
    %523 = vector.broadcast %2 : vector<1x128xf32> to vector<2x128xf32>
    %524 = arith.addf %522, %523 : vector<2x128xf32>
    %525 = vector.extract_strided_slice %524 {offsets = [0, 0], sizes = [2, 32], strides = [1, 1]} : vector<2x128xf32> to vector<2x32xf32>
    %cst_175 = arith.constant 5.000000e-01 : f32
    %526 = vector.broadcast %cst_175 : f32 to vector<2x32xf32>
    %527 = arith.mulf %526, %525 : vector<2x32xf32>
    %528 = math.tanh %527 : vector<2x32xf32>
    %cst_176 = arith.constant 1.000000e+00 : f32
    %529 = vector.broadcast %cst_176 : f32 to vector<2x32xf32>
    %530 = arith.addf %528, %529 : vector<2x32xf32>
    %cst_177 = arith.constant 5.000000e-01 : f32
    %531 = vector.broadcast %cst_177 : f32 to vector<2x32xf32>
    %532 = arith.mulf %531, %530 : vector<2x32xf32>
    %533 = vector.extract_strided_slice %524 {offsets = [0, 32], sizes = [2, 32], strides = [1, 1]} : vector<2x128xf32> to vector<2x32xf32>
    %cst_178 = arith.constant 5.000000e-01 : f32
    %534 = vector.broadcast %cst_178 : f32 to vector<2x32xf32>
    %535 = arith.mulf %534, %533 : vector<2x32xf32>
    %536 = math.tanh %535 : vector<2x32xf32>
    %cst_179 = arith.constant 1.000000e+00 : f32
    %537 = vector.broadcast %cst_179 : f32 to vector<2x32xf32>
    %538 = arith.addf %536, %537 : vector<2x32xf32>
    %cst_180 = arith.constant 5.000000e-01 : f32
    %539 = vector.broadcast %cst_180 : f32 to vector<2x32xf32>
    %540 = arith.mulf %539, %538 : vector<2x32xf32>
    %541 = vector.extract_strided_slice %524 {offsets = [0, 64], sizes = [2, 32], strides = [1, 1]} : vector<2x128xf32> to vector<2x32xf32>
    %542 = math.tanh %541 : vector<2x32xf32>
    %543 = vector.extract_strided_slice %524 {offsets = [0, 96], sizes = [2, 32], strides = [1, 1]} : vector<2x128xf32> to vector<2x32xf32>
    %cst_181 = arith.constant 5.000000e-01 : f32
    %544 = vector.broadcast %cst_181 : f32 to vector<2x32xf32>
    %545 = arith.mulf %544, %543 : vector<2x32xf32>
    %546 = math.tanh %545 : vector<2x32xf32>
    %cst_182 = arith.constant 1.000000e+00 : f32
    %547 = vector.broadcast %cst_182 : f32 to vector<2x32xf32>
    %548 = arith.addf %546, %547 : vector<2x32xf32>
    %cst_183 = arith.constant 5.000000e-01 : f32
    %549 = vector.broadcast %cst_183 : f32 to vector<2x32xf32>
    %550 = arith.mulf %549, %548 : vector<2x32xf32>
    %551 = arith.mulf %540, %519 : vector<2x32xf32>
    %552 = arith.mulf %532, %542 : vector<2x32xf32>
    %553 = arith.addf %551, %552 : vector<2x32xf32>
    %554 = math.tanh %553 : vector<2x32xf32>
    %555 = arith.mulf %550, %554 : vector<2x32xf32>
    %556 = tpu.concatenate %317, %351, %385, %419, %453, %487, %521, %555 in 1 : vector<2x32xf32>, vector<2x32xf32>, vector<2x32xf32>, vector<2x32xf32>, vector<2x32xf32>, vector<2x32xf32>, vector<2x32xf32>, vector<2x32xf32> -> vector<2x256xf32>
    %c0_184 = arith.constant 0 : index
    %c0_185 = arith.constant 0 : index
    %557 = vector.load %arg7[%c0_184, %c0_185] : memref<2x256xf32, #tpu.memory_space<vmem>>, vector<2x256xf32>
    tpu.vector_store %arg7[%c0_184, %c0_185], %556 {strides = array<i32>} : memref<2x256xf32, #tpu.memory_space<vmem>>, vector<2x256xf32>,
    return
  }
  func.func @transform_0(%arg0: i32) -> (i32, i32) {
    %c0_i32 = arith.constant 0 : i32
    %c0_i32_0 = arith.constant 0 : i32
    %c0_i32_1 = arith.constant 0 : i32
    return %c0_i32, %c0_i32_0 : i32, i32
  }
  func.func @transform_1(%arg0: i32) -> (i32, i32) {
    %c0_i32 = arith.constant 0 : i32
    %c0_i32_0 = arith.constant 0 : i32
    %c0_i32_1 = arith.constant 0 : i32
    return %c0_i32, %c0_i32_0 : i32, i32
  }
  func.func @transform_2(%arg0: i32) -> (i32, i32) {
    %c0_i32 = arith.constant 0 : i32
    %c0_i32_0 = arith.constant 0 : i32
    %c0_i32_1 = arith.constant 0 : i32
    return %c0_i32, %c0_i32_0 : i32, i32
  }
  func.func @transform_3(%arg0: i32) -> (i32, i32) {
    %c0_i32 = arith.constant 0 : i32
    %c0_i32_0 = arith.constant 0 : i32
    %c0_i32_1 = arith.constant 0 : i32
    return %c0_i32, %c0_i32_0 : i32, i32
  }
  func.func @transform_4(%arg0: i32) -> (i32, i32) {
    %c0_i32 = arith.constant 0 : i32
    %c0_i32_0 = arith.constant 0 : i32
    %c0_i32_1 = arith.constant 0 : i32
    return %c0_i32, %c0_i32_0 : i32, i32
  }
  func.func @transform_5(%arg0: i32) -> (i32, i32) {
    %c0_i32 = arith.constant 0 : i32
    %c0_i32_0 = arith.constant 0 : i32
    %c0_i32_1 = arith.constant 0 : i32
    return %c0_i32, %c0_i32_0 : i32, i32
  }
  func.func @transform_6(%arg0: i32) -> (i32, i32) {
    %c0_i32 = arith.constant 0 : i32
    %c0_i32_0 = arith.constant 0 : i32
    %c0_i32_1 = arith.constant 0 : i32
    return %c0_i32, %c0_i32_0 : i32, i32
  }
}

</mosaic_0001>

<bundles_post_ra>
// kernel: seq2seq_pallas.1
= control target key start
LH: loop header
LB: loop body
LE: loop exit
PB: predicated region body
PF: predicated region fallthrough
CT: control target
= control target key end

     0   :  { %11 = vsyncpa [#allocation4], 0  ;;  %s11254_s21 = smov [#allocation3]   ;;  %s12185_s0 = inlined_call_operand.vmem [shape: f32[16,16], index: 0, kind: input, shape index: {}]   ;;  %s12186_s1 = inlined_call_operand.vmem [shape: f32[16,128], index: 1, kind: input, shape index: {}]   ;;  %s12187_s2 = inlined_call_operand.vmem [shape: f32[1,128], index: 2, kind: input, shape index: {}]   ;;  %s12188_s3 = inlined_call_operand.vmem [shape: f32[32,128], index: 3, kind: input, shape index: {}]   ;;  %s12189_s4 = inlined_call_operand.hbm [shape: f32[32,128], index: 4, kind: input, shape index: {}]   ;;  %s12190_s5 = inlined_call_operand.vmem [shape: f32[1,128], index: 5, kind: input, shape index: {}]   ;;  %s12191_s6 = inlined_call_operand.vmem [shape: f32[2,256], index: 6, kind: output, shape index: {}]  }
   0x1   :  { %s25_s22 = sshll.u32 %s11254_s21, 4  ;;  %s11230_s25 = scalar_lea.hbm %s12189_s4, 512  ;;  %s26_s22 = int_to_ptr.vmem [resolvable:$true] %s25_s22 }
   0x2   :  { %p11231_p0 = scmp.ne.s32.totalorder %s12189_s4, %s11230_s25  ;;  %p11234_p1 = scmp.lt.u32.totalorder %s11230_s25, %s12189_s4 }
   0x4   :  { %p11236_p2 = pnand %p11234_p1, %p11231_p0 }
   0x6   :  { %11239 = shalt.err (!%p11236_p2)
}
   0x7   :  { %s11240_s30 = scalar_lea.vmem %s26_s22, 512  ;;  %p11245_p4 = scmp.lt.s32.totalorder %s26_s22, %s26_s22 }
   0x8   :  { %p11241_p3 = scmp.ne.s32.totalorder %s26_s22, %s11240_s30  ;;  %p11246_p5 = scmp.lt.s32.totalorder %s11240_s30, %s11240_s30 }
   0xa   :  { %p11247_p6 = por %p11246_p5, %p11245_p4 }
   0xc   :  { %p11248_p7 = pnand %p11247_p6, %p11241_p3 }
   0xe   :  { %11251 = shalt.err (!%p11248_p7)
}
   0xf   :  { %s11255_s7 = smov 128   ;;  %s11256_s8 = smov 8  }
  0x10   :  { %31 = dma.hbm_to_vmem [thread:$0]  %s12189_s4, 512, %s26_s22, [#allocation4], %s11255_s7, %s11255_s7, %s11256_s8  }
  0x11   :  { %11252 = dma.done.wait [#allocation4], 512  }
  0x12   :  { %11253 = vsyncadd [#allocation4], 4294966784  ;;  %vm57_vm0 = vcmask 130048   ;;  %v48_v0 = vld [vmem:[%s12186_s1] sm:$0xff]  ;;  %v49_v1 = vld [vmem:[%s12186_s1 + $0x8] sm:$0xff]  ;;  %v11257_v31 = vmov 0.0|0.0  }
  0x13   :  { %v46_v2 = vld [vmem:[%s12185_s0] sm:$0xff]  ;;  %v65_v3 = vand.u32 4294901760, %v48_v0  ;;  %v68_v4 = vand.u32 4294901760, %v49_v1  ;;  %v47_v6 = vld [vmem:[%s12185_s0 + $0x8] sm:$0xff]  ;;  %v39_v13 = vld [vmem:[%s12188_s3 + $0x10] sm:$0xff]  ;;  %vm11258_vm1 = vmmov 0  }
  0x14   :  { %v59_v5 = vsel %vm57_vm0, %v46_v2, 0  ;;  %v37_v7 = vld [vmem:[%s12188_s3] sm:$0xff]  ;;  %v38_v8 = vld [vmem:[%s12188_s3 + $0x8] sm:$0xff]  ;;  %v62_v10 = vsel %vm57_vm0, %v47_v6, 0  ;;  %v40_v14 = vld [vmem:[%s12188_s3 + $0x18] sm:$0xff]  ;;  %v580_v20 = vand.u32 4294901760, %v39_v13 }
  0x15   :  { %v11328_v9 = vand.u32 4294901760, %v59_v5  ;;  %v574_v11 = vand.u32 4294901760, %v37_v7  ;;  %v577_v12 = vand.u32 4294901760, %v38_v8  ;;  %v11336_v15 = vpack.c.bf16 %v68_v4, %v65_v3  ;;  %s11261_s25 = smov 32  }
  0x16   :  { %v11338_v16 = vsub.f32 %v48_v0, %v65_v3  ;;  %v11340_v17 = vsub.f32 %v49_v1, %v68_v4  ;;  %v11342_v18 = vand.u32 4294901760, %v62_v10  ;;  %v583_v21 = vand.u32 4294901760, %v40_v14 }
  0x17   :  { %9338 = vmatprep.mubr.f32.mxu0 %v11328_v9  ;;  %v11346_v19 = vsub.f32 %v59_v5, %v11328_v9  ;;  %10426 = vmatprep.subr.bf16.mxu1 %v11336_v15  ;;  %v11356_v26 = vpack.c.bf16 %v577_v12, %v574_v11  ;;  %v11358_v27 = vsub.f32 %v37_v7, %v574_v11  ;;  %v11259_v54 = vmov 0.0  }
  0x18   :  { %v154_v22 = vand.u32 4294901760, %v11338_v16  ;;  %v161_v23 = vand.u32 4294901760, %v11340_v17  ;;  %v11352_v24 = vsub.f32 %v62_v10, %v11342_v18  ;;  %10428 = vmatpush3.bf16.msra.mxu1 %v11336_v15  ;;  %v11360_v28 = vsub.f32 %v38_v8, %v577_v12  ;;  %v8820_v10 = vld [vmem:[%s12187_s2] ss:$0 sm:$0xff]  ;;  %s11260_s2 = smov 64  }
  0x19   :  { %v133_v25 = vand.u32 4294901760, %v11346_v19  ;;  %10449 = vmatprep.subr.bf16.mxu1 %v11257_v31  ;;  %v11366_v33 = vsub.f32 %v39_v13, %v580_v20  ;;  %v655_v35 = vand.u32 4294901760, %v11358_v27  ;;  %v11371_v37 = vsub.f32 %v40_v14, %v583_v21 }
  0x1a   :  { %v155_v29 = vsub.f32 %v11338_v16, %v154_v22  ;;  %v162_v30 = vsub.f32 %v11340_v17, %v161_v23  ;;  %v143_v32 = vand.u32 4294901760, %v11352_v24  ;;  %v662_v36 = vand.u32 4294901760, %v11360_v28 }
  0x1b   :  { %v134_v34 = vsub.f32 %v11346_v19, %v133_v25  ;;  %v669_v41 = vand.u32 4294901760, %v11366_v33  ;;  %v656_v43 = vsub.f32 %v11358_v27, %v655_v35  ;;  %v676_v45 = vand.u32 4294901760, %v11371_v37 }
  0x1c   :  { %v156_v38 = vand.u32 4294901760, %v155_v29  ;;  %v163_v39 = vand.u32 4294901760, %v162_v30  ;;  %v144_v40 = vsub.f32 %v11352_v24, %v143_v32  ;;  %v663_v44 = vsub.f32 %v11360_v28, %v662_v36 }
  0x1d   :  { %v135_v42 = vand.u32 4294901760, %v134_v34  ;;  %v10433_v47 = vpack.c.bf16 %v11340_v17, %v11338_v16  ;;  %v11380_v49 = vpack.c.bf16 %v583_v21, %v580_v20  ;;  %v657_v50 = vand.u32 4294901760, %v656_v43 }
  0x1e   :  { %v10429_v46 = vpack.c.bf16 %v163_v39, %v156_v38  ;;  %v145_v48 = vand.u32 4294901760, %v144_v40  ;;  %v664_v51 = vand.u32 4294901760, %v663_v44  ;;  %v670_v52 = vsub.f32 %v11366_v33, %v669_v41 }
  0x1f   :  { %9331 = vmatprep.mubr.f32.mxu1 %v135_v42  ;;  %v677_v53 = vsub.f32 %v11371_v37, %v676_v45  ;;  %v10441_v59 = vpack.c.bf16 %v161_v23, %v154_v22  ;;  %v11407_v60 = vpack.c.bf16 %v11360_v28, %v11358_v27  ;;  %v11414_v61 = vpack.c.bf16 %v11371_v37, %v11366_v33 }
  0x20   :  { %10430 = vmatprep.subr.bf16.mxu0 %v10429_v46  ;;  %9332 = vmatmul.mubr.f32.vlgmr.msra.gmra.mrb[0].mxu1 %v145_v48  ;;  %v11390_v55 = vpack.c.bf16 %v664_v51, %v657_v50  ;;  %v671_v56 = vand.u32 4294901760, %v670_v52  ;;  %v11420_v62 = vpack.c.bf16 %v662_v36, %v655_v35  ;;  %v11430_v63 = vpack.c.bf16 %v676_v45, %v669_v41 }
  0x21   :  { %10432 = vmatpush3.bf16.msra.mxu0 %v10429_v46  ;;  %10451 = vmatpush3.bf16.msra.mxu1 %v11356_v26  ;;  %v678_v57 = vand.u32 4294901760, %v677_v53  ;;  %vm569_vm2 = vcmask 261120   ;;  %vm8796_vm3 = vcmask 523264   ;;  %vm8798_vm4 = vcmask 785408  }
  0x22   :  { %10434 = vmatprep.subr.bf16.mxu0 %v10433_v47  ;;  %10452 = vmatprep.subr.bf16.mxu1 %v11257_v31 }
  0x23   :  { %9377 = vmatprep.mubr.msk.f32.mxu1 %vm11258_vm1, %v11259_v54  ;;  %v11397_v58 = vpack.c.bf16 %v678_v57, %v671_v56 }
  0x24   :  { %9339 = vmatmul.mubr.f32.vlgmr.msra.gmra.mrb[0].mxu0 %v11342_v18 }
  0x25   :  { %10436 = vmatpush3.bf16.msra.mxu0 %v10433_v47  ;;  %10454 = vmatpush3.bf16.msra.mxu1 %v11380_v49 }
  0x26   :  { %9345 = vmatprep.mubr.f32.mxu0 %v11346_v19  ;;  %10438 = vmatprep.subr.bf16.mxu0 %v11336_v15 }
  0x27   :  { %10455 = vmatprep.subr.bf16.mxu1 %v11257_v31 }
  0x28   :  { %9378 = vmatmul.mubr.f32.vlgmr.msra.gmra.mrb[2].mxu1 %v11259_v54 }
  0x29   :  { %10457 = vmatpush3.bf16.msra.mxu1 %v11390_v55  ;;  %9388 = vmatprep.mubr.msk.f32.mxu1 %vm11258_vm1, %v11259_v54 }
  0x2a   :  { %10458 = vmatprep.subr.bf16.mxu1 %v11257_v31 }
  0x2c   :  { %9346 = vmatmul.mubr.f32.vlgmr.msra.gmra.mrb[0].mxu0 %v11352_v24 }
  0x2d   :  { %10440 = vmatpush3.bf16.msra.mxu0 %v11336_v15  ;;  %10460 = vmatpush3.bf16.msra.mxu1 %v11397_v58 }
  0x2e   :  { %9352 = vmatprep.mubr.f32.mxu0 %v133_v25  ;;  %10442 = vmatprep.subr.bf16.mxu0 %v10441_v59 }
  0x2f   :  { %10461 = vmatprep.subr.bf16.mxu1 %v11257_v31 }
  0x30   :  { %9389 = vmatmul.mubr.f32.vlgmr.msra.gmra.mrb[4].mxu1 %v11259_v54 }
  0x31   :  { %10463 = vmatpush3.bf16.msra.mxu1 %v11407_v60  ;;  %9399 = vmatprep.mubr.msk.f32.mxu1 %vm11258_vm1, %v11259_v54 }
  0x32   :  { %10464 = vmatprep.subr.bf16.mxu1 %v11257_v31 }
  0x34   :  { %9353 = vmatmul.mubr.f32.vlgmr.msra.gmra.mrb[0].mxu0 %v143_v32 }
  0x35   :  { %10444 = vmatpush3.bf16.msra.mxu0 %v10441_v59  ;;  %10466 = vmatpush3.bf16.msra.mxu1 %v11414_v61 }
  0x36   :  { %9359 = vmatprep.mubr.f32.mxu0 %v11328_v9  ;;  %10446 = vmatprep.subr.bf16.mxu0 %v11336_v15 }
  0x37   :  { %10473 = vmatprep.subr.bf16.mxu1 %v11257_v31 }
  0x38   :  { %9400 = vmatmul.mubr.f32.vlgmr.msra.gmra.mrb[6].mxu1 %v11259_v54 }
  0x39   :  { %10475 = vmatpush3.bf16.msra.mxu1 %v11420_v62  ;;  %9421 = vmatprep.mubr.msk.f32.mxu1 %vm11258_vm1, %v11259_v54 }
  0x3a   :  { %10476 = vmatprep.subr.bf16.mxu1 %v11257_v31 }
  0x3c   :  { %9360 = vmatmul.mubr.f32.vlgmr.msra.gmra.mrb[0].mxu0 %v11342_v18 }
  0x3d   :  { %10448 = vmatpush3.bf16.msra.mxu0 %v11336_v15  ;;  %9366 = vmatprep.mubr.f32.mxu0 %v11328_v9 }
  0x3e   :  { %10467 = vmatprep.subr.bf16.mxu0 %v11257_v31  ;;  %10478 = vmatpush3.bf16.msra.mxu1 %v11430_v63 }
  0x3f   :  { %10485 = vmatprep.subr.bf16.mxu1 %v11257_v31 }
  0x41   :  { %9422 = vmatmul.mubr.f32.vlgmr.msra.gmra.mrb[8].mxu1 %v11259_v54 }
  0x42   :  { %10487 = vmatpush3.bf16.msra.mxu1 %v11356_v26  ;;  %9443 = vmatprep.mubr.msk.f32.mxu1 %vm11258_vm1, %v11259_v54 }
  0x43   :  { %10488 = vmatprep.subr.bf16.mxu1 %v11257_v31 }
  0x44   :  { %9367 = vmatmul.mubr.f32.vlgmr.msra.gmra.mrb[0].mxu0 %v11342_v18 }
  0x45   :  { %10469 = vmatpush3.bf16.msra.mxu0 %v11356_v26  ;;  %9410 = vmatprep.mubr.msk.f32.mxu0 %vm11258_vm1, %v11259_v54 }
  0x46   :  { %10470 = vmatprep.subr.bf16.mxu0 %v11257_v31  ;;  %10490 = vmatpush3.bf16.msra.mxu1 %v11380_v49 }
  0x47   :  { %10497 = vmatprep.subr.bf16.mxu1 %v11257_v31 }
  0x49   :  { %10472 = vmatpush3.bf16.msra.mxu0 %v11380_v49 }
  0x4a   :  { %10479 = vmatprep.subr.bf16.mxu0 %v11257_v31 }
  0x4c   :  { %9411 = vmatmul.mubr.f32.vlgmr.msra.gmra.mrb[2].mxu0 %v11259_v54 }
  0x4d   :  { %10481 = vmatpush3.bf16.msra.mxu0 %v11356_v26  ;;  %9432 = vmatprep.mubr.msk.f32.mxu0 %vm11258_vm1, %v11259_v54 }
  0x4e   :  { %10482 = vmatprep.subr.bf16.mxu0 %v11257_v31 }
  0x51   :  { %10484 = vmatpush3.bf16.msra.mxu0 %v11380_v49 }
  0x52   :  { %10491 = vmatprep.subr.bf16.mxu0 %v11257_v31 }
  0x54   :  { %9433 = vmatmul.mubr.f32.vlgmr.msra.gmra.mrb[4].mxu0 %v11259_v54 }
  0x55   :  { %10493 = vmatpush3.bf16.msra.mxu0 %v11390_v55  ;;  %9454 = vmatprep.mubr.msk.f32.mxu0 %vm11258_vm1, %v11259_v54 }
  0x56   :  { %10494 = vmatprep.subr.bf16.mxu0 %v11257_v31 }
  0x59   :  { %10496 = vmatpush3.bf16.msra.mxu0 %v11397_v58 }
  0x5a   :  { %10503 = vmatprep.subr.bf16.mxu0 %v11257_v31 }
  0xf3   :  { %v9333_v0 = vpop.f32.mrb[0].mxu1 }
  0xf4   :  { %v137_v1 = vpop.f32.mrb[1].mxu1  ;;  %v148_v13 = vadd.f32 %v9333_v0, %v8820_v10 }
  0xf5   :  { %v138_v14 = vadd.f32 %v8820_v10, %v137_v1 }
  0xfb   :  { %v648_v2 = vpop.f32.mrb[2].mxu1 }
  0xfc   :  { %v9379_v3 = vpop.f32.mrb[3].mxu1 }
 0x103   :  { %v739_v4 = vpop.f32.mrb[4].mxu1 }
 0x104   :  { %v740_v5 = vadd.f32 %v739_v4, %v648_v2  ;;  %v9390_v6 = vpop.f32.mrb[5].mxu1 }
 0x10b   :  { %v819_v7 = vpop.f32.mrb[6].mxu1 }
 0x10c   :  { %v820_v8 = vadd.f32 %v819_v7, %v740_v5  ;;  %v9401_v9 = vpop.f32.mrb[7].mxu1 }
 0x114   :  { %v979_v11 = vpop.f32.mrb[8].mxu1 }
 0x115   :  { %v9423_v12 = vpop.f32.mrb[9].mxu1 }
 0x117   :  { %v9368_v15 = vpop.f32.mrb[0].mxu0 }
 0x118   :  { %v11026_v16 = vadd.f32 %v9368_v15, %v148_v13  ;;  %v556_v17 = vpop.f32.mrb[1].mxu0 }
 0x119   :  { %v11028_v18 = vadd.f32 %v556_v17, %v138_v14 }
 0x11a   :  { %567 = vst [vmem:[#allocation2 + $0x8] sm:$0xff] %v11026_v16 }
 0x11b   :  { %566 = vst [vmem:[#allocation2] sm:$0xff] %v11028_v18 }
 0x11f   :  { %v896_v19 = vpop.f32.mrb[2].mxu0 }
 0x120   :  { %v897_v20 = vadd.f32 %v896_v19, %v820_v8  ;;  %v9412_v21 = vpop.f32.mrb[3].mxu0 }
 0x122   :  { %v980_v22 = vadd.f32 %v979_v11, %v897_v20  ;;  %v568_v27 = vld [vmem:[#allocation2] sm:$0x3]  ;;  %v1081_v11 = vld [vmem:[#allocation2 + $0x2] sm:$0x3] }
 0x127   :  { %v1054_v23 = vpop.f32.mrb[4].mxu0 }
 0x128   :  { %v1055_v24 = vadd.f32 %v1054_v23, %v980_v22  ;;  %v9434_v25 = vpop.f32.mrb[5].mxu0 }
 0x12a   :  { %v1058_v28 = vadd.f32 %v1055_v24, %v568_v27 }
 0x12c   :  { %11134 = vtanh.f32 %v1058_v28  ;;  %v1059_v30 = vmul.f32 0.5, %v1058_v28 }
 0x12e   :  { %11136 = vtanh.f32 %v1059_v30 }
 0x136   :  { %v11135_v29 = vpop.eup %11134 }
 0x137   :  { %1066 = vrot.lane.b32.xlu0 %v11135_v29, %s11260_s2 }
 0x138   :  { %v11137_v32 = vpop.eup %11136 }
 0x139   :  { %v1061_v33 = vadd.f32 1.0, %v11137_v32 }
 0x13b   :  { %v1062_v34 = vmul.f32 0.5, %v1061_v33 }
 0x13d   :  { %v1064_v37 = vmul.f32 0.0, %v1062_v34 }
 0x1a9   :  { %v1067_v35 = vpop.permute.xlu0 %1066 }
 0x1aa   :  { %v1069_v36 = vmul.f32 %v1067_v35, %v1062_v34 }
 0x1ac   :  { %1071 = vrot.lane.b32.xlu0 %v1069_v36, %s11261_s25 }
 0x21e   :  { %v1072_v38 = vpop.permute.xlu0 %1071 }
 0x21f   :  { %v11471_v39 = vadd.f32 %v1072_v38, %v1064_v37 }
 0x221   :  { %11138 = vtanh.f32 %v11471_v39 }
 0x22b   :  { %v11139_v40 = vpop.eup %11138 }
 0x22c   :  { %1077 = vrot.lane.b32.xlu1 %v11139_v40, %s11260_s2 }
 0x29e   :  { %v1078_v41 = vpop.permute.xlu1 %1077 }
 0x29f   :  { %v1080_v42 = vmul.f32 %v1078_v41, %v1062_v34 }
 0x2a1   :  { %1083 = vrot.lane.b32.xlu1 %v1080_v42, %s11261_s25 }
 0x313   :  { %v1084_v43 = vpop.permute.xlu1 %1083 }
 0x314   :  { %v1085_v44 = vsel %vm569_vm2, %v1084_v43, 0 }
 0x315   :  { %v1156_v45 = vand.u32 4294901760, %v1085_v44 }
 0x317   :  { %v1157_v46 = vsub.f32 %v1085_v44, %v1156_v45  ;;  %9455 = vmatmul.mubr.f32.vlgmr.msra.gmra.mrb[6].mxu0 %v1156_v45 }
 0x318   :  { %10505 = vmatpush3.bf16.msra.mxu0 %v11356_v26  ;;  %9476 = vmatprep.mubr.msk.f32.mxu0 %vm11258_vm1, %v11259_v54 }
 0x319   :  { %v1158_v47 = vand.u32 4294901760, %v1157_v46  ;;  %10506 = vmatprep.subr.bf16.mxu0 %v11257_v31 }
 0x31b   :  { %v1159_v48 = vsub.f32 %v1157_v46, %v1158_v47 }
 0x31c   :  { %10508 = vmatpush3.bf16.msra.mxu0 %v11380_v49 }
 0x31d   :  { %v1160_v50 = vand.u32 4294901760, %v1159_v48  ;;  %10515 = vmatprep.subr.bf16.mxu0 %v11257_v31 }
 0x31f   :  { %9477 = vmatmul.mubr.f32.vlgmr.msra.gmra.mrb[8].mxu0 %v1158_v47  ;;  %9444 = vmatmul.mubr.f32.vlgmr.msra.gmra.mrb[10].mxu1 %v1160_v50 }
 0x320   :  { %10499 = vmatpush3.bf16.msra.mxu1 %v11407_v60  ;;  %10517 = vmatpush3.bf16.msra.mxu0 %v11356_v26 }
 0x321   :  { %10500 = vmatprep.subr.bf16.mxu1 %v11257_v31  ;;  %10518 = vmatprep.subr.bf16.mxu0 %v11257_v31 }
 0x322   :  { %9465 = vmatprep.mubr.msk.f32.mxu1 %vm11258_vm1, %v11259_v54  ;;  %9498 = vmatprep.mubr.msk.f32.mxu0 %vm11258_vm1, %v11259_v54 }
 0x324   :  { %10502 = vmatpush3.bf16.msra.mxu1 %v11414_v61  ;;  %10520 = vmatpush3.bf16.msra.mxu0 %v11380_v49 }
 0x325   :  { %10509 = vmatprep.subr.bf16.mxu1 %v11257_v31  ;;  %10527 = vmatprep.subr.bf16.mxu0 %v11257_v31 }
 0x327   :  { %9466 = vmatmul.mubr.f32.vlgmr.msra.gmra.mrb[12].mxu1 %v1157_v46  ;;  %9499 = vmatmul.mubr.f32.vlgmr.msra.gmra.mrb[10].mxu0 %v1156_v45 }
 0x328   :  { %10511 = vmatpush3.bf16.msra.mxu1 %v11420_v62  ;;  %9487 = vmatprep.mubr.msk.f32.mxu1 %vm11258_vm1, %v11259_v54 }
 0x329   :  { %10512 = vmatprep.subr.bf16.mxu1 %v11257_v31  ;;  %10529 = vmatpush3.bf16.msra.mxu0 %v11390_v55 }
 0x32a   :  { %10530 = vmatprep.subr.bf16.mxu0 %v11257_v31  ;;  %9520 = vmatprep.mubr.msk.f32.mxu0 %vm11258_vm1, %v11259_v54 }
 0x32c   :  { %10514 = vmatpush3.bf16.msra.mxu1 %v11430_v63 }
 0x32d   :  { %10532 = vmatpush3.bf16.msra.mxu0 %v11397_v58  ;;  %10521 = vmatprep.subr.bf16.mxu1 %v11257_v31 }
 0x32e   :  { %10539 = vmatprep.subr.bf16.mxu0 %v11257_v31 }
 0x32f   :  { %9488 = vmatmul.mubr.f32.vlgmr.msra.gmra.mrb[14].mxu1 %v1156_v45 }
 0x330   :  { %10523 = vmatpush3.bf16.msra.mxu1 %v11356_v26  ;;  %9509 = vmatprep.mubr.msk.f32.mxu1 %vm11258_vm1, %v11259_v54 }
 0x331   :  { %10524 = vmatprep.subr.bf16.mxu1 %v11257_v31 }
 0x334   :  { %10526 = vmatpush3.bf16.msra.mxu1 %v11380_v49 }
 0x335   :  { %10533 = vmatprep.subr.bf16.mxu1 %v11257_v31 }
 0x3ea   :  { %v1253_v51 = vpop.f32.mrb[6].mxu0 }
 0x3eb   :  { %v9456_v52 = vpop.f32.mrb[7].mxu0 }
 0x3f2   :  { %v1410_v53 = vpop.f32.mrb[8].mxu0  ;;  %v1162_v56 = vpop.f32.mrb[10].mxu1 }
 0x3f3   :  { %v1254_v57 = vadd.f32 %v1253_v51, %v1162_v56  ;;  %v9478_v59 = vpop.f32.mrb[9].mxu0  ;;  %v9445_v0 = vpop.f32.mrb[11].mxu1 }
 0x3fa   :  { %v1333_v1 = vpop.f32.mrb[12].mxu1  ;;  %v1568_v2 = vpop.f32.mrb[10].mxu0 }
 0x3fb   :  { %v1334_v3 = vadd.f32 %v1333_v1, %v1254_v57  ;;  %v9467_v4 = vpop.f32.mrb[13].mxu1  ;;  %v9500_v5 = vpop.f32.mrb[11].mxu0 }
 0x3fd   :  { %v1411_v6 = vadd.f32 %v1410_v53, %v1334_v3  ;;  %v1595_v53 = vld [vmem:[#allocation2 + $0x4] sm:$0x3] }
 0x402   :  { %v1493_v7 = vpop.f32.mrb[14].mxu1 }
 0x403   :  { %v1494_v8 = vadd.f32 %v1493_v7, %v1411_v6  ;;  %v9489_v9 = vpop.f32.mrb[15].mxu1 }
 0x405   :  { %v1569_v10 = vadd.f32 %v1568_v2, %v1494_v8 }
 0x407   :  { %v1572_v12 = vadd.f32 %v1569_v10, %v1081_v11 }
 0x409   :  { %11140 = vtanh.f32 %v1572_v12  ;;  %v1573_v14 = vmul.f32 0.5, %v1572_v12 }
 0x40b   :  { %11142 = vtanh.f32 %v1573_v14 }
 0x413   :  { %v11141_v13 = vpop.eup %11140 }
 0x414   :  { %1580 = vrot.lane.b32.xlu0 %v11141_v13, %s11260_s2 }
 0x415   :  { %v11143_v15 = vpop.eup %11142 }
 0x416   :  { %v1575_v16 = vadd.f32 1.0, %v11143_v15 }
 0x418   :  { %v1576_v17 = vmul.f32 0.5, %v1575_v16 }
 0x41a   :  { %v1578_v20 = vmul.f32 %v1576_v17, %v11471_v39 }
 0x486   :  { %v1581_v18 = vpop.permute.xlu0 %1580 }
 0x487   :  { %v1583_v19 = vmul.f32 %v1581_v18, %v1576_v17 }
 0x489   :  { %1585 = vrot.lane.b32.xlu1 %v1583_v19, %s11261_s25 }
 0x4fb   :  { %v1586_v21 = vpop.permute.xlu1 %1585 }
 0x4fc   :  { %v11516_v22 = vadd.f32 %v1586_v21, %v1578_v20 }
 0x4fe   :  { %11144 = vtanh.f32 %v11516_v22 }
 0x508   :  { %v11145_v23 = vpop.eup %11144 }
 0x509   :  { %1591 = vrot.lane.b32.xlu0 %v11145_v23, %s11260_s2 }
 0x57b   :  { %v1592_v24 = vpop.permute.xlu0 %1591 }
 0x57c   :  { %v1594_v25 = vmul.f32 %v1592_v24, %v1576_v17 }
 0x57e   :  { %1597 = vrot.lane.b32.xlu1 %v1594_v25, %s11261_s25 }
 0x5f0   :  { %v1598_v27 = vpop.permute.xlu1 %1597 }
 0x5f1   :  { %v1599_v28 = vsel %vm569_vm2, %v1598_v27, 0 }
 0x5f2   :  { %v1670_v29 = vand.u32 4294901760, %v1599_v28 }
 0x5f4   :  { %v1671_v30 = vsub.f32 %v1599_v28, %v1670_v29  ;;  %9521 = vmatmul.mubr.f32.vlgmr.msra.gmra.mrb[12].mxu0 %v1670_v29 }
 0x5f5   :  { %10541 = vmatpush3.bf16.msra.mxu0 %v11356_v26  ;;  %9542 = vmatprep.mubr.msk.f32.mxu0 %vm11258_vm1, %v11259_v54 }
 0x5f6   :  { %v1672_v32 = vand.u32 4294901760, %v1671_v30  ;;  %10542 = vmatprep.subr.bf16.mxu0 %v11257_v31 }
 0x5f8   :  { %v1673_v33 = vsub.f32 %v1671_v30, %v1672_v32 }
 0x5f9   :  { %10544 = vmatpush3.bf16.msra.mxu0 %v11380_v49 }
 0x5fa   :  { %v1674_v34 = vand.u32 4294901760, %v1673_v33  ;;  %10551 = vmatprep.subr.bf16.mxu0 %v11257_v31 }
 0x5fc   :  { %9543 = vmatmul.mubr.f32.vlgmr.msra.gmra.mrb[14].mxu0 %v1672_v32  ;;  %9510 = vmatmul.mubr.f32.vlgmr.msra.gmra.mrb[16].mxu1 %v1674_v34 }
 0x5fd   :  { %10535 = vmatpush3.bf16.msra.mxu1 %v11407_v60  ;;  %10553 = vmatpush3.bf16.msra.mxu0 %v11356_v26 }
 0x5fe   :  { %10536 = vmatprep.subr.bf16.mxu1 %v11257_v31  ;;  %10554 = vmatprep.subr.bf16.mxu0 %v11257_v31 }
 0x5ff   :  { %9531 = vmatprep.mubr.msk.f32.mxu1 %vm11258_vm1, %v11259_v54  ;;  %9564 = vmatprep.mubr.msk.f32.mxu0 %vm11258_vm1, %v11259_v54 }
 0x601   :  { %10538 = vmatpush3.bf16.msra.mxu1 %v11414_v61  ;;  %10556 = vmatpush3.bf16.msra.mxu0 %v11380_v49 }
 0x602   :  { %10545 = vmatprep.subr.bf16.mxu1 %v11257_v31  ;;  %10563 = vmatprep.subr.bf16.mxu0 %v11257_v31 }
 0x604   :  { %9532 = vmatmul.mubr.f32.vlgmr.msra.gmra.mrb[18].mxu1 %v1671_v30  ;;  %9565 = vmatmul.mubr.f32.vlgmr.msra.gmra.mrb[16].mxu0 %v1670_v29 }
 0x605   :  { %10547 = vmatpush3.bf16.msra.mxu1 %v11420_v62  ;;  %9553 = vmatprep.mubr.msk.f32.mxu1 %vm11258_vm1, %v11259_v54 }
 0x606   :  { %10548 = vmatprep.subr.bf16.mxu1 %v11257_v31  ;;  %10565 = vmatpush3.bf16.msra.mxu0 %v11390_v55 }
 0x607   :  { %10566 = vmatprep.subr.bf16.mxu0 %v11257_v31  ;;  %9586 = vmatprep.mubr.msk.f32.mxu0 %vm11258_vm1, %v11259_v54 }
 0x609   :  { %10550 = vmatpush3.bf16.msra.mxu1 %v11430_v63 }
 0x60a   :  { %10568 = vmatpush3.bf16.msra.mxu0 %v11397_v58  ;;  %10557 = vmatprep.subr.bf16.mxu1 %v11257_v31 }
 0x60b   :  { %10575 = vmatprep.subr.bf16.mxu0 %v11257_v31 }
 0x60c   :  { %9554 = vmatmul.mubr.f32.vlgmr.msra.gmra.mrb[20].mxu1 %v1670_v29 }
 0x60d   :  { %10559 = vmatpush3.bf16.msra.mxu1 %v11356_v26  ;;  %9575 = vmatprep.mubr.msk.f32.mxu1 %vm11258_vm1, %v11259_v54 }
 0x60e   :  { %10560 = vmatprep.subr.bf16.mxu1 %v11257_v31 }
 0x611   :  { %10562 = vmatpush3.bf16.msra.mxu1 %v11380_v49 }
 0x612   :  { %10569 = vmatprep.subr.bf16.mxu1 %v11257_v31 }
 0x6c7   :  { %v1767_v35 = vpop.f32.mrb[12].mxu0 }
 0x6c8   :  { %v9522_v36 = vpop.f32.mrb[13].mxu0 }
 0x6cf   :  { %v1924_v37 = vpop.f32.mrb[14].mxu0  ;;  %v1676_v38 = vpop.f32.mrb[16].mxu1 }
 0x6d0   :  { %v1768_v39 = vadd.f32 %v1767_v35, %v1676_v38  ;;  %v9544_v40 = vpop.f32.mrb[15].mxu0  ;;  %v9511_v41 = vpop.f32.mrb[17].mxu1 }
 0x6d7   :  { %v1847_v42 = vpop.f32.mrb[18].mxu1  ;;  %v2082_v43 = vpop.f32.mrb[16].mxu0 }
 0x6d8   :  { %v1848_v44 = vadd.f32 %v1847_v42, %v1768_v39  ;;  %v9533_v45 = vpop.f32.mrb[19].mxu1  ;;  %v9566_v46 = vpop.f32.mrb[17].mxu0 }
 0x6da   :  { %v1925_v47 = vadd.f32 %v1924_v37, %v1848_v44  ;;  %v2109_v37 = vld [vmem:[#allocation2 + $0x6] sm:$0x3] }
 0x6df   :  { %v2007_v48 = vpop.f32.mrb[20].mxu1 }
 0x6e0   :  { %v2008_v50 = vadd.f32 %v2007_v48, %v1925_v47  ;;  %v9555_v51 = vpop.f32.mrb[21].mxu1 }
 0x6e2   :  { %v2083_v52 = vadd.f32 %v2082_v43, %v2008_v50 }
 0x6e4   :  { %v2086_v56 = vadd.f32 %v2083_v52, %v1595_v53 }
 0x6e6   :  { %11146 = vtanh.f32 %v2086_v56  ;;  %v2087_v59 = vmul.f32 0.5, %v2086_v56 }
 0x6e8   :  { %11148 = vtanh.f32 %v2087_v59 }
 0x6f0   :  { %v11147_v57 = vpop.eup %11146 }
 0x6f1   :  { %2094 = vrot.lane.b32.xlu0 %v11147_v57, %s11260_s2 }
 0x6f2   :  { %v11149_v0 = vpop.eup %11148 }
 0x6f3   :  { %v2089_v1 = vadd.f32 1.0, %v11149_v0 }
 0x6f5   :  { %v2090_v2 = vmul.f32 0.5, %v2089_v1 }
 0x6f7   :  { %v2092_v5 = vmul.f32 %v2090_v2, %v11516_v22 }
 0x763   :  { %v2095_v3 = vpop.permute.xlu0 %2094 }
 0x764   :  { %v2097_v4 = vmul.f32 %v2095_v3, %v2090_v2 }
 0x766   :  { %2099 = vrot.lane.b32.xlu1 %v2097_v4, %s11261_s25 }
 0x7d8   :  { %v2100_v6 = vpop.permute.xlu1 %2099 }
 0x7d9   :  { %v11561_v7 = vadd.f32 %v2100_v6, %v2092_v5 }
 0x7db   :  { %11150 = vtanh.f32 %v11561_v7 }
 0x7e5   :  { %v11151_v8 = vpop.eup %11150 }
 0x7e6   :  { %2105 = vrot.lane.b32.xlu0 %v11151_v8, %s11260_s2 }
 0x858   :  { %v2106_v9 = vpop.permute.xlu0 %2105 }
 0x859   :  { %v2108_v10 = vmul.f32 %v2106_v9, %v2090_v2 }
 0x85b   :  { %2111 = vrot.lane.b32.xlu1 %v2108_v10, %s11261_s25 }
 0x8cd   :  { %v2112_v11 = vpop.permute.xlu1 %2111 }
 0x8ce   :  { %v2113_v12 = vsel %vm569_vm2, %v2112_v11, 0 }
 0x8cf   :  { %v2184_v13 = vand.u32 4294901760, %v2113_v12 }
 0x8d1   :  { %v2185_v14 = vsub.f32 %v2113_v12, %v2184_v13  ;;  %9587 = vmatmul.mubr.f32.vlgmr.msra.gmra.mrb[18].mxu0 %v2184_v13 }
 0x8d2   :  { %10577 = vmatpush3.bf16.msra.mxu0 %v11356_v26  ;;  %9608 = vmatprep.mubr.msk.f32.mxu0 %vm11258_vm1, %v11259_v54 }
 0x8d3   :  { %v2186_v15 = vand.u32 4294901760, %v2185_v14  ;;  %10578 = vmatprep.subr.bf16.mxu0 %v11257_v31 }
 0x8d5   :  { %v2187_v16 = vsub.f32 %v2185_v14, %v2186_v15 }
 0x8d6   :  { %10580 = vmatpush3.bf16.msra.mxu0 %v11380_v49 }
 0x8d7   :  { %v2188_v17 = vand.u32 4294901760, %v2187_v16  ;;  %10587 = vmatprep.subr.bf16.mxu0 %v11257_v31 }
 0x8d9   :  { %9609 = vmatmul.mubr.f32.vlgmr.msra.gmra.mrb[20].mxu0 %v2186_v15  ;;  %9576 = vmatmul.mubr.f32.vlgmr.msra.gmra.mrb[22].mxu1 %v2188_v17 }
 0x8da   :  { %10571 = vmatpush3.bf16.msra.mxu1 %v11407_v60  ;;  %10589 = vmatpush3.bf16.msra.mxu0 %v11356_v26 }
 0x8db   :  { %10572 = vmatprep.subr.bf16.mxu1 %v11257_v31  ;;  %10590 = vmatprep.subr.bf16.mxu0 %v11257_v31 }
 0x8dc   :  { %9597 = vmatprep.mubr.msk.f32.mxu1 %vm11258_vm1, %v11259_v54  ;;  %9630 = vmatprep.mubr.msk.f32.mxu0 %vm11258_vm1, %v11259_v54 }
 0x8de   :  { %10574 = vmatpush3.bf16.msra.mxu1 %v11414_v61  ;;  %10592 = vmatpush3.bf16.msra.mxu0 %v11380_v49 }
 0x8df   :  { %10581 = vmatprep.subr.bf16.mxu1 %v11257_v31  ;;  %10599 = vmatprep.subr.bf16.mxu0 %v11257_v31 }
 0x8e1   :  { %9598 = vmatmul.mubr.f32.vlgmr.msra.gmra.mrb[24].mxu1 %v2185_v14  ;;  %9631 = vmatmul.mubr.f32.vlgmr.msra.gmra.mrb[22].mxu0 %v2184_v13 }
 0x8e2   :  { %10583 = vmatpush3.bf16.msra.mxu1 %v11420_v62  ;;  %9619 = vmatprep.mubr.msk.f32.mxu1 %vm11258_vm1, %v11259_v54 }
 0x8e3   :  { %10584 = vmatprep.subr.bf16.mxu1 %v11257_v31  ;;  %10601 = vmatpush3.bf16.msra.mxu0 %v11390_v55 }
 0x8e4   :  { %10602 = vmatprep.subr.bf16.mxu0 %v11257_v31  ;;  %9652 = vmatprep.mubr.msk.f32.mxu0 %vm11258_vm1, %v11259_v54 }
 0x8e6   :  { %10586 = vmatpush3.bf16.msra.mxu1 %v11430_v63 }
 0x8e7   :  { %10604 = vmatpush3.bf16.msra.mxu0 %v11397_v58  ;;  %10593 = vmatprep.subr.bf16.mxu1 %v11257_v31 }
 0x8e8   :  { %10611 = vmatprep.subr.bf16.mxu0 %v11257_v31 }
 0x8e9   :  { %9620 = vmatmul.mubr.f32.vlgmr.msra.gmra.mrb[26].mxu1 %v2184_v13 }
 0x8ea   :  { %10595 = vmatpush3.bf16.msra.mxu1 %v11356_v26  ;;  %9641 = vmatprep.mubr.msk.f32.mxu1 %vm11258_vm1, %v11259_v54 }
 0x8eb   :  { %10596 = vmatprep.subr.bf16.mxu1 %v11257_v31 }
 0x8ee   :  { %10598 = vmatpush3.bf16.msra.mxu1 %v11380_v49 }
 0x8ef   :  { %10605 = vmatprep.subr.bf16.mxu1 %v11257_v31 }
 0x9a4   :  { %v2281_v18 = vpop.f32.mrb[18].mxu0 }
 0x9a5   :  { %v9588_v19 = vpop.f32.mrb[19].mxu0 }
 0x9ac   :  { %v2438_v20 = vpop.f32.mrb[20].mxu0  ;;  %v2190_v21 = vpop.f32.mrb[22].mxu1 }
 0x9ad   :  { %v2282_v22 = vadd.f32 %v2281_v18, %v2190_v21  ;;  %v9610_v23 = vpop.f32.mrb[21].mxu0  ;;  %v9577_v24 = vpop.f32.mrb[23].mxu1 }
 0x9b4   :  { %v2361_v25 = vpop.f32.mrb[24].mxu1  ;;  %v2596_v27 = vpop.f32.mrb[22].mxu0 }
 0x9b5   :  { %v2362_v28 = vadd.f32 %v2361_v25, %v2282_v22  ;;  %v9599_v29 = vpop.f32.mrb[25].mxu1  ;;  %v9632_v30 = vpop.f32.mrb[23].mxu0 }
 0x9b7   :  { %v2439_v32 = vadd.f32 %v2438_v20, %v2362_v28  ;;  %v2623_v20 = vld [vmem:[#allocation2 + $0x8] sm:$0x3] }
 0x9bc   :  { %v2521_v33 = vpop.f32.mrb[26].mxu1 }
 0x9bd   :  { %v2522_v34 = vadd.f32 %v2521_v33, %v2439_v32  ;;  %v9621_v35 = vpop.f32.mrb[27].mxu1 }
 0x9bf   :  { %v2597_v36 = vadd.f32 %v2596_v27, %v2522_v34 }
 0x9c1   :  { %v2600_v38 = vadd.f32 %v2597_v36, %v2109_v37 }
 0x9c3   :  { %11152 = vtanh.f32 %v2600_v38  ;;  %v2601_v40 = vmul.f32 0.5, %v2600_v38 }
 0x9c5   :  { %11154 = vtanh.f32 %v2601_v40 }
 0x9cd   :  { %v11153_v39 = vpop.eup %11152 }
 0x9ce   :  { %2608 = vrot.lane.b32.xlu0 %v11153_v39, %s11260_s2 }
 0x9cf   :  { %v11155_v41 = vpop.eup %11154 }
 0x9d0   :  { %v2603_v42 = vadd.f32 1.0, %v11155_v41 }
 0x9d2   :  { %v2604_v43 = vmul.f32 0.5, %v2603_v42 }
 0x9d4   :  { %v2606_v46 = vmul.f32 %v2604_v43, %v11561_v7 }
 0xa40   :  { %v2609_v44 = vpop.permute.xlu0 %2608 }
 0xa41   :  { %v2611_v45 = vmul.f32 %v2609_v44, %v2604_v43 }
 0xa43   :  { %2613 = vrot.lane.b32.xlu1 %v2611_v45, %s11261_s25 }
 0xab5   :  { %v2614_v47 = vpop.permute.xlu1 %2613 }
 0xab6   :  { %v11606_v48 = vadd.f32 %v2614_v47, %v2606_v46 }
 0xab8   :  { %11156 = vtanh.f32 %v11606_v48 }
 0xac2   :  { %v11157_v50 = vpop.eup %11156 }
 0xac3   :  { %2619 = vrot.lane.b32.xlu0 %v11157_v50, %s11260_s2 }
 0xb35   :  { %v2620_v51 = vpop.permute.xlu0 %2619 }
 0xb36   :  { %v2622_v52 = vmul.f32 %v2620_v51, %v2604_v43 }
 0xb38   :  { %2625 = vrot.lane.b32.xlu1 %v2622_v52, %s11261_s25 }
 0xbaa   :  { %v2626_v53 = vpop.permute.xlu1 %2625 }
 0xbab   :  { %v2627_v56 = vsel %vm569_vm2, %v2626_v53, 0 }
 0xbac   :  { %v2698_v57 = vand.u32 4294901760, %v2627_v56 }
 0xbae   :  { %v2699_v59 = vsub.f32 %v2627_v56, %v2698_v57  ;;  %9653 = vmatmul.mubr.f32.vlgmr.msra.gmra.mrb[24].mxu0 %v2698_v57 }
 0xbaf   :  { %10613 = vmatpush3.bf16.msra.mxu0 %v11356_v26  ;;  %9674 = vmatprep.mubr.msk.f32.mxu0 %vm11258_vm1, %v11259_v54 }
 0xbb0   :  { %v2700_v0 = vand.u32 4294901760, %v2699_v59  ;;  %10614 = vmatprep.subr.bf16.mxu0 %v11257_v31 }
 0xbb2   :  { %v2701_v1 = vsub.f32 %v2699_v59, %v2700_v0 }
 0xbb3   :  { %10616 = vmatpush3.bf16.msra.mxu0 %v11380_v49 }
 0xbb4   :  { %v2702_v2 = vand.u32 4294901760, %v2701_v1  ;;  %10623 = vmatprep.subr.bf16.mxu0 %v11257_v31 }
 0xbb6   :  { %9675 = vmatmul.mubr.f32.vlgmr.msra.gmra.mrb[26].mxu0 %v2700_v0  ;;  %9642 = vmatmul.mubr.f32.vlgmr.msra.gmra.mrb[28].mxu1 %v2702_v2 }
 0xbb7   :  { %10607 = vmatpush3.bf16.msra.mxu1 %v11407_v60  ;;  %10625 = vmatpush3.bf16.msra.mxu0 %v11356_v26 }
 0xbb8   :  { %10608 = vmatprep.subr.bf16.mxu1 %v11257_v31  ;;  %10626 = vmatprep.subr.bf16.mxu0 %v11257_v31 }
 0xbb9   :  { %9663 = vmatprep.mubr.msk.f32.mxu1 %vm11258_vm1, %v11259_v54  ;;  %9696 = vmatprep.mubr.msk.f32.mxu0 %vm11258_vm1, %v11259_v54 }
 0xbbb   :  { %10610 = vmatpush3.bf16.msra.mxu1 %v11414_v61  ;;  %10628 = vmatpush3.bf16.msra.mxu0 %v11380_v49 }
 0xbbc   :  { %10617 = vmatprep.subr.bf16.mxu1 %v11257_v31  ;;  %10635 = vmatprep.subr.bf16.mxu0 %v11257_v31 }
 0xbbe   :  { %9664 = vmatmul.mubr.f32.vlgmr.msra.gmra.mrb[30].mxu1 %v2699_v59  ;;  %9697 = vmatmul.mubr.f32.vlgmr.msra.gmra.mrb[28].mxu0 %v2698_v57 }
 0xbbf   :  { %10619 = vmatpush3.bf16.msra.mxu1 %v11420_v62  ;;  %9685 = vmatprep.mubr.msk.f32.mxu1 %vm11258_vm1, %v11259_v54 }
 0xbc0   :  { %10620 = vmatprep.subr.bf16.mxu1 %v11257_v31  ;;  %10637 = vmatpush3.bf16.msra.mxu0 %v11390_v55 }
 0xbc1   :  { %10638 = vmatprep.subr.bf16.mxu0 %v11257_v31  ;;  %9718 = vmatprep.mubr.msk.f32.mxu0 %vm11258_vm1, %v11259_v54 }
 0xbc3   :  { %10622 = vmatpush3.bf16.msra.mxu1 %v11430_v63 }
 0xbc4   :  { %10640 = vmatpush3.bf16.msra.mxu0 %v11397_v58  ;;  %10629 = vmatprep.subr.bf16.mxu1 %v11257_v31 }
 0xbc5   :  { %10647 = vmatprep.subr.bf16.mxu0 %v11257_v31 }
 0xbc6   :  { %9686 = vmatmul.mubr.f32.vlgmr.msra.gmra.mrb[32].mxu1 %v2698_v57 }
 0xbc7   :  { %10631 = vmatpush3.bf16.msra.mxu1 %v11356_v26  ;;  %9707 = vmatprep.mubr.msk.f32.mxu1 %vm11258_vm1, %v11259_v54 }
 0xbc8   :  { %10632 = vmatprep.subr.bf16.mxu1 %v11257_v31 }
 0xbcb   :  { %10634 = vmatpush3.bf16.msra.mxu1 %v11380_v49 }
 0xbcc   :  { %10641 = vmatprep.subr.bf16.mxu1 %v11257_v31 }
 0xc81   :  { %v2795_v3 = vpop.f32.mrb[24].mxu0 }
 0xc82   :  { %v9654_v4 = vpop.f32.mrb[25].mxu0 }
 0xc89   :  { %v2952_v5 = vpop.f32.mrb[26].mxu0  ;;  %v2704_v6 = vpop.f32.mrb[28].mxu1 }
 0xc8a   :  { %v2796_v7 = vadd.f32 %v2795_v3, %v2704_v6  ;;  %v9676_v8 = vpop.f32.mrb[27].mxu0  ;;  %v9643_v9 = vpop.f32.mrb[29].mxu1 }
 0xc91   :  { %v2875_v10 = vpop.f32.mrb[30].mxu1  ;;  %v3110_v11 = vpop.f32.mrb[28].mxu0 }
 0xc92   :  { %v2876_v12 = vadd.f32 %v2875_v10, %v2796_v7  ;;  %v9665_v13 = vpop.f32.mrb[31].mxu1  ;;  %v9698_v14 = vpop.f32.mrb[29].mxu0 }
 0xc94   :  { %v2953_v15 = vadd.f32 %v2952_v5, %v2876_v12  ;;  %v3137_v5 = vld [vmem:[#allocation2 + $0xa] sm:$0x3] }
 0xc99   :  { %v3035_v16 = vpop.f32.mrb[32].mxu1 }
 0xc9a   :  { %v3036_v17 = vadd.f32 %v3035_v16, %v2953_v15  ;;  %v9687_v18 = vpop.f32.mrb[33].mxu1 }
 0xc9c   :  { %v3111_v19 = vadd.f32 %v3110_v11, %v3036_v17 }
 0xc9e   :  { %v3114_v21 = vadd.f32 %v3111_v19, %v2623_v20 }
 0xca0   :  { %11158 = vtanh.f32 %v3114_v21  ;;  %v3115_v23 = vmul.f32 0.5, %v3114_v21 }
 0xca2   :  { %11160 = vtanh.f32 %v3115_v23 }
 0xcaa   :  { %v11159_v22 = vpop.eup %11158 }
 0xcab   :  { %3122 = vrot.lane.b32.xlu0 %v11159_v22, %s11260_s2 }
 0xcac   :  { %v11161_v24 = vpop.eup %11160 }
 0xcad   :  { %v3117_v25 = vadd.f32 1.0, %v11161_v24 }
 0xcaf   :  { %v3118_v27 = vmul.f32 0.5, %v3117_v25 }
 0xcb1   :  { %v3120_v30 = vmul.f32 %v3118_v27, %v11606_v48 }
 0xd1d   :  { %v3123_v28 = vpop.permute.xlu0 %3122 }
 0xd1e   :  { %v3125_v29 = vmul.f32 %v3123_v28, %v3118_v27 }
 0xd20   :  { %3127 = vrot.lane.b32.xlu1 %v3125_v29, %s11261_s25 }
 0xd92   :  { %v3128_v32 = vpop.permute.xlu1 %3127 }
 0xd93   :  { %v11651_v33 = vadd.f32 %v3128_v32, %v3120_v30 }
 0xd95   :  { %11162 = vtanh.f32 %v11651_v33 }
 0xd9f   :  { %v11163_v34 = vpop.eup %11162 }
 0xda0   :  { %3133 = vrot.lane.b32.xlu0 %v11163_v34, %s11260_s2 }
 0xe12   :  { %v3134_v35 = vpop.permute.xlu0 %3133 }
 0xe13   :  { %v3136_v36 = vmul.f32 %v3134_v35, %v3118_v27 }
 0xe15   :  { %3139 = vrot.lane.b32.xlu1 %v3136_v36, %s11261_s25 }
 0xe87   :  { %v3140_v37 = vpop.permute.xlu1 %3139 }
 0xe88   :  { %v3141_v38 = vsel %vm569_vm2, %v3140_v37, 0 }
 0xe89   :  { %v3212_v39 = vand.u32 4294901760, %v3141_v38 }
 0xe8b   :  { %v3213_v40 = vsub.f32 %v3141_v38, %v3212_v39  ;;  %9719 = vmatmul.mubr.f32.vlgmr.msra.gmra.mrb[30].mxu0 %v3212_v39 }
 0xe8c   :  { %10649 = vmatpush3.bf16.msra.mxu0 %v11356_v26  ;;  %9740 = vmatprep.mubr.msk.f32.mxu0 %vm11258_vm1, %v11259_v54 }
 0xe8d   :  { %v3214_v41 = vand.u32 4294901760, %v3213_v40  ;;  %10650 = vmatprep.subr.bf16.mxu0 %v11257_v31 }
 0xe8f   :  { %v3215_v42 = vsub.f32 %v3213_v40, %v3214_v41 }
 0xe90   :  { %10652 = vmatpush3.bf16.msra.mxu0 %v11380_v49 }
 0xe91   :  { %v3216_v43 = vand.u32 4294901760, %v3215_v42  ;;  %10659 = vmatprep.subr.bf16.mxu0 %v11257_v31 }
 0xe93   :  { %9741 = vmatmul.mubr.f32.vlgmr.msra.gmra.mrb[32].mxu0 %v3214_v41  ;;  %9708 = vmatmul.mubr.f32.vlgmr.msra.gmra.mrb[34].mxu1 %v3216_v43 }
 0xe94   :  { %10643 = vmatpush3.bf16.msra.mxu1 %v11407_v60  ;;  %10661 = vmatpush3.bf16.msra.mxu0 %v11356_v26 }
 0xe95   :  { %10644 = vmatprep.subr.bf16.mxu1 %v11257_v31  ;;  %10662 = vmatprep.subr.bf16.mxu0 %v11257_v31 }
 0xe96   :  { %9729 = vmatprep.mubr.msk.f32.mxu1 %vm11258_vm1, %v11259_v54  ;;  %9762 = vmatprep.mubr.msk.f32.mxu0 %vm11258_vm1, %v11259_v54 }
 0xe98   :  { %10646 = vmatpush3.bf16.msra.mxu1 %v11414_v61  ;;  %10664 = vmatpush3.bf16.msra.mxu0 %v11380_v49 }
 0xe99   :  { %10653 = vmatprep.subr.bf16.mxu1 %v11257_v31  ;;  %10671 = vmatprep.subr.bf16.mxu0 %v11257_v31 }
 0xe9b   :  { %9730 = vmatmul.mubr.f32.vlgmr.msra.gmra.mrb[36].mxu1 %v3213_v40  ;;  %9763 = vmatmul.mubr.f32.vlgmr.msra.gmra.mrb[34].mxu0 %v3212_v39 }
 0xe9c   :  { %10655 = vmatpush3.bf16.msra.mxu1 %v11420_v62  ;;  %9751 = vmatprep.mubr.msk.f32.mxu1 %vm11258_vm1, %v11259_v54 }
 0xe9d   :  { %10656 = vmatprep.subr.bf16.mxu1 %v11257_v31  ;;  %10673 = vmatpush3.bf16.msra.mxu0 %v11390_v55 }
 0xe9e   :  { %10674 = vmatprep.subr.bf16.mxu0 %v11257_v31  ;;  %9784 = vmatprep.mubr.msk.f32.mxu0 %vm11258_vm1, %v11259_v54 }
 0xea0   :  { %10658 = vmatpush3.bf16.msra.mxu1 %v11430_v63 }
 0xea1   :  { %10676 = vmatpush3.bf16.msra.mxu0 %v11397_v58  ;;  %10665 = vmatprep.subr.bf16.mxu1 %v11257_v31 }
 0xea2   :  { %10683 = vmatprep.subr.bf16.mxu0 %v11257_v31 }
 0xea3   :  { %9752 = vmatmul.mubr.f32.vlgmr.msra.gmra.mrb[38].mxu1 %v3212_v39 }
 0xea4   :  { %10667 = vmatpush3.bf16.msra.mxu1 %v11356_v26  ;;  %9773 = vmatprep.mubr.msk.f32.mxu1 %vm11258_vm1, %v11259_v54 }
 0xea5   :  { %10668 = vmatprep.subr.bf16.mxu1 %v11257_v31 }
 0xea8   :  { %10670 = vmatpush3.bf16.msra.mxu1 %v11380_v49 }
 0xea9   :  { %10677 = vmatprep.subr.bf16.mxu1 %v11257_v31 }
 0xf5e   :  { %v3309_v44 = vpop.f32.mrb[30].mxu0 }
 0xf5f   :  { %v9720_v45 = vpop.f32.mrb[31].mxu0 }
 0xf66   :  { %v3466_v46 = vpop.f32.mrb[32].mxu0  ;;  %v3218_v47 = vpop.f32.mrb[34].mxu1 }
 0xf67   :  { %v3310_v48 = vadd.f32 %v3309_v44, %v3218_v47  ;;  %v9742_v50 = vpop.f32.mrb[33].mxu0  ;;  %v9709_v51 = vpop.f32.mrb[35].mxu1  ;;  %v3651_v44 = vld [vmem:[#allocation2 + $0xc] sm:$0x3] }
 0xf6e   :  { %v3389_v52 = vpop.f32.mrb[36].mxu1  ;;  %v3624_v53 = vpop.f32.mrb[34].mxu0 }
 0xf6f   :  { %v3390_v56 = vadd.f32 %v3389_v52, %v3310_v48  ;;  %v9731_v57 = vpop.f32.mrb[37].mxu1  ;;  %v9764_v59 = vpop.f32.mrb[35].mxu0 }
 0xf71   :  { %v3467_v0 = vadd.f32 %v3466_v46, %v3390_v56 }
 0xf76   :  { %v3549_v1 = vpop.f32.mrb[38].mxu1 }
 0xf77   :  { %v3550_v2 = vadd.f32 %v3549_v1, %v3467_v0  ;;  %v9753_v3 = vpop.f32.mrb[39].mxu1 }
 0xf79   :  { %v3625_v4 = vadd.f32 %v3624_v53, %v3550_v2 }
 0xf7b   :  { %v3628_v6 = vadd.f32 %v3625_v4, %v3137_v5 }
 0xf7d   :  { %11164 = vtanh.f32 %v3628_v6  ;;  %v3629_v8 = vmul.f32 0.5, %v3628_v6 }
 0xf7f   :  { %11166 = vtanh.f32 %v3629_v8 }
 0xf87   :  { %v11165_v7 = vpop.eup %11164 }
 0xf88   :  { %3636 = vrot.lane.b32.xlu0 %v11165_v7, %s11260_s2 }
 0xf89   :  { %v11167_v9 = vpop.eup %11166 }
 0xf8a   :  { %v3631_v10 = vadd.f32 1.0, %v11167_v9 }
 0xf8c   :  { %v3632_v11 = vmul.f32 0.5, %v3631_v10 }
 0xf8e   :  { %v3634_v14 = vmul.f32 %v3632_v11, %v11651_v33 }
 0xffa   :  { %v3637_v12 = vpop.permute.xlu0 %3636 }
 0xffb   :  { %v3639_v13 = vmul.f32 %v3637_v12, %v3632_v11 }
 0xffd   :  { %3641 = vrot.lane.b32.xlu1 %v3639_v13, %s11261_s25 }
0x106f   :  { %v3642_v15 = vpop.permute.xlu1 %3641 }
0x1070   :  { %v11696_v16 = vadd.f32 %v3642_v15, %v3634_v14 }
0x1072   :  { %11168 = vtanh.f32 %v11696_v16 }
0x107c   :  { %v11169_v17 = vpop.eup %11168 }
0x107d   :  { %3647 = vrot.lane.b32.xlu0 %v11169_v17, %s11260_s2 }
0x10ef   :  { %v3648_v18 = vpop.permute.xlu0 %3647 }
0x10f0   :  { %v3650_v19 = vmul.f32 %v3648_v18, %v3632_v11 }
0x10f2   :  { %3653 = vrot.lane.b32.xlu1 %v3650_v19, %s11261_s25 }
0x1164   :  { %v3654_v20 = vpop.permute.xlu1 %3653 }
0x1165   :  { %v3655_v21 = vsel %vm569_vm2, %v3654_v20, 0 }
0x1166   :  { %v3726_v22 = vand.u32 4294901760, %v3655_v21 }
0x1168   :  { %v3727_v23 = vsub.f32 %v3655_v21, %v3726_v22  ;;  %9785 = vmatmul.mubr.f32.vlgmr.msra.gmra.mrb[36].mxu0 %v3726_v22  ;;  %v4165_v21 = vld [vmem:[#allocation2 + $0xe] sm:$0x3] }
0x1169   :  { %10685 = vmatpush3.bf16.msra.mxu0 %v11356_v26  ;;  %9806 = vmatprep.mubr.msk.f32.mxu0 %vm11258_vm1, %v11259_v54 }
0x116a   :  { %v3728_v24 = vand.u32 4294901760, %v3727_v23  ;;  %10686 = vmatprep.subr.bf16.mxu0 %v11257_v31 }
0x116c   :  { %v3729_v25 = vsub.f32 %v3727_v23, %v3728_v24 }
0x116d   :  { %10688 = vmatpush3.bf16.msra.mxu0 %v11380_v49 }
0x116e   :  { %v3730_v27 = vand.u32 4294901760, %v3729_v25  ;;  %10695 = vmatprep.subr.bf16.mxu0 %v11257_v31 }
0x1170   :  { %9807 = vmatmul.mubr.f32.vlgmr.msra.gmra.mrb[38].mxu0 %v3728_v24  ;;  %9774 = vmatmul.mubr.f32.vlgmr.msra.gmra.mrb[40].mxu1 %v3730_v27 }
0x1171   :  { %10679 = vmatpush3.bf16.msra.mxu1 %v11407_v60  ;;  %10697 = vmatpush3.bf16.msra.mxu0 %v11356_v26 }
0x1172   :  { %10680 = vmatprep.subr.bf16.mxu1 %v11257_v31  ;;  %10698 = vmatprep.subr.bf16.mxu0 %v11257_v31 }
0x1173   :  { %9795 = vmatprep.mubr.msk.f32.mxu1 %vm11258_vm1, %v11259_v54  ;;  %9828 = vmatprep.mubr.msk.f32.mxu0 %vm11258_vm1, %v11259_v54 }
0x1175   :  { %10682 = vmatpush3.bf16.msra.mxu1 %v11414_v61  ;;  %10700 = vmatpush3.bf16.msra.mxu0 %v11380_v49 }
0x1176   :  { %10689 = vmatprep.subr.bf16.mxu1 %v11257_v31  ;;  %10707 = vmatprep.subr.bf16.mxu0 %v11257_v31 }
0x1178   :  { %9796 = vmatmul.mubr.f32.vlgmr.msra.gmra.mrb[42].mxu1 %v3727_v23  ;;  %9829 = vmatmul.mubr.f32.vlgmr.msra.gmra.mrb[40].mxu0 %v3726_v22 }
0x1179   :  { %10691 = vmatpush3.bf16.msra.mxu1 %v11420_v62  ;;  %9817 = vmatprep.mubr.msk.f32.mxu1 %vm11258_vm1, %v11259_v54 }
0x117a   :  { %10692 = vmatprep.subr.bf16.mxu1 %v11257_v31  ;;  %10709 = vmatpush3.bf16.msra.mxu0 %v11390_v55 }
0x117b   :  { %10710 = vmatprep.subr.bf16.mxu0 %v11257_v31  ;;  %9850 = vmatprep.mubr.msk.f32.mxu0 %vm11258_vm1, %v11259_v54 }
0x117d   :  { %10694 = vmatpush3.bf16.msra.mxu1 %v11430_v63 }
0x117e   :  { %10712 = vmatpush3.bf16.msra.mxu0 %v11397_v58  ;;  %10701 = vmatprep.subr.bf16.mxu1 %v11257_v31 }
0x117f   :  { %10719 = vmatprep.subr.bf16.mxu0 %v11257_v31 }
0x1180   :  { %9818 = vmatmul.mubr.f32.vlgmr.msra.gmra.mrb[44].mxu1 %v3726_v22 }
0x1181   :  { %10703 = vmatpush3.bf16.msra.mxu1 %v11356_v26  ;;  %9839 = vmatprep.mubr.msk.f32.mxu1 %vm11258_vm1, %v11259_v54 }
0x1182   :  { %10704 = vmatprep.subr.bf16.mxu1 %v11257_v31 }
0x1185   :  { %10706 = vmatpush3.bf16.msra.mxu1 %v11380_v49 }
0x1186   :  { %10713 = vmatprep.subr.bf16.mxu1 %v11257_v31 }
0x123b   :  { %v3823_v55 = vpop.f32.mrb[36].mxu0 }
0x123c   :  { %v9786_v28 = vpop.f32.mrb[37].mxu0 }
0x1243   :  { %v3980_v29 = vpop.f32.mrb[38].mxu0  ;;  %v3732_v58 = vpop.f32.mrb[40].mxu1 }
0x1244   :  { %v3824_v30 = vadd.f32 %v3823_v55, %v3732_v58  ;;  %v9808_v32 = vpop.f32.mrb[39].mxu0  ;;  %v9775_v33 = vpop.f32.mrb[41].mxu1 }
0x124b   :  { %v3903_v34 = vpop.f32.mrb[42].mxu1  ;;  %v4138_v35 = vpop.f32.mrb[40].mxu0 }
0x124c   :  { %v3904_v36 = vadd.f32 %v3903_v34, %v3824_v30  ;;  %v9797_v37 = vpop.f32.mrb[43].mxu1  ;;  %v9830_v38 = vpop.f32.mrb[41].mxu0  ;;  %v41_v34 = vld [vmem:[#allocation3] sm:$0xff] }
0x124e   :  { %v3981_v39 = vadd.f32 %v3980_v29, %v3904_v36  ;;  %v4691_v36 = vand.u32 4294901760, %v41_v34 }
0x1253   :  { %v4063_v40 = vpop.f32.mrb[44].mxu1 }
0x1254   :  { %v4064_v41 = vadd.f32 %v4063_v40, %v3981_v39  ;;  %v9819_v42 = vpop.f32.mrb[45].mxu1  ;;  %v4771_v39 = vsub.f32 %v41_v34, %v4691_v36 }
0x1255   :  { %v44_v42 = vld [vmem:[#allocation3 + $0x18] sm:$0xff] }
0x1256   :  { %v4139_v43 = vadd.f32 %v4138_v35, %v4064_v41  ;;  %v42_v35 = vld [vmem:[#allocation3 + $0x8] sm:$0xff]  ;;  %v43_v41 = vld [vmem:[#allocation3 + $0x10] sm:$0xff] }
0x1257   :  { %v4694_v37 = vand.u32 4294901760, %v42_v35 }
0x1258   :  { %v4142_v45 = vadd.f32 %v4139_v43, %v3651_v44  ;;  %v4697_v43 = vand.u32 4294901760, %v43_v41  ;;  %v4700_v44 = vand.u32 4294901760, %v44_v42 }
0x1259   :  { %v11782_v38 = vpack.c.bf16 %v4694_v37, %v4691_v36  ;;  %v4778_v40 = vsub.f32 %v42_v35, %v4694_v37 }
0x125a   :  { %11170 = vtanh.f32 %v4142_v45  ;;  %v4143_v47 = vmul.f32 0.5, %v4142_v45  ;;  %v4772_v45 = vand.u32 4294901760, %v4771_v39 }
0x125c   :  { %11172 = vtanh.f32 %v4143_v47  ;;  %v11788_v47 = vpack.c.bf16 %v4700_v44, %v4697_v43 }
0x1264   :  { %v11171_v46 = vpop.eup %11170 }
0x1265   :  { %4150 = vrot.lane.b32.xlu0 %v11171_v46, %s11260_s2  ;;  %v4779_v46 = vand.u32 4294901760, %v4778_v40 }
0x1266   :  { %v11173_v48 = vpop.eup %11172 }
0x1267   :  { %v4145_v50 = vadd.f32 1.0, %v11173_v48  ;;  %v4773_v48 = vsub.f32 %v4771_v39, %v4772_v45 }
0x1269   :  { %v4146_v51 = vmul.f32 0.5, %v4145_v50  ;;  %v4780_v50 = vsub.f32 %v4778_v40, %v4779_v46 }
0x126b   :  { %v4148_v56 = vmul.f32 %v4146_v51, %v11696_v16 }
0x12d7   :  { %v4151_v52 = vpop.permute.xlu0 %4150 }
0x12d8   :  { %v4153_v53 = vmul.f32 %v4151_v52, %v4146_v51  ;;  %v4792_v52 = vsub.f32 %v44_v42, %v4700_v44 }
0x12da   :  { %4155 = vrot.lane.b32.xlu1 %v4153_v53, %s11261_s25  ;;  %v4774_v53 = vand.u32 4294901760, %v4773_v48 }
0x134c   :  { %v4156_v57 = vpop.permute.xlu1 %4155 }
0x134d   :  { %v11741_v59 = vadd.f32 %v4156_v57, %v4148_v56  ;;  %v4781_v56 = vand.u32 4294901760, %v4780_v50 }
0x134f   :  { %11174 = vtanh.f32 %v11741_v59 }
0x1359   :  { %v11175_v0 = vpop.eup %11174 }
0x135a   :  { %4161 = vrot.lane.b32.xlu0 %v11175_v0, %s11260_s2 }
0x13cc   :  { %v4162_v1 = vpop.permute.xlu0 %4161 }
0x13cd   :  { %v4164_v2 = vmul.f32 %v4162_v1, %v4146_v51  ;;  %v4785_v51 = vsub.f32 %v43_v41, %v4697_v43  ;;  %v11794_v1 = vpack.c.bf16 %v4781_v56, %v4774_v53 }
0x13cf   :  { %4167 = vrot.lane.b32.xlu1 %v4164_v2, %s11261_s25  ;;  %v4786_v57 = vand.u32 4294901760, %v4785_v51 }
0x13d1   :  { %v4787_v2 = vsub.f32 %v4785_v51, %v4786_v57 }
0x1441   :  { %v4168_v3 = vpop.permute.xlu1 %4167 }
0x1442   :  { %v4169_v4 = vsel %vm569_vm2, %v4168_v3, 0 }
0x1443   :  { %v4240_v5 = vand.u32 4294901760, %v4169_v4 }
0x1445   :  { %v4241_v6 = vsub.f32 %v4169_v4, %v4240_v5  ;;  %9851 = vmatmul.mubr.f32.vlgmr.msra.gmra.mrb[42].mxu0 %v4240_v5 }
0x1446   :  { %10721 = vmatpush3.bf16.msra.mxu0 %v11356_v26  ;;  %9872 = vmatprep.mubr.msk.f32.mxu0 %vm11258_vm1, %v11259_v54 }
0x1447   :  { %v4242_v7 = vand.u32 4294901760, %v4241_v6  ;;  %10722 = vmatprep.subr.bf16.mxu0 %v11257_v31 }
0x1449   :  { %v4243_v8 = vsub.f32 %v4241_v6, %v4242_v7 }
0x144a   :  { %10724 = vmatpush3.bf16.msra.mxu0 %v11380_v49 }
0x144b   :  { %v4244_v9 = vand.u32 4294901760, %v4243_v8  ;;  %10731 = vmatprep.subr.bf16.mxu0 %v11257_v31  ;;  %v11799_v8 = vpack.c.bf16 %v4778_v40, %v4771_v39 }
0x144d   :  { %9873 = vmatmul.mubr.f32.vlgmr.msra.gmra.mrb[44].mxu0 %v4242_v7  ;;  %9840 = vmatmul.mubr.f32.vlgmr.msra.gmra.mrb[46].mxu1 %v4244_v9  ;;  %v11801_v9 = vpack.c.bf16 %v4792_v52, %v4785_v51 }
0x144e   :  { %10715 = vmatpush3.bf16.msra.mxu1 %v11407_v60  ;;  %10733 = vmatpush3.bf16.msra.mxu0 %v11356_v26 }
0x144f   :  { %10716 = vmatprep.subr.bf16.mxu1 %v11257_v31  ;;  %10734 = vmatprep.subr.bf16.mxu0 %v11257_v31 }
0x1450   :  { %9861 = vmatprep.mubr.msk.f32.mxu1 %vm11258_vm1, %v11259_v54  ;;  %9894 = vmatprep.mubr.msk.f32.mxu0 %vm11258_vm1, %v11259_v54 }
0x1452   :  { %10718 = vmatpush3.bf16.msra.mxu1 %v11414_v61  ;;  %10736 = vmatpush3.bf16.msra.mxu0 %v11380_v49 }
0x1453   :  { %10725 = vmatprep.subr.bf16.mxu1 %v11257_v31  ;;  %10773 = vmatprep.subr.bf16.mxu0 %v11257_v31 }
0x1455   :  { %9862 = vmatmul.mubr.f32.vlgmr.msra.gmra.mrb[48].mxu1 %v4241_v6  ;;  %9895 = vmatmul.mubr.f32.vlgmr.msra.gmra.mrb[46].mxu0 %v4240_v5 }
0x1456   :  { %10727 = vmatpush3.bf16.msra.mxu1 %v11420_v62  ;;  %9883 = vmatprep.mubr.msk.f32.mxu1 %vm11258_vm1, %v11259_v54 }
0x1457   :  { %10728 = vmatprep.subr.bf16.mxu1 %v11257_v31  ;;  %9971 = vmatprep.mubr.msk.f32.mxu0 %vm11258_vm1, %v11259_v54 }
0x1458   :  { %10775 = vmatpush3.bf16.msra.mxu0 %v11782_v38 }
0x1459   :  { %10776 = vmatprep.subr.bf16.mxu0 %v11257_v31 }
0x145a   :  { %10730 = vmatpush3.bf16.msra.mxu1 %v11430_v63 }
0x145b   :  { %10737 = vmatprep.subr.bf16.mxu1 %v11257_v31 }
0x145c   :  { %10778 = vmatpush3.bf16.msra.mxu0 %v11788_v47 }
0x145d   :  { %9884 = vmatmul.mubr.f32.vlgmr.msra.gmra.mrb[50].mxu1 %v4240_v5  ;;  %10779 = vmatprep.subr.bf16.mxu0 %v11257_v31  ;;  %v4788_v5 = vand.u32 4294901760, %v4787_v2 }
0x145e   :  { %9905 = vmatprep.mubr.msk.f32.mxu1 %vm11258_vm1, %v11259_v54  ;;  %10739 = vmatpush3.bf16.msra.mxu1 %v11782_v38 }
0x145f   :  { %10740 = vmatprep.subr.bf16.mxu1 %v11257_v31 }
0x1462   :  { %10742 = vmatpush3.bf16.msra.mxu1 %v11788_v47 }
0x1463   :  { %10743 = vmatprep.subr.bf16.mxu1 %v11257_v31 }
0x1518   :  { %v4337_v26 = vpop.f32.mrb[42].mxu0 }
0x1519   :  { %v9852_v49 = vpop.f32.mrb[43].mxu0 }
0x1520   :  { %v4494_v60 = vpop.f32.mrb[44].mxu0  ;;  %v4246_v61 = vpop.f32.mrb[46].mxu1 }
0x1521   :  { %v4338_v62 = vadd.f32 %v4337_v26, %v4246_v61  ;;  %v9874_v10 = vpop.f32.mrb[45].mxu0  ;;  %v9841_v11 = vpop.f32.mrb[47].mxu1  ;;  %v11803_v26 = vpack.c.bf16 %v4779_v46, %v4772_v45 }
0x1528   :  { %v4417_v12 = vpop.f32.mrb[48].mxu1  ;;  %v4652_v13 = vpop.f32.mrb[46].mxu0 }
0x1529   :  { %v4418_v14 = vadd.f32 %v4417_v12, %v4338_v62  ;;  %v9863_v15 = vpop.f32.mrb[49].mxu1  ;;  %v9896_v16 = vpop.f32.mrb[47].mxu0 }
0x152b   :  { %v4495_v17 = vadd.f32 %v4494_v60, %v4418_v14  ;;  %v11847_v14 = vld [vmem:[%s12190_s5] ss:$0 sm:$0xff]  ;;  %s11262_s5 = smov 96  }
0x1530   :  { %v4577_v63 = vpop.f32.mrb[50].mxu1 }
0x1531   :  { %v4578_v18 = vadd.f32 %v4577_v63, %v4495_v17  ;;  %v9885_v19 = vpop.f32.mrb[51].mxu1 }
0x1533   :  { %v4653_v20 = vadd.f32 %v4652_v13, %v4578_v18 }
0x1535   :  { %v4656_v22 = vadd.f32 %v4653_v20, %v4165_v21 }
0x1537   :  { %11176 = vtanh.f32 %v4656_v22  ;;  %v4657_v24 = vmul.f32 0.5, %v4656_v22 }
0x1539   :  { %11178 = vtanh.f32 %v4657_v24 }
0x1541   :  { %v11177_v23 = vpop.eup %11176 }
0x1542   :  { %4664 = vrot.lane.b32.xlu0 %v11177_v23, %s11260_s2 }
0x1543   :  { %v11179_v25 = vpop.eup %11178 }
0x1544   :  { %v4659_v27 = vadd.f32 1.0, %v11179_v25 }
0x1546   :  { %v4660_v55 = vmul.f32 0.5, %v4659_v27 }
0x1548   :  { %v4662_v58 = vmul.f32 %v4660_v55, %v11741_v59  ;;  %v4793_v59 = vand.u32 4294901760, %v4792_v52 }
0x154a   :  { %v4794_v4 = vsub.f32 %v4792_v52, %v4793_v59  ;;  %v11805_v49 = vpack.c.bf16 %v4793_v59, %v4786_v57 }
0x154c   :  { %v4795_v6 = vand.u32 4294901760, %v4794_v4 }
0x154e   :  { %v11797_v7 = vpack.c.bf16 %v4795_v6, %v4788_v5 }
0x15b4   :  { %v4665_v28 = vpop.permute.xlu0 %4664 }
0x15b5   :  { %v4667_v29 = vmul.f32 %v4665_v28, %v4660_v55 }
0x15b7   :  { %4669 = vrot.lane.b32.xlu1 %v4667_v29, %s11261_s25 }
0x1629   :  { %v4670_v30 = vpop.permute.xlu1 %4669 }
0x162a   :  { %v11778_v32 = vadd.f32 %v4670_v30, %v4662_v58 }
0x162c   :  { %11180 = vtanh.f32 %v11778_v32 }
0x1636   :  { %v11181_v33 = vpop.eup %11180 }
0x1637   :  { %4675 = vrot.lane.b32.xlu0 %v11181_v33, %s11260_s2 }
0x16a9   :  { %v4676_v0 = vpop.permute.xlu0 %4675 }
0x16aa   :  { %v4678_v3 = vmul.f32 %v4676_v0, %v4660_v55 }
0x16ac   :  { %4686 = vrot.lane.b32.xlu1 %v4678_v3, %s11261_s25 }
0x171e   :  { %v4687_v60 = vpop.permute.xlu1 %4686 }
0x171f   :  { %v4688_v61 = vsel %vm569_vm2, %v4687_v60, 0 }
0x1720   :  { %v4759_v62 = vand.u32 4294901760, %v4688_v61 }
0x1722   :  { %v4760_v10 = vsub.f32 %v4688_v61, %v4759_v62 }
0x1724   :  { %v4761_v11 = vand.u32 4294901760, %v4760_v10 }
0x1726   :  { %v4762_v12 = vsub.f32 %v4760_v10, %v4761_v11 }
0x1728   :  { %v4763_v13 = vand.u32 4294901760, %v4762_v12 }
0x172a   :  { %9906 = vmatmul.mubr.f32.vlgmr.msra.gmra.mrb[52].mxu1 %v4763_v13 }
0x172b   :  { %10745 = vmatpush3.bf16.msra.mxu1 %v11794_v1  ;;  %9916 = vmatprep.mubr.msk.f32.mxu1 %vm11258_vm1, %v11259_v54 }
0x172c   :  { %10746 = vmatprep.subr.bf16.mxu1 %v11257_v31 }
0x172f   :  { %10748 = vmatpush3.bf16.msra.mxu1 %v11797_v7 }
0x1730   :  { %10749 = vmatprep.subr.bf16.mxu1 %v11257_v31 }
0x1732   :  { %9917 = vmatmul.mubr.f32.vlgmr.msra.gmra.mrb[52].mxu1 %v4759_v62 }
0x1733   :  { %10751 = vmatpush3.bf16.msra.mxu1 %v11799_v8  ;;  %9927 = vmatprep.mubr.msk.f32.mxu1 %vm11258_vm1, %v11259_v54 }
0x1734   :  { %10752 = vmatprep.subr.bf16.mxu1 %v11257_v31 }
0x1737   :  { %10754 = vmatpush3.bf16.msra.mxu1 %v11801_v9 }
0x1738   :  { %10755 = vmatprep.subr.bf16.mxu1 %v11257_v31 }
0x173a   :  { %9928 = vmatmul.mubr.f32.vlgmr.msra.gmra.mrb[52].mxu1 %v4760_v10 }
0x173b   :  { %10757 = vmatpush3.bf16.msra.mxu1 %v11782_v38  ;;  %9938 = vmatprep.mubr.msk.f32.mxu1 %vm11258_vm1, %v11259_v54 }
0x173c   :  { %10758 = vmatprep.subr.bf16.mxu1 %v11257_v31 }
0x173f   :  { %10760 = vmatpush3.bf16.msra.mxu1 %v11788_v47 }
0x1740   :  { %10761 = vmatprep.subr.bf16.mxu1 %v11257_v31 }
0x1742   :  { %9939 = vmatmul.mubr.f32.vlgmr.msra.gmra.mrb[52].mxu1 %v4761_v11 }
0x1743   :  { %10763 = vmatpush3.bf16.msra.mxu1 %v11803_v26  ;;  %9949 = vmatprep.mubr.msk.f32.mxu1 %vm11258_vm1, %v11259_v54 }
0x1744   :  { %10764 = vmatprep.subr.bf16.mxu1 %v11257_v31 }
0x1747   :  { %10766 = vmatpush3.bf16.msra.mxu1 %v11805_v49 }
0x1748   :  { %10767 = vmatprep.subr.bf16.mxu1 %v11257_v31 }
0x174a   :  { %9950 = vmatmul.mubr.f32.vlgmr.msra.gmra.mrb[52].mxu1 %v4759_v62 }
0x174b   :  { %10769 = vmatpush3.bf16.msra.mxu1 %v11782_v38  ;;  %9960 = vmatprep.mubr.msk.f32.mxu1 %vm11258_vm1, %v11259_v54 }
0x174c   :  { %10770 = vmatprep.subr.bf16.mxu1 %v11257_v31 }
0x174f   :  { %10772 = vmatpush3.bf16.msra.mxu1 %v11788_v47 }
0x1750   :  { %10809 = vmatprep.subr.bf16.mxu1 %v11257_v31 }
0x1752   :  { %9961 = vmatmul.mubr.f32.vlgmr.msra.gmra.mrb[52].mxu1 %v4759_v62 }
0x1753   :  { %10811 = vmatpush3.bf16.msra.mxu1 %v11782_v38  ;;  %10037 = vmatprep.mubr.msk.f32.mxu1 %vm11258_vm1, %v11259_v54 }
0x1754   :  { %10812 = vmatprep.subr.bf16.mxu1 %v11257_v31 }
0x1757   :  { %10814 = vmatpush3.bf16.msra.mxu1 %v11788_v47 }
0x1758   :  { %10815 = vmatprep.subr.bf16.mxu1 %v11257_v31 }
0x1825   :  { %v5171_v15 = vpop.f32.mrb[52].mxu1 }
0x1826   :  { %v11029_v16 = vadd.f32 %v11847_v14, %v5171_v15  ;;  %v9962_v17 = vpop.f32.mrb[53].mxu1 }
0x1828   :  { %11182 = vtanh.f32 %v11029_v16  ;;  %v5175_v18 = vmul.f32 0.5, %v11029_v16 }
0x182a   :  { %11184 = vtanh.f32 %v5175_v18 }
0x1832   :  { %v11183_v63 = vpop.eup %11182 }
0x1833   :  { %5182 = vrot.lane.b32.xlu0 %v11183_v63, %s11260_s2 }
0x1834   :  { %v11185_v19 = vpop.eup %11184 }
0x1835   :  { %v5177_v20 = vadd.f32 1.0, %v11185_v19 }
0x1837   :  { %v5178_v21 = vmul.f32 0.5, %v5177_v20 }
0x1839   :  { %v5180_v24 = vmul.f32 %v5178_v21, %v11778_v32 }
0x18a5   :  { %v5183_v22 = vpop.permute.xlu0 %5182 }
0x18a6   :  { %v5185_v23 = vmul.f32 %v5183_v22, %v5178_v21 }
0x18a8   :  { %5187 = vrot.lane.b32.xlu1 %v5185_v23, %s11261_s25 }
0x191a   :  { %v5188_v25 = vpop.permute.xlu1 %5187 }
0x191b   :  { %v11853_v27 = vadd.f32 %v5188_v25, %v5180_v24 }
0x191d   :  { %11186 = vtanh.f32 %v11853_v27 }
0x1927   :  { %v11187_v55 = vpop.eup %11186 }
0x1928   :  { %5193 = vrot.lane.b32.xlu0 %v11187_v55, %s11260_s2 }
0x199a   :  { %v5194_v28 = vpop.permute.xlu0 %5193 }
0x199b   :  { %v5196_v29 = vmul.f32 %v5194_v28, %v5178_v21 }
0x199d   :  { %5198 = vrot.lane.b32.xlu1 %v5196_v29, %s11261_s25 }
0x1a0f   :  { %v11858_v58 = vpop.permute.xlu1 %5198 }
0x1a10   :  { %v5200_v30 = vsel %vm569_vm2, %v11858_v58, 0 }
0x1a11   :  { %v5271_v33 = vand.u32 4294901760, %v5200_v30 }
0x1a13   :  { %v5272_v34 = vsub.f32 %v5200_v30, %v5271_v33 }
0x1a15   :  { %v5273_v32 = vand.u32 4294901760, %v5272_v34 }
0x1a17   :  { %v5274_v35 = vsub.f32 %v5272_v34, %v5273_v32 }
0x1a19   :  { %v5275_v36 = vand.u32 4294901760, %v5274_v35 }
0x1a1b   :  { %9972 = vmatmul.mubr.f32.vlgmr.msra.gmra.mrb[48].mxu0 %v5275_v36 }
0x1a1c   :  { %10781 = vmatpush3.bf16.msra.mxu0 %v11794_v1  ;;  %9982 = vmatprep.mubr.msk.f32.mxu0 %vm11258_vm1, %v11259_v54 }
0x1a1d   :  { %10782 = vmatprep.subr.bf16.mxu0 %v11257_v31 }
0x1a20   :  { %10784 = vmatpush3.bf16.msra.mxu0 %v11797_v7 }
0x1a21   :  { %10785 = vmatprep.subr.bf16.mxu0 %v11257_v31 }
0x1a23   :  { %9983 = vmatmul.mubr.f32.vlgmr.msra.gmra.mrb[48].mxu0 %v5271_v33 }
0x1a24   :  { %10787 = vmatpush3.bf16.msra.mxu0 %v11799_v8  ;;  %9993 = vmatprep.mubr.msk.f32.mxu0 %vm11258_vm1, %v11259_v54 }
0x1a25   :  { %10788 = vmatprep.subr.bf16.mxu0 %v11257_v31 }
0x1a28   :  { %10790 = vmatpush3.bf16.msra.mxu0 %v11801_v9 }
0x1a29   :  { %10791 = vmatprep.subr.bf16.mxu0 %v11257_v31 }
0x1a2b   :  { %9994 = vmatmul.mubr.f32.vlgmr.msra.gmra.mrb[48].mxu0 %v5272_v34 }
0x1a2c   :  { %10793 = vmatpush3.bf16.msra.mxu0 %v11782_v38  ;;  %10004 = vmatprep.mubr.msk.f32.mxu0 %vm11258_vm1, %v11259_v54 }
0x1a2d   :  { %10794 = vmatprep.subr.bf16.mxu0 %v11257_v31 }
0x1a30   :  { %10796 = vmatpush3.bf16.msra.mxu0 %v11788_v47 }
0x1a31   :  { %10797 = vmatprep.subr.bf16.mxu0 %v11257_v31 }
0x1a33   :  { %10005 = vmatmul.mubr.f32.vlgmr.msra.gmra.mrb[48].mxu0 %v5273_v32 }
0x1a34   :  { %10799 = vmatpush3.bf16.msra.mxu0 %v11803_v26  ;;  %10015 = vmatprep.mubr.msk.f32.mxu0 %vm11258_vm1, %v11259_v54 }
0x1a35   :  { %10800 = vmatprep.subr.bf16.mxu0 %v11257_v31 }
0x1a38   :  { %10802 = vmatpush3.bf16.msra.mxu0 %v11805_v49 }
0x1a39   :  { %10803 = vmatprep.subr.bf16.mxu0 %v11257_v31 }
0x1a3b   :  { %10016 = vmatmul.mubr.f32.vlgmr.msra.gmra.mrb[48].mxu0 %v5271_v33 }
0x1a3c   :  { %10805 = vmatpush3.bf16.msra.mxu0 %v11782_v38  ;;  %10026 = vmatprep.mubr.msk.f32.mxu0 %vm11258_vm1, %v11259_v54 }
0x1a3d   :  { %10806 = vmatprep.subr.bf16.mxu0 %v11257_v31 }
0x1a40   :  { %10808 = vmatpush3.bf16.msra.mxu0 %v11788_v47 }
0x1a41   :  { %10845 = vmatprep.subr.bf16.mxu0 %v11257_v31 }
0x1a43   :  { %10027 = vmatmul.mubr.f32.vlgmr.msra.gmra.mrb[48].mxu0 %v5271_v33 }
0x1a44   :  { %10847 = vmatpush3.bf16.msra.mxu0 %v11782_v38  ;;  %10103 = vmatprep.mubr.msk.f32.mxu0 %vm11258_vm1, %v11259_v54 }
0x1a45   :  { %10848 = vmatprep.subr.bf16.mxu0 %v11257_v31 }
0x1a48   :  { %10850 = vmatpush3.bf16.msra.mxu0 %v11788_v47 }
0x1a49   :  { %10851 = vmatprep.subr.bf16.mxu0 %v11257_v31 }
0x1b16   :  { %v5683_v37 = vpop.f32.mrb[48].mxu0 }
0x1b17   :  { %v11030_v39 = vadd.f32 %v11847_v14, %v5683_v37  ;;  %v10028_v40 = vpop.f32.mrb[49].mxu0 }
0x1b19   :  { %11188 = vtanh.f32 %v11030_v39  ;;  %v5687_v42 = vmul.f32 0.5, %v11030_v39 }
0x1b1b   :  { %11190 = vtanh.f32 %v5687_v42 }
0x1b23   :  { %v11189_v41 = vpop.eup %11188 }
0x1b24   :  { %5694 = vrot.lane.b32.xlu0 %v11189_v41, %s11260_s2 }
0x1b25   :  { %v11191_v43 = vpop.eup %11190 }
0x1b26   :  { %v5689_v44 = vadd.f32 1.0, %v11191_v43 }
0x1b28   :  { %v5690_v45 = vmul.f32 0.5, %v5689_v44 }
0x1b2a   :  { %v5692_v50 = vmul.f32 %v5690_v45, %v11853_v27 }
0x1b96   :  { %v5695_v46 = vpop.permute.xlu0 %5694 }
0x1b97   :  { %v5697_v48 = vmul.f32 %v5695_v46, %v5690_v45 }
0x1b99   :  { %5699 = vrot.lane.b32.xlu1 %v5697_v48, %s11261_s25 }
0x1c0b   :  { %v5700_v51 = vpop.permute.xlu1 %5699 }
0x1c0c   :  { %v11902_v52 = vadd.f32 %v5700_v51, %v5692_v50 }
0x1c0e   :  { %11192 = vtanh.f32 %v11902_v52 }
0x1c18   :  { %v11193_v53 = vpop.eup %11192 }
0x1c19   :  { %5705 = vrot.lane.b32.xlu0 %v11193_v53, %s11260_s2 }
0x1c8b   :  { %v5706_v56 = vpop.permute.xlu0 %5705 }
0x1c8c   :  { %v11906_v57 = vmul.f32 %v5706_v56, %v5690_v45 }
0x1c8e   :  { %5710 = vrot.lane.b32.xlu1 %v11906_v57, %s11261_s25 }
0x1d00   :  { %v5711_v59 = vpop.permute.xlu1 %5710 }
0x1d01   :  { %v5712_v0 = vsel %vm569_vm2, %v5711_v59, 0 }
0x1d02   :  { %v5783_v2 = vand.u32 4294901760, %v5712_v0 }
0x1d04   :  { %v5784_v3 = vsub.f32 %v5712_v0, %v5783_v2 }
0x1d06   :  { %v5785_v4 = vand.u32 4294901760, %v5784_v3 }
0x1d08   :  { %v5786_v5 = vsub.f32 %v5784_v3, %v5785_v4 }
0x1d0a   :  { %v5787_v6 = vand.u32 4294901760, %v5786_v5 }
0x1d0c   :  { %10038 = vmatmul.mubr.f32.vlgmr.msra.gmra.mrb[54].mxu1 %v5787_v6 }
0x1d0d   :  { %10817 = vmatpush3.bf16.msra.mxu1 %v11794_v1  ;;  %10048 = vmatprep.mubr.msk.f32.mxu1 %vm11258_vm1, %v11259_v54 }
0x1d0e   :  { %10818 = vmatprep.subr.bf16.mxu1 %v11257_v31 }
0x1d11   :  { %10820 = vmatpush3.bf16.msra.mxu1 %v11797_v7 }
0x1d12   :  { %10821 = vmatprep.subr.bf16.mxu1 %v11257_v31 }
0x1d14   :  { %10049 = vmatmul.mubr.f32.vlgmr.msra.gmra.mrb[54].mxu1 %v5783_v2 }
0x1d15   :  { %10823 = vmatpush3.bf16.msra.mxu1 %v11799_v8  ;;  %10059 = vmatprep.mubr.msk.f32.mxu1 %vm11258_vm1, %v11259_v54 }
0x1d16   :  { %10824 = vmatprep.subr.bf16.mxu1 %v11257_v31 }
0x1d19   :  { %10826 = vmatpush3.bf16.msra.mxu1 %v11801_v9 }
0x1d1a   :  { %10827 = vmatprep.subr.bf16.mxu1 %v11257_v31 }
0x1d1c   :  { %10060 = vmatmul.mubr.f32.vlgmr.msra.gmra.mrb[54].mxu1 %v5784_v3 }
0x1d1d   :  { %10829 = vmatpush3.bf16.msra.mxu1 %v11782_v38  ;;  %10070 = vmatprep.mubr.msk.f32.mxu1 %vm11258_vm1, %v11259_v54 }
0x1d1e   :  { %10830 = vmatprep.subr.bf16.mxu1 %v11257_v31 }
0x1d21   :  { %10832 = vmatpush3.bf16.msra.mxu1 %v11788_v47 }
0x1d22   :  { %10833 = vmatprep.subr.bf16.mxu1 %v11257_v31 }
0x1d24   :  { %10071 = vmatmul.mubr.f32.vlgmr.msra.gmra.mrb[54].mxu1 %v5785_v4 }
0x1d25   :  { %10835 = vmatpush3.bf16.msra.mxu1 %v11803_v26  ;;  %10081 = vmatprep.mubr.msk.f32.mxu1 %vm11258_vm1, %v11259_v54 }
0x1d26   :  { %10836 = vmatprep.subr.bf16.mxu1 %v11257_v31 }
0x1d29   :  { %10838 = vmatpush3.bf16.msra.mxu1 %v11805_v49 }
0x1d2a   :  { %10839 = vmatprep.subr.bf16.mxu1 %v11257_v31 }
0x1d2c   :  { %10082 = vmatmul.mubr.f32.vlgmr.msra.gmra.mrb[54].mxu1 %v5783_v2 }
0x1d2d   :  { %10841 = vmatpush3.bf16.msra.mxu1 %v11782_v38  ;;  %10092 = vmatprep.mubr.msk.f32.mxu1 %vm11258_vm1, %v11259_v54 }
0x1d2e   :  { %10842 = vmatprep.subr.bf16.mxu1 %v11257_v31 }
0x1d31   :  { %10844 = vmatpush3.bf16.msra.mxu1 %v11788_v47 }
0x1d32   :  { %10881 = vmatprep.subr.bf16.mxu1 %v11257_v31 }
0x1d34   :  { %10093 = vmatmul.mubr.f32.vlgmr.msra.gmra.mrb[54].mxu1 %v5783_v2 }
0x1d35   :  { %10883 = vmatpush3.bf16.msra.mxu1 %v11782_v38  ;;  %10169 = vmatprep.mubr.msk.f32.mxu1 %vm11258_vm1, %v11259_v54 }
0x1d36   :  { %10884 = vmatprep.subr.bf16.mxu1 %v11257_v31 }
0x1d39   :  { %10886 = vmatpush3.bf16.msra.mxu1 %v11788_v47 }
0x1d3a   :  { %10887 = vmatprep.subr.bf16.mxu1 %v11257_v31 }
0x1e07   :  { %v6195_v60 = vpop.f32.mrb[54].mxu1 }
0x1e08   :  { %v11031_v61 = vadd.f32 %v11847_v14, %v6195_v60  ;;  %v10094_v62 = vpop.f32.mrb[55].mxu1 }
0x1e0a   :  { %11194 = vtanh.f32 %v11031_v61  ;;  %v6199_v11 = vmul.f32 0.5, %v11031_v61 }
0x1e0c   :  { %11196 = vtanh.f32 %v6199_v11 }
0x1e14   :  { %v11195_v10 = vpop.eup %11194 }
0x1e15   :  { %6206 = vrot.lane.b32.xlu0 %v11195_v10, %s11260_s2 }
0x1e16   :  { %v11197_v12 = vpop.eup %11196 }
0x1e17   :  { %v6201_v13 = vadd.f32 1.0, %v11197_v12 }
0x1e19   :  { %v6202_v15 = vmul.f32 0.5, %v6201_v13 }
0x1e1b   :  { %v6204_v63 = vmul.f32 %v6202_v15, %v11902_v52 }
0x1e87   :  { %v6207_v16 = vpop.permute.xlu0 %6206 }
0x1e88   :  { %v6209_v17 = vmul.f32 %v6207_v16, %v6202_v15 }
0x1e8a   :  { %6211 = vrot.lane.b32.xlu1 %v6209_v17, %s11261_s25 }
0x1efc   :  { %v6212_v18 = vpop.permute.xlu1 %6211 }
0x1efd   :  { %v11951_v19 = vadd.f32 %v6212_v18, %v6204_v63 }
0x1eff   :  { %11198 = vtanh.f32 %v11951_v19 }
0x1f09   :  { %v11199_v20 = vpop.eup %11198 }
0x1f0a   :  { %6217 = vrot.lane.b32.xlu0 %v11199_v20, %s11260_s2 }
0x1f7c   :  { %v6218_v21 = vpop.permute.xlu0 %6217 }
0x1f7d   :  { %v11955_v22 = vmul.f32 %v6218_v21, %v6202_v15 }
0x1f7f   :  { %6222 = vrot.lane.b32.xlu1 %v11955_v22, %s11261_s25 }
0x1ff1   :  { %v6223_v23 = vpop.permute.xlu1 %6222 }
0x1ff2   :  { %v6224_v24 = vsel %vm569_vm2, %v6223_v23, 0 }
0x1ff3   :  { %v6295_v25 = vand.u32 4294901760, %v6224_v24 }
0x1ff5   :  { %v6296_v27 = vsub.f32 %v6224_v24, %v6295_v25 }
0x1ff7   :  { %v6297_v55 = vand.u32 4294901760, %v6296_v27 }
0x1ff9   :  { %v6298_v28 = vsub.f32 %v6296_v27, %v6297_v55 }
0x1ffb   :  { %v6299_v29 = vand.u32 4294901760, %v6298_v28 }
0x1ffd   :  { %10104 = vmatmul.mubr.f32.vlgmr.msra.gmra.mrb[50].mxu0 %v6299_v29 }
0x1ffe   :  { %10853 = vmatpush3.bf16.msra.mxu0 %v11794_v1  ;;  %10114 = vmatprep.mubr.msk.f32.mxu0 %vm11258_vm1, %v11259_v54 }
0x1fff   :  { %10854 = vmatprep.subr.bf16.mxu0 %v11257_v31 }
0x2002   :  { %10856 = vmatpush3.bf16.msra.mxu0 %v11797_v7 }
0x2003   :  { %10857 = vmatprep.subr.bf16.mxu0 %v11257_v31 }
0x2005   :  { %10115 = vmatmul.mubr.f32.vlgmr.msra.gmra.mrb[50].mxu0 %v6295_v25 }
0x2006   :  { %10859 = vmatpush3.bf16.msra.mxu0 %v11799_v8  ;;  %10125 = vmatprep.mubr.msk.f32.mxu0 %vm11258_vm1, %v11259_v54 }
0x2007   :  { %10860 = vmatprep.subr.bf16.mxu0 %v11257_v31 }
0x200a   :  { %10862 = vmatpush3.bf16.msra.mxu0 %v11801_v9 }
0x200b   :  { %10863 = vmatprep.subr.bf16.mxu0 %v11257_v31 }
0x200d   :  { %10126 = vmatmul.mubr.f32.vlgmr.msra.gmra.mrb[50].mxu0 %v6296_v27 }
0x200e   :  { %10865 = vmatpush3.bf16.msra.mxu0 %v11782_v38  ;;  %10136 = vmatprep.mubr.msk.f32.mxu0 %vm11258_vm1, %v11259_v54 }
0x200f   :  { %10866 = vmatprep.subr.bf16.mxu0 %v11257_v31 }
0x2012   :  { %10868 = vmatpush3.bf16.msra.mxu0 %v11788_v47 }
0x2013   :  { %10869 = vmatprep.subr.bf16.mxu0 %v11257_v31 }
0x2015   :  { %10137 = vmatmul.mubr.f32.vlgmr.msra.gmra.mrb[50].mxu0 %v6297_v55 }
0x2016   :  { %10871 = vmatpush3.bf16.msra.mxu0 %v11803_v26  ;;  %10147 = vmatprep.mubr.msk.f32.mxu0 %vm11258_vm1, %v11259_v54 }
0x2017   :  { %10872 = vmatprep.subr.bf16.mxu0 %v11257_v31 }
0x201a   :  { %10874 = vmatpush3.bf16.msra.mxu0 %v11805_v49 }
0x201b   :  { %10875 = vmatprep.subr.bf16.mxu0 %v11257_v31 }
0x201d   :  { %10148 = vmatmul.mubr.f32.vlgmr.msra.gmra.mrb[50].mxu0 %v6295_v25 }
0x201e   :  { %10877 = vmatpush3.bf16.msra.mxu0 %v11782_v38  ;;  %10158 = vmatprep.mubr.msk.f32.mxu0 %vm11258_vm1, %v11259_v54 }
0x201f   :  { %10878 = vmatprep.subr.bf16.mxu0 %v11257_v31 }
0x2022   :  { %10880 = vmatpush3.bf16.msra.mxu0 %v11788_v47 }
0x2023   :  { %10917 = vmatprep.subr.bf16.mxu0 %v11257_v31 }
0x2025   :  { %10159 = vmatmul.mubr.f32.vlgmr.msra.gmra.mrb[50].mxu0 %v6295_v25 }
0x2026   :  { %10919 = vmatpush3.bf16.msra.mxu0 %v11782_v38  ;;  %10235 = vmatprep.mubr.msk.f32.mxu0 %vm11258_vm1, %v11259_v54 }
0x2027   :  { %10920 = vmatprep.subr.bf16.mxu0 %v11257_v31 }
0x202a   :  { %10922 = vmatpush3.bf16.msra.mxu0 %v11788_v47 }
0x202b   :  { %10923 = vmatprep.subr.bf16.mxu0 %v11257_v31 }
0x20f8   :  { %v6707_v30 = vpop.f32.mrb[50].mxu0 }
0x20f9   :  { %v11032_v33 = vadd.f32 %v11847_v14, %v6707_v30  ;;  %v10160_v34 = vpop.f32.mrb[51].mxu0 }
0x20fb   :  { %11200 = vtanh.f32 %v11032_v33  ;;  %v6711_v35 = vmul.f32 0.5, %v11032_v33 }
0x20fd   :  { %11202 = vtanh.f32 %v6711_v35 }
0x2105   :  { %v11201_v32 = vpop.eup %11200 }
0x2106   :  { %6718 = vrot.lane.b32.xlu0 %v11201_v32, %s11260_s2 }
0x2107   :  { %v11203_v36 = vpop.eup %11202 }
0x2108   :  { %v6713_v37 = vadd.f32 1.0, %v11203_v36 }
0x210a   :  { %v6714_v39 = vmul.f32 0.5, %v6713_v37 }
0x210c   :  { %v6716_v42 = vmul.f32 %v6714_v39, %v11951_v19 }
0x2178   :  { %v6719_v40 = vpop.permute.xlu0 %6718 }
0x2179   :  { %v6721_v41 = vmul.f32 %v6719_v40, %v6714_v39 }
0x217b   :  { %6723 = vrot.lane.b32.xlu1 %v6721_v41, %s11261_s25 }
0x21ed   :  { %v6724_v43 = vpop.permute.xlu1 %6723 }
0x21ee   :  { %v12000_v44 = vadd.f32 %v6724_v43, %v6716_v42 }
0x21f0   :  { %11204 = vtanh.f32 %v12000_v44 }
0x21fa   :  { %v11205_v45 = vpop.eup %11204 }
0x21fb   :  { %6729 = vrot.lane.b32.xlu0 %v11205_v45, %s11260_s2 }
0x226d   :  { %v6730_v46 = vpop.permute.xlu0 %6729 }
0x226e   :  { %v12004_v48 = vmul.f32 %v6730_v46, %v6714_v39 }
0x2270   :  { %6734 = vrot.lane.b32.xlu1 %v12004_v48, %s11261_s25 }
0x22e2   :  { %v6735_v50 = vpop.permute.xlu1 %6734 }
0x22e3   :  { %v6736_v51 = vsel %vm569_vm2, %v6735_v50, 0 }
0x22e4   :  { %v6807_v52 = vand.u32 4294901760, %v6736_v51 }
0x22e6   :  { %v6808_v53 = vsub.f32 %v6736_v51, %v6807_v52 }
0x22e8   :  { %v6809_v56 = vand.u32 4294901760, %v6808_v53 }
0x22ea   :  { %v6810_v59 = vsub.f32 %v6808_v53, %v6809_v56 }
0x22ec   :  { %v6811_v0 = vand.u32 4294901760, %v6810_v59 }
0x22ee   :  { %10170 = vmatmul.mubr.f32.vlgmr.msra.gmra.mrb[56].mxu1 %v6811_v0 }
0x22ef   :  { %10889 = vmatpush3.bf16.msra.mxu1 %v11794_v1  ;;  %10180 = vmatprep.mubr.msk.f32.mxu1 %vm11258_vm1, %v11259_v54 }
0x22f0   :  { %10890 = vmatprep.subr.bf16.mxu1 %v11257_v31 }
0x22f3   :  { %10892 = vmatpush3.bf16.msra.mxu1 %v11797_v7 }
0x22f4   :  { %10893 = vmatprep.subr.bf16.mxu1 %v11257_v31 }
0x22f6   :  { %10181 = vmatmul.mubr.f32.vlgmr.msra.gmra.mrb[56].mxu1 %v6807_v52 }
0x22f7   :  { %10895 = vmatpush3.bf16.msra.mxu1 %v11799_v8  ;;  %10191 = vmatprep.mubr.msk.f32.mxu1 %vm11258_vm1, %v11259_v54 }
0x22f8   :  { %10896 = vmatprep.subr.bf16.mxu1 %v11257_v31 }
0x22fb   :  { %10898 = vmatpush3.bf16.msra.mxu1 %v11801_v9 }
0x22fc   :  { %10899 = vmatprep.subr.bf16.mxu1 %v11257_v31 }
0x22fe   :  { %10192 = vmatmul.mubr.f32.vlgmr.msra.gmra.mrb[56].mxu1 %v6808_v53 }
0x22ff   :  { %10901 = vmatpush3.bf16.msra.mxu1 %v11782_v38  ;;  %10202 = vmatprep.mubr.msk.f32.mxu1 %vm11258_vm1, %v11259_v54 }
0x2300   :  { %10902 = vmatprep.subr.bf16.mxu1 %v11257_v31 }
0x2303   :  { %10904 = vmatpush3.bf16.msra.mxu1 %v11788_v47 }
0x2304   :  { %10905 = vmatprep.subr.bf16.mxu1 %v11257_v31 }
0x2306   :  { %10203 = vmatmul.mubr.f32.vlgmr.msra.gmra.mrb[56].mxu1 %v6809_v56 }
0x2307   :  { %10907 = vmatpush3.bf16.msra.mxu1 %v11803_v26  ;;  %10213 = vmatprep.mubr.msk.f32.mxu1 %vm11258_vm1, %v11259_v54 }
0x2308   :  { %10908 = vmatprep.subr.bf16.mxu1 %v11257_v31 }
0x230b   :  { %10910 = vmatpush3.bf16.msra.mxu1 %v11805_v49 }
0x230c   :  { %10911 = vmatprep.subr.bf16.mxu1 %v11257_v31 }
0x230e   :  { %10214 = vmatmul.mubr.f32.vlgmr.msra.gmra.mrb[56].mxu1 %v6807_v52 }
0x230f   :  { %10913 = vmatpush3.bf16.msra.mxu1 %v11782_v38  ;;  %10224 = vmatprep.mubr.msk.f32.mxu1 %vm11258_vm1, %v11259_v54 }
0x2310   :  { %10914 = vmatprep.subr.bf16.mxu1 %v11257_v31 }
0x2313   :  { %10916 = vmatpush3.bf16.msra.mxu1 %v11788_v47 }
0x2314   :  { %10953 = vmatprep.subr.bf16.mxu1 %v11257_v31 }
0x2316   :  { %10225 = vmatmul.mubr.f32.vlgmr.msra.gmra.mrb[56].mxu1 %v6807_v52 }
0x2317   :  { %10955 = vmatpush3.bf16.msra.mxu1 %v11782_v38  ;;  %10301 = vmatprep.mubr.msk.f32.mxu1 %vm11258_vm1, %v11259_v54 }
0x2318   :  { %10956 = vmatprep.subr.bf16.mxu1 %v11257_v31 }
0x231b   :  { %10958 = vmatpush3.bf16.msra.mxu1 %v11788_v47 }
0x231c   :  { %10959 = vmatprep.subr.bf16.mxu1 %v11257_v31 }
0x23e9   :  { %v7219_v2 = vpop.f32.mrb[56].mxu1 }
0x23ea   :  { %v11033_v3 = vadd.f32 %v11847_v14, %v7219_v2  ;;  %v10226_v4 = vpop.f32.mrb[57].mxu1 }
0x23ec   :  { %11206 = vtanh.f32 %v11033_v3  ;;  %v7223_v6 = vmul.f32 0.5, %v11033_v3 }
0x23ee   :  { %11208 = vtanh.f32 %v7223_v6 }
0x23f6   :  { %v11207_v5 = vpop.eup %11206 }
0x23f7   :  { %7230 = vrot.lane.b32.xlu0 %v11207_v5, %s11260_s2 }
0x23f8   :  { %v11209_v60 = vpop.eup %11208 }
0x23f9   :  { %v7225_v61 = vadd.f32 1.0, %v11209_v60 }
0x23fb   :  { %v7226_v62 = vmul.f32 0.5, %v7225_v61 }
0x23fd   :  { %v7228_v12 = vmul.f32 %v7226_v62, %v12000_v44 }
0x2469   :  { %v7231_v10 = vpop.permute.xlu0 %7230 }
0x246a   :  { %v7233_v11 = vmul.f32 %v7231_v10, %v7226_v62 }
0x246c   :  { %7235 = vrot.lane.b32.xlu1 %v7233_v11, %s11261_s25 }
0x24de   :  { %v7236_v13 = vpop.permute.xlu1 %7235 }
0x24df   :  { %v12049_v15 = vadd.f32 %v7236_v13, %v7228_v12 }
0x24e1   :  { %11210 = vtanh.f32 %v12049_v15 }
0x24eb   :  { %v11211_v16 = vpop.eup %11210 }
0x24ec   :  { %7241 = vrot.lane.b32.xlu0 %v11211_v16, %s11260_s2 }
0x255e   :  { %v7242_v17 = vpop.permute.xlu0 %7241 }
0x255f   :  { %v7244_v63 = vmul.f32 %v7242_v17, %v7226_v62 }
0x2561   :  { %7246 = vrot.lane.b32.xlu1 %v7244_v63, %s11261_s25 }
0x25d3   :  { %v12054_v18 = vpop.permute.xlu1 %7246 }
0x25d4   :  { %v7248_v19 = vsel %vm569_vm2, %v12054_v18, 0 }
0x25d5   :  { %v7319_v20 = vand.u32 4294901760, %v7248_v19 }
0x25d7   :  { %v7320_v21 = vsub.f32 %v7248_v19, %v7319_v20 }
0x25d9   :  { %v7321_v23 = vand.u32 4294901760, %v7320_v21 }
0x25db   :  { %v7322_v24 = vsub.f32 %v7320_v21, %v7321_v23 }
0x25dd   :  { %v7323_v25 = vand.u32 4294901760, %v7322_v24 }
0x25df   :  { %10236 = vmatmul.mubr.f32.vlgmr.msra.gmra.mrb[52].mxu0 %v7323_v25 }
0x25e0   :  { %10925 = vmatpush3.bf16.msra.mxu0 %v11794_v1  ;;  %10246 = vmatprep.mubr.msk.f32.mxu0 %vm11258_vm1, %v11259_v54 }
0x25e1   :  { %10926 = vmatprep.subr.bf16.mxu0 %v11257_v31 }
0x25e4   :  { %10928 = vmatpush3.bf16.msra.mxu0 %v11797_v7 }
0x25e5   :  { %10929 = vmatprep.subr.bf16.mxu0 %v11257_v31 }
0x25e7   :  { %10247 = vmatmul.mubr.f32.vlgmr.msra.gmra.mrb[52].mxu0 %v7319_v20 }
0x25e8   :  { %10931 = vmatpush3.bf16.msra.mxu0 %v11799_v8  ;;  %10257 = vmatprep.mubr.msk.f32.mxu0 %vm11258_vm1, %v11259_v54 }
0x25e9   :  { %10932 = vmatprep.subr.bf16.mxu0 %v11257_v31 }
0x25ec   :  { %10934 = vmatpush3.bf16.msra.mxu0 %v11801_v9 }
0x25ed   :  { %10935 = vmatprep.subr.bf16.mxu0 %v11257_v31 }
0x25ef   :  { %10258 = vmatmul.mubr.f32.vlgmr.msra.gmra.mrb[52].mxu0 %v7320_v21 }
0x25f0   :  { %10937 = vmatpush3.bf16.msra.mxu0 %v11782_v38  ;;  %10268 = vmatprep.mubr.msk.f32.mxu0 %vm11258_vm1, %v11259_v54 }
0x25f1   :  { %10938 = vmatprep.subr.bf16.mxu0 %v11257_v31 }
0x25f4   :  { %10940 = vmatpush3.bf16.msra.mxu0 %v11788_v47 }
0x25f5   :  { %10941 = vmatprep.subr.bf16.mxu0 %v11257_v31 }
0x25f7   :  { %10269 = vmatmul.mubr.f32.vlgmr.msra.gmra.mrb[52].mxu0 %v7321_v23 }
0x25f8   :  { %10943 = vmatpush3.bf16.msra.mxu0 %v11803_v26  ;;  %10279 = vmatprep.mubr.msk.f32.mxu0 %vm11258_vm1, %v11259_v54 }
0x25f9   :  { %10944 = vmatprep.subr.bf16.mxu0 %v11257_v31 }
0x25fc   :  { %10946 = vmatpush3.bf16.msra.mxu0 %v11805_v49 }
0x25fd   :  { %10947 = vmatprep.subr.bf16.mxu0 %v11257_v31 }
0x25ff   :  { %10280 = vmatmul.mubr.f32.vlgmr.msra.gmra.mrb[52].mxu0 %v7319_v20 }
0x2600   :  { %10949 = vmatpush3.bf16.msra.mxu0 %v11782_v38  ;;  %10290 = vmatprep.mubr.msk.f32.mxu0 %vm11258_vm1, %v11259_v54 }
0x2601   :  { %10950 = vmatprep.subr.bf16.mxu0 %v11257_v31 }
0x2604   :  { %10952 = vmatpush3.bf16.msra.mxu0 %v11788_v47 }
0x2605   :  { %10989 = vmatprep.subr.bf16.mxu0 %v11257_v31 }
0x2607   :  { %10291 = vmatmul.mubr.f32.vlgmr.msra.gmra.mrb[52].mxu0 %v7319_v20 }
0x2608   :  { %10991 = vmatpush3.bf16.msra.mxu0 %v11782_v38  ;;  %10367 = vmatprep.mubr.msk.f32.mxu0 %vm11258_vm1, %v11259_v54 }
0x2609   :  { %10992 = vmatprep.subr.bf16.mxu0 %v11257_v31 }
0x260c   :  { %10994 = vmatpush3.bf16.msra.mxu0 %v11788_v47 }
0x260d   :  { %10995 = vmatprep.subr.bf16.mxu0 %v11257_v31 }
0x26da   :  { %v7731_v27 = vpop.f32.mrb[52].mxu0 }
0x26db   :  { %v11034_v55 = vadd.f32 %v11847_v14, %v7731_v27  ;;  %v10292_v28 = vpop.f32.mrb[53].mxu0 }
0x26dd   :  { %11212 = vtanh.f32 %v11034_v55  ;;  %v7735_v30 = vmul.f32 0.5, %v11034_v55 }
0x26df   :  { %11214 = vtanh.f32 %v7735_v30 }
0x26e7   :  { %v11213_v29 = vpop.eup %11212 }
0x26e8   :  { %7742 = vrot.lane.b32.xlu0 %v11213_v29, %s11260_s2 }
0x26e9   :  { %v11215_v33 = vpop.eup %11214 }
0x26ea   :  { %v7737_v34 = vadd.f32 1.0, %v11215_v33 }
0x26ec   :  { %v7738_v32 = vmul.f32 0.5, %v7737_v34 }
0x26ee   :  { %v7740_v37 = vmul.f32 %v7738_v32, %v12049_v15 }
0x275a   :  { %v7743_v35 = vpop.permute.xlu0 %7742 }
0x275b   :  { %v7745_v36 = vmul.f32 %v7743_v35, %v7738_v32 }
0x275d   :  { %7747 = vrot.lane.b32.xlu1 %v7745_v36, %s11261_s25 }
0x27cf   :  { %v7748_v39 = vpop.permute.xlu1 %7747 }
0x27d0   :  { %v7750_v40 = vadd.f32 %v7748_v39, %v7740_v37 }
0x27d2   :  { %11216 = vtanh.f32 %v7750_v40 }
0x27dc   :  { %v11217_v41 = vpop.eup %11216 }
0x27dd   :  { %7753 = vrot.lane.b32.xlu0 %v11217_v41, %s11260_s2 }
0x284f   :  { %v7754_v42 = vpop.permute.xlu0 %7753 }
0x2850   :  { %v12099_v43 = vmul.f32 %v7754_v42, %v7738_v32 }
0x2852   :  { %7758 = vrot.lane.b32.xlu1 %v12099_v43, %s11261_s25 }
0x28c4   :  { %v7759_v44 = vpop.permute.xlu1 %7758 }
0x28c5   :  { %v7760_v45 = vsel %vm569_vm2, %v7759_v44, 0 }
0x28c6   :  { %v7831_v46 = vand.u32 4294901760, %v7760_v45 }
0x28c8   :  { %v7832_v50 = vsub.f32 %v7760_v45, %v7831_v46 }
0x28ca   :  { %v7833_v51 = vand.u32 4294901760, %v7832_v50 }
0x28cc   :  { %v7834_v52 = vsub.f32 %v7832_v50, %v7833_v51 }
0x28ce   :  { %v7835_v53 = vand.u32 4294901760, %v7834_v52 }
0x28d0   :  { %10302 = vmatmul.mubr.f32.vlgmr.msra.gmra.mrb[58].mxu1 %v7835_v53 }
0x28d1   :  { %10961 = vmatpush3.bf16.msra.mxu1 %v11794_v1  ;;  %10312 = vmatprep.mubr.msk.f32.mxu1 %vm11258_vm1, %v11259_v54 }
0x28d2   :  { %10962 = vmatprep.subr.bf16.mxu1 %v11257_v31 }
0x28d5   :  { %10964 = vmatpush3.bf16.msra.mxu1 %v11797_v7 }
0x28d6   :  { %10965 = vmatprep.subr.bf16.mxu1 %v11257_v31 }
0x28d8   :  { %10313 = vmatmul.mubr.f32.vlgmr.msra.gmra.mrb[58].mxu1 %v7831_v46 }
0x28d9   :  { %10967 = vmatpush3.bf16.msra.mxu1 %v11799_v8  ;;  %10323 = vmatprep.mubr.msk.f32.mxu1 %vm11258_vm1, %v11259_v54 }
0x28da   :  { %10968 = vmatprep.subr.bf16.mxu1 %v11257_v31 }
0x28dd   :  { %10970 = vmatpush3.bf16.msra.mxu1 %v11801_v9 }
0x28de   :  { %10971 = vmatprep.subr.bf16.mxu1 %v11257_v31 }
0x28e0   :  { %10324 = vmatmul.mubr.f32.vlgmr.msra.gmra.mrb[58].mxu1 %v7832_v50 }
0x28e1   :  { %10973 = vmatpush3.bf16.msra.mxu1 %v11782_v38  ;;  %10334 = vmatprep.mubr.msk.f32.mxu1 %vm11258_vm1, %v11259_v54 }
0x28e2   :  { %10974 = vmatprep.subr.bf16.mxu1 %v11257_v31 }
0x28e5   :  { %10976 = vmatpush3.bf16.msra.mxu1 %v11788_v47 }
0x28e6   :  { %10977 = vmatprep.subr.bf16.mxu1 %v11257_v31 }
0x28e8   :  { %10335 = vmatmul.mubr.f32.vlgmr.msra.gmra.mrb[58].mxu1 %v7833_v51 }
0x28e9   :  { %10979 = vmatpush3.bf16.msra.mxu1 %v11803_v26  ;;  %10345 = vmatprep.mubr.msk.f32.mxu1 %vm11258_vm1, %v11259_v54 }
0x28ea   :  { %10980 = vmatprep.subr.bf16.mxu1 %v11257_v31 }
0x28ed   :  { %10982 = vmatpush3.bf16.msra.mxu1 %v11805_v49 }
0x28ee   :  { %10983 = vmatprep.subr.bf16.mxu1 %v11257_v31 }
0x28f0   :  { %10346 = vmatmul.mubr.f32.vlgmr.msra.gmra.mrb[58].mxu1 %v7831_v46 }
0x28f1   :  { %10985 = vmatpush3.bf16.msra.mxu1 %v11782_v38  ;;  %10356 = vmatprep.mubr.msk.f32.mxu1 %vm11258_vm1, %v11259_v54 }
0x28f2   :  { %10986 = vmatprep.subr.bf16.mxu1 %v11257_v31 }
0x28f5   :  { %10988 = vmatpush3.bf16.msra.mxu1 %v11788_v47 }
0x28f8   :  { %10357 = vmatmul.mubr.f32.vlgmr.msra.gmra.mrb[58].mxu1 %v7831_v46 }
0x29cb   :  { %v8243_v56 = vpop.f32.mrb[58].mxu1 }
0x29cc   :  { %v11035_v59 = vadd.f32 %v11847_v14, %v8243_v56  ;;  %v10358_v0 = vpop.f32.mrb[59].mxu1 }
0x29ce   :  { %11218 = vtanh.f32 %v11035_v59  ;;  %v8247_v3 = vmul.f32 0.5, %v11035_v59 }
0x29d0   :  { %11220 = vtanh.f32 %v8247_v3 }
0x29d8   :  { %v11219_v2 = vpop.eup %11218 }
0x29d9   :  { %8254 = vrot.lane.b32.xlu0 %v11219_v2, %s11260_s2 }
0x29da   :  { %v11221_v4 = vpop.eup %11220 }
0x29db   :  { %v8249_v5 = vadd.f32 1.0, %v11221_v4 }
0x29dd   :  { %v8250_v6 = vmul.f32 0.5, %v8249_v5 }
0x29df   :  { %v8252_v62 = vmul.f32 %v8250_v6, %v7750_v40 }
0x2a4b   :  { %v8255_v60 = vpop.permute.xlu0 %8254 }
0x2a4c   :  { %v8257_v61 = vmul.f32 %v8255_v60, %v8250_v6 }
0x2a4e   :  { %8259 = vrot.lane.b32.xlu1 %v8257_v61, %s11261_s25 }
0x2ac0   :  { %v8260_v10 = vpop.permute.xlu1 %8259 }
0x2ac1   :  { %v8262_v11 = vadd.f32 %v8260_v10, %v8252_v62 }
0x2ac3   :  { %11222 = vtanh.f32 %v8262_v11 }
0x2acd   :  { %v11223_v12 = vpop.eup %11222 }
0x2ace   :  { %8265 = vrot.lane.b32.xlu0 %v11223_v12, %s11260_s2 }
0x2b40   :  { %v8266_v13 = vpop.permute.xlu0 %8265 }
0x2b41   :  { %v8268_v15 = vmul.f32 %v8266_v13, %v8250_v6 }
0x2b43   :  { %8270 = vrot.lane.b32.xlu1 %v8268_v15, %s11261_s25 }
0x2bb5   :  { %v8271_v16 = vpop.permute.xlu1 %8270 }
0x2bb6   :  { %v8272_v17 = vsel %vm569_vm2, %v8271_v16, 0 }
0x2bb7   :  { %v8343_v63 = vand.u32 4294901760, %v8272_v17 }
0x2bb9   :  { %v8344_v19 = vsub.f32 %v8272_v17, %v8343_v63 }
0x2bbb   :  { %v8345_v20 = vand.u32 4294901760, %v8344_v19 }
0x2bbd   :  { %v8346_v21 = vsub.f32 %v8344_v19, %v8345_v20 }
0x2bbf   :  { %v8347_v23 = vand.u32 4294901760, %v8346_v21 }
0x2bc1   :  { %10368 = vmatmul.mubr.f32.vlgmr.msra.gmra.mrb[54].mxu0 %v8347_v23 }
0x2bc2   :  { %10997 = vmatpush3.bf16.msra.mxu0 %v11794_v1  ;;  %10378 = vmatprep.mubr.msk.f32.mxu0 %vm11258_vm1, %v11259_v54 }
0x2bc3   :  { %10998 = vmatprep.subr.bf16.mxu0 %v11257_v31 }
0x2bc6   :  { %11000 = vmatpush3.bf16.msra.mxu0 %v11797_v7 }
0x2bc7   :  { %11001 = vmatprep.subr.bf16.mxu0 %v11257_v31 }
0x2bc9   :  { %10379 = vmatmul.mubr.f32.vlgmr.msra.gmra.mrb[54].mxu0 %v8343_v63 }
0x2bca   :  { %11003 = vmatpush3.bf16.msra.mxu0 %v11799_v8  ;;  %10389 = vmatprep.mubr.msk.f32.mxu0 %vm11258_vm1, %v11259_v54 }
0x2bcb   :  { %11004 = vmatprep.subr.bf16.mxu0 %v11257_v31 }
0x2bce   :  { %11006 = vmatpush3.bf16.msra.mxu0 %v11801_v9 }
0x2bcf   :  { %11007 = vmatprep.subr.bf16.mxu0 %v11257_v31 }
0x2bd1   :  { %10390 = vmatmul.mubr.f32.vlgmr.msra.gmra.mrb[54].mxu0 %v8344_v19 }
0x2bd2   :  { %11009 = vmatpush3.bf16.msra.mxu0 %v11782_v38  ;;  %10400 = vmatprep.mubr.msk.f32.mxu0 %vm11258_vm1, %v11259_v54 }
0x2bd3   :  { %11010 = vmatprep.subr.bf16.mxu0 %v11257_v31 }
0x2bd6   :  { %11012 = vmatpush3.bf16.msra.mxu0 %v11788_v47 }
0x2bd7   :  { %11013 = vmatprep.subr.bf16.mxu0 %v11257_v31 }
0x2bd9   :  { %10401 = vmatmul.mubr.f32.vlgmr.msra.gmra.mrb[54].mxu0 %v8345_v20 }
0x2bda   :  { %11015 = vmatpush3.bf16.msra.mxu0 %v11803_v26  ;;  %10411 = vmatprep.mubr.msk.f32.mxu0 %vm11258_vm1, %v11259_v54 }
0x2bdb   :  { %11016 = vmatprep.subr.bf16.mxu0 %v11257_v31 }
0x2bde   :  { %11018 = vmatpush3.bf16.msra.mxu0 %v11805_v49 }
0x2bdf   :  { %11019 = vmatprep.subr.bf16.mxu0 %v11257_v31 }
0x2be1   :  { %10412 = vmatmul.mubr.f32.vlgmr.msra.gmra.mrb[54].mxu0 %v8343_v63 }
0x2be2   :  { %11021 = vmatpush3.bf16.msra.mxu0 %v11782_v38  ;;  %10422 = vmatprep.mubr.msk.f32.mxu0 %vm11258_vm1, %v11259_v54 }
0x2be3   :  { %11022 = vmatprep.subr.bf16.mxu0 %v11257_v31 }
0x2be6   :  { %11024 = vmatpush3.bf16.msra.mxu0 %v11788_v47 }
0x2be9   :  { %10423 = vmatmul.mubr.f32.vlgmr.msra.gmra.mrb[54].mxu0 %v8343_v63 }
0x2cbc   :  { %v8755_v1 = vpop.f32.mrb[54].mxu0 }
0x2cbd   :  { %v11036_v7 = vadd.f32 %v11847_v14, %v8755_v1  ;;  %v10424_v8 = vpop.f32.mrb[55].mxu0 }
0x2cbf   :  { %11224 = vtanh.f32 %v11036_v7  ;;  %v8759_v38 = vmul.f32 0.5, %v11036_v7 }
0x2cc1   :  { %11226 = vtanh.f32 %v8759_v38 }
0x2cc9   :  { %v11225_v9 = vpop.eup %11224 }
0x2cca   :  { %8766 = vrot.lane.b32.xlu0 %v11225_v9, %s11260_s2 }
0x2ccb   :  { %v11227_v26 = vpop.eup %11226 }
0x2ccc   :  { %v8761_v54 = vadd.f32 1.0, %v11227_v26 }
0x2cce   :  { %8789 = vrot.lane.b32.xlu0 %v12099_v43, %s11260_s2  ;;  %v8762_v49 = vmul.f32 0.5, %v8761_v54 }
0x2cd0   :  { %v8764_v47 = vmul.f32 %v8762_v49, %v8262_v11 }
0x2d3c   :  { %v8767_v31 = vpop.permute.xlu0 %8766 }
0x2d3d   :  { %v8769_v24 = vmul.f32 %v8767_v31, %v8762_v49 }
0x2d3f   :  { %8771 = vrot.lane.b32.xlu1 %v8769_v24, %s11261_s25 }
0x2d40   :  { %v8790_v28 = vpop.permute.xlu0 %8789 }
0x2d43   :  { %8782 = vrot.lane.b32.xlu1 %v11906_v57, %s11260_s2 }
0x2d47   :  { %8785 = vrot.lane.b32.xlu1 %v11955_v22, %s11262_s5  ;;  %v8800_v22 = vsel %vm569_vm2, %v12054_v18, %v8790_v28 }
0x2db1   :  { %v8772_v14 = vpop.permute.xlu1 %8771 }
0x2db2   :  { %v8774_v25 = vadd.f32 %v8772_v14, %v8764_v47 }
0x2db4   :  { %11228 = vtanh.f32 %v8774_v25 }
0x2db5   :  { %v8783_v55 = vpop.permute.xlu1 %8782 }
0x2db6   :  { %v8795_v33 = vsel %vm569_vm2, %v11858_v58, %v8783_v55 }
0x2db9   :  { %v8786_v29 = vpop.permute.xlu1 %8785 }
0x2dba   :  { %v8797_v57 = vsel %vm8796_vm3, %v8795_v33, %v8786_v29 }
0x2dbb   :  { %v8799_v36 = vsel %vm8798_vm4, %v8797_v57, %v12004_v48 }
0x2dbe   :  { %v11229_v27 = vpop.eup %11228 }
0x2dbf   :  { %8777 = vrot.lane.b32.xlu0 %v11229_v27, %s11260_s2 }
0x2dc3   :  { %8792 = vrot.lane.b32.xlu0 %v8268_v15, %s11262_s5 }
0x2e31   :  { %v8778_v30 = vpop.permute.xlu0 %8777 }
0x2e32   :  { %v8780_v34 = vmul.f32 %v8778_v30, %v8762_v49 }
0x2e35   :  { %v8793_v32 = vpop.permute.xlu0 %8792 }
0x2e36   :  { %v8801_v35 = vsel %vm8796_vm3, %v8800_v22, %v8793_v32 }
0x2e37   :  { %v8802_v37 = vsel %vm8798_vm4, %v8801_v35, %v8780_v34 }
0x2e38   :  { %v8805_v39 = vcombine.low %v8799_v36, %v8802_v37 }
0x2e3a   :  { %8822 = vst.sshfl [vmem:[%s12191_s6] sm:$0x33 pattern:$0x76325410] %v8805_v39 }
0x2e3b   :  { %8819 = vsyncpa [#allocation4], 1 }

</bundles_post_ra>
